<compile_context>
chip_gen: v7x
topology: tpu7x:2x2x1
jax: 0.10.0
libtpu: 0.0.40
codegen_flags: <defaults>
</compile_context>

<pallas_src>
import functools

import jax
import jax.numpy as jnp
from jax.experimental import pallas as pl
from jax.experimental.pallas import tpu as pltpu


def mha_kernel(x_ref, wqkv_ref, bqkv_ref, wo_ref, bo_ref, gamma_ref, o_ref, *,
               batch_tile, seq_len, num_heads, head_dim, scale):
    C = num_heads * head_dim

    # x block: (batch_tile * N, C) tokens, image-major.
    x = x_ref[...]

    # Fused QKV projection: one (M, C) @ (C, 3C) matmul + one bias broadcast.
    qkv = jnp.dot(x, wqkv_ref[...], preferred_element_type=jnp.float32) + bqkv_ref[...]
    qkv = qkv.reshape(batch_tile, seq_len, 3 * C)      # leading-dim split only

    # Per-head scaled-dot-product attention, batched over the image tile.
    # Static (small) head loop; each einsum is a 3-D dot_general with the image as the
    # leading batch dim, contracting the last dim of K (no explicit transpose).
    head_outs = []
    for h in range(num_heads):
        lo = h * head_dim
        hi = lo + head_dim
        q_h = qkv[:, :, lo:hi] * scale                 # (Bt, N, hd), scale folded into Q
        k_h = qkv[:, :, C + lo:C + hi]                 # (Bt, N, hd)
        v_h = qkv[:, :, 2 * C + lo:2 * C + hi]         # (Bt, N, hd)

        s = jnp.einsum("bnd,bmd->bnm", q_h, k_h,
                       preferred_element_type=jnp.float32)          # (Bt, N, N)
        s = s - jnp.max(s, axis=-1, keepdims=True)
        p = jnp.exp(s)
        inv = pl.reciprocal(jnp.sum(p, axis=-1, keepdims=True), approx=False)
        p = p * inv
        head_outs.append(jnp.einsum("bnm,bmd->bnd", p, v_h,
                                    preferred_element_type=jnp.float32))  # (Bt, N, hd)

    attn = jnp.concatenate(head_outs, axis=-1)         # (Bt, N, C), heads repacked
    attn = attn.reshape(batch_tile * seq_len, C)       # leading-dim merge only

    # Output projection + gamma-gated residual.
    proj = jnp.dot(attn, wo_ref[...], preferred_element_type=jnp.float32) + bo_ref[...]
    gamma = gamma_ref[0]                               # scalar read from SMEM
    o_ref[...] = gamma * proj + x


def multi_head_attention(x, params, num_heads, batch_tile=None):
    """x: (B, C, W, H) float32 (NCHW, like the PyTorch module)."""
    B, C, W, H = x.shape
    assert C % num_heads == 0
    head_dim = C // num_heads
    scale = float(head_dim) ** -0.5
    N = W * H

    if batch_tile is None:
        # Several images per grid step to amortize per-step overhead, but keep at
        # least 2 grid steps when possible so both TensorCores (v7x) get work.
        batch_tile = min(8, max(1, B // 2)) if B > 1 else 1
    n_steps = (B + batch_tile - 1) // batch_tile
    B_pad = n_steps * batch_tile

    # NCHW -> token layout (B, N, C) -> flat 2-D slab (B*N, C).  N flattens (W, H)
    # row-major, matching torch's .view(B, heads, hd, W*H) flattening order.
    # TODO(synk): keep activations channel-major end-to-end to drop these wrapper-side
    # transposes for large feature maps.
    x_tok = jnp.transpose(x.reshape(B, C, N), (0, 2, 1)).astype(jnp.float32)
    x2d = x_tok.reshape(B * N, C)
    if B_pad != B:
        x2d = jnp.pad(x2d, ((0, (B_pad - B) * N), (0, 0)))

    # Conv weights are (C_out, C_in) (1x1 kernel squeezed); pass transposed for x @ W.T.
    # Fuse Q/K/V weights and biases so the projection is a single lane-dense matmul.
    w_qkv = jnp.concatenate(
        [params["wq"].T, params["wk"].T, params["wv"].T], axis=1)          # (C, 3C)
    b_qkv = jnp.concatenate(
        [params["bq"], params["bk"], params["bv"]]).reshape(1, 3 * C)      # (1, 3C)
    w_o = params["wo"].T                                                   # (C, C)
    b_o = params["bo"].reshape(1, C)
    gamma = params["gamma"].reshape(1).astype(jnp.float32)

    kernel = functools.partial(
        mha_kernel, batch_tile=batch_tile, seq_len=N,
        num_heads=num_heads, head_dim=head_dim, scale=scale)

    M = batch_tile * N
    const = lambda shape: pl.BlockSpec(shape, lambda i: (0, 0))

    out2d = pl.pallas_call(
        kernel,
        out_shape=jax.ShapeDtypeStruct((B_pad * N, C), jnp.float32),
        grid_spec=pltpu.PrefetchScalarGridSpec(
            num_scalar_prefetch=0,
            grid=(n_steps,),
            in_specs=[
                pl.BlockSpec((M, C), lambda i: (i, 0)),               # x token tile
                const((C, 3 * C)),                                    # fused Wqkv^T
                const((1, 3 * C)),                                    # fused bias
                const((C, C)),                                        # Wo^T
                const((1, C)),                                        # bo
                pl.BlockSpec(memory_space=pltpu.MemorySpace.SMEM),    # gamma scalar
            ],
            out_specs=pl.BlockSpec((M, C), lambda i: (i, 0)),
        ),
        compiler_params=pltpu.CompilerParams(
            dimension_semantics=("parallel",)),
    )(x2d, w_qkv, b_qkv, w_o, b_o, gamma)

    out_tok = out2d[:B * N].reshape(B, N, C)
    return jnp.transpose(out_tok, (0, 2, 1)).reshape(B, C, W, H)


def ref_forward(x, params, num_heads):
    """Pure-JAX reference mirroring the PyTorch forward exactly."""
    B, C, W, H = x.shape
    hd = C // num_heads
    scale = float(hd) ** -0.5

    def conv1x1(t, w, b):
        return jnp.einsum("oc,bcwh->bowh", w, t) + b[None, :, None, None]

    q = conv1x1(x, params["wq"], params["bq"]).reshape(B, num_heads, hd, W * H)
    k = conv1x1(x, params["wk"], params["bk"]).reshape(B, num_heads, hd, W * H)
    v = conv1x1(x, params["wv"], params["bv"]).reshape(B, num_heads, hd, W * H)
    q = jnp.transpose(q, (0, 1, 3, 2))
    att = jnp.matmul(q, k) * scale
    att = jax.nn.softmax(att, axis=-1)
    v = jnp.transpose(v, (0, 1, 3, 2))
    out = jnp.matmul(att, v)
    out = jnp.transpose(out, (0, 1, 3, 2)).reshape(B, C, W, H)
    out = conv1x1(out, params["wo"], params["bo"])
    return params["gamma"][0] * out + x


if __name__ == "__main__":
    B, C, W, H = 2, 64, 8, 8
    num_heads = 8  # head_dim = 8

    key = jax.random.PRNGKey(0)
    keys = jax.random.split(key, 10)

    # Deterministic synthetic parameters (PyTorch inits gamma to 0, which would hide
    # the attention path; use a nonzero gamma so the kernel math is exercised).
    params = {
        "wq": 0.1 * jax.random.normal(keys[0], (C, C), jnp.float32),
        "bq": 0.1 * jax.random.normal(keys[1], (C,), jnp.float32),
        "wk": 0.1 * jax.random.normal(keys[2], (C, C), jnp.float32),
        "bk": 0.1 * jax.random.normal(keys[3], (C,), jnp.float32),
        "wv": 0.1 * jax.random.normal(keys[4], (C, C), jnp.float32),
        "bv": 0.1 * jax.random.normal(keys[5], (C,), jnp.float32),
        "wo": 0.1 * jax.random.normal(keys[6], (C, C), jnp.float32),
        "bo": 0.1 * jax.random.normal(keys[7], (C,), jnp.float32),
        "gamma": jnp.array([0.5], jnp.float32),
    }

    x = jax.random.normal(keys[8], (B, C, W, H), jnp.float32)

    out = multi_head_attention(x, params, num_heads)
    out = jax.block_until_ready(out)

    ref = jax.block_until_ready(ref_forward(x, params, num_heads))
    assert out.shape == (B, C, W, H)
    assert jnp.allclose(out, ref, rtol=1e-4, atol=1e-4), float(jnp.max(jnp.abs(out - ref)))

    print("KERNEL_OK")
</pallas_src>

<mosaic_0001>
module attributes {stable_mosaic.version = 11 : i64} {
  func.func @mha_kernel(%arg0: i32, %arg1: memref<64x64xf32, #tpu.memory_space<vmem>>, %arg2: memref<64x192xf32, #tpu.memory_space<vmem>>, %arg3: memref<1x192xf32, #tpu.memory_space<vmem>>, %arg4: memref<64x64xf32, #tpu.memory_space<vmem>>, %arg5: memref<1x64xf32, #tpu.memory_space<vmem>>, %arg6: memref<1xf32, #tpu.memory_space<smem>>, %arg7: memref<64x64xf32, #tpu.memory_space<vmem>>) attributes {dimension_semantics = [#tpu.dimension_semantics<parallel>], iteration_bounds = array<i64: 2>, scalar_prefetch = 0 : i64, scratch_operands = 0 : i64, tpu.core_type = #tpu.core_type<tc>, window_params = [{transform_indices = @transform_0, window_bounds = array<i64: 64, 64>}, {pipeline_mode = #tpu.pipeline_mode<synchronous>, transform_indices = @transform_1, window_bounds = array<i64: 64, 192>}, {pipeline_mode = #tpu.pipeline_mode<synchronous>, transform_indices = @transform_2, window_bounds = array<i64: 1, 192>}, {pipeline_mode = #tpu.pipeline_mode<synchronous>, transform_indices = @transform_3, window_bounds = array<i64: 64, 64>}, {pipeline_mode = #tpu.pipeline_mode<synchronous>, transform_indices = @transform_4, window_bounds = array<i64: 1, 64>}, {transform_indices = @transform_5, window_bounds = array<i64: 1>}, {transform_indices = @transform_6, window_bounds = array<i64: 64, 64>}]} {
    %c0 = arith.constant 0 : index
    %c0_0 = arith.constant 0 : index
    %0 = vector.load %arg1[%c0, %c0_0] : memref<64x64xf32, #tpu.memory_space<vmem>>, vector<64x64xf32>
    %c0_1 = arith.constant 0 : index
    %c0_2 = arith.constant 0 : index
    %1 = vector.load %arg2[%c0_1, %c0_2] : memref<64x192xf32, #tpu.memory_space<vmem>>, vector<64x192xf32>
    %cst = arith.constant dense<0.000000e+00> : vector<64x192xf32>
    %2 = tpu.matmul %0, %1, %cst {dimension_numbers = #tpu.dot_dimension_numbers<[1], [0], [0], [1], [0, 0, 1, 1], [], []>} : vector<64x64xf32>, vector<64x192xf32>, vector<64x192xf32> -> vector<64x192xf32>
    %c0_3 = arith.constant 0 : index
    %c0_4 = arith.constant 0 : index
    %3 = vector.load %arg3[%c0_3, %c0_4] : memref<1x192xf32, #tpu.memory_space<vmem>>, vector<1x192xf32>
    %4 = vector.broadcast %3 : vector<1x192xf32> to vector<64x192xf32>
    %5 = arith.addf %2, %4 : vector<64x192xf32>
    %6 = vector.shape_cast %5 : vector<64x192xf32> to vector<1x64x192xf32>
    %7 = vector.extract_strided_slice %6 {offsets = [0, 0, 0], sizes = [1, 64, 8], strides = [1, 1, 1]} : vector<1x64x192xf32> to vector<1x64x8xf32>
    %cst_5 = arith.constant 0.353553385 : f32
    %8 = vector.broadcast %cst_5 : f32 to vector<1x64x8xf32>
    %9 = arith.mulf %7, %8 : vector<1x64x8xf32>
    %10 = vector.extract_strided_slice %6 {offsets = [0, 0, 64], sizes = [1, 64, 8], strides = [1, 1, 1]} : vector<1x64x192xf32> to vector<1x64x8xf32>
    %11 = vector.extract_strided_slice %6 {offsets = [0, 0, 128], sizes = [1, 64, 8], strides = [1, 1, 1]} : vector<1x64x192xf32> to vector<1x64x8xf32>
    "tpu.trace_start"() <{level = 10 : i32, message = "bnd,bmd->bnm"}> : () -> ()
    %cst_6 = arith.constant dense<0.000000e+00> : vector<1x64x64xf32>
    %12 = tpu.matmul %9, %10, %cst_6 {dimension_numbers = #tpu.dot_dimension_numbers<[2], [2], [1], [1], [0, 0, 0, 1, 1, 1], [0], [0]>} : vector<1x64x8xf32>, vector<1x64x8xf32>, vector<1x64x64xf32> -> vector<1x64x64xf32>
    "tpu.trace_stop"() : () -> ()
    %cst_7 = arith.constant dense<0xFF800000> : vector<1x64xf32>
    %13 = vector.multi_reduction <maximumf>, %12, %cst_7 [2] : vector<1x64x64xf32> to vector<1x64xf32>
    %14 = vector.shape_cast %13 : vector<1x64xf32> to vector<1x64x1xf32>
    %15 = vector.broadcast %14 : vector<1x64x1xf32> to vector<1x64x64xf32>
    %16 = arith.subf %12, %15 : vector<1x64x64xf32>
    %17 = math.exp %16 : vector<1x64x64xf32>
    %cst_8 = arith.constant dense<0.000000e+00> : vector<1x64xf32>
    %18 = vector.multi_reduction <add>, %17, %cst_8 [2] : vector<1x64x64xf32> to vector<1x64xf32>
    %19 = vector.shape_cast %18 : vector<1x64xf32> to vector<1x64x1xf32>
    %20 = tpu.reciprocal %19 : vector<1x64x1xf32> -> vector<1x64x1xf32>
    %21 = vector.broadcast %20 : vector<1x64x1xf32> to vector<1x64x64xf32>
    %22 = arith.mulf %17, %21 : vector<1x64x64xf32>
    "tpu.trace_start"() <{level = 10 : i32, message = "bnm,bmd->bnd"}> : () -> ()
    %cst_9 = arith.constant dense<0.000000e+00> : vector<1x64x8xf32>
    %23 = tpu.matmul %22, %11, %cst_9 {dimension_numbers = #tpu.dot_dimension_numbers<[2], [1], [1], [2], [0, 0, 0, 1, 1, 2], [0], [0]>} : vector<1x64x64xf32>, vector<1x64x8xf32>, vector<1x64x8xf32> -> vector<1x64x8xf32>
    "tpu.trace_stop"() : () -> ()
    %24 = vector.extract_strided_slice %6 {offsets = [0, 0, 8], sizes = [1, 64, 8], strides = [1, 1, 1]} : vector<1x64x192xf32> to vector<1x64x8xf32>
    %cst_10 = arith.constant 0.353553385 : f32
    %25 = vector.broadcast %cst_10 : f32 to vector<1x64x8xf32>
    %26 = arith.mulf %24, %25 : vector<1x64x8xf32>
    %27 = vector.extract_strided_slice %6 {offsets = [0, 0, 72], sizes = [1, 64, 8], strides = [1, 1, 1]} : vector<1x64x192xf32> to vector<1x64x8xf32>
    %28 = vector.extract_strided_slice %6 {offsets = [0, 0, 136], sizes = [1, 64, 8], strides = [1, 1, 1]} : vector<1x64x192xf32> to vector<1x64x8xf32>
    "tpu.trace_start"() <{level = 10 : i32, message = "bnd,bmd->bnm"}> : () -> ()
    %cst_11 = arith.constant dense<0.000000e+00> : vector<1x64x64xf32>
    %29 = tpu.matmul %26, %27, %cst_11 {dimension_numbers = #tpu.dot_dimension_numbers<[2], [2], [1], [1], [0, 0, 0, 1, 1, 1], [0], [0]>} : vector<1x64x8xf32>, vector<1x64x8xf32>, vector<1x64x64xf32> -> vector<1x64x64xf32>
    "tpu.trace_stop"() : () -> ()
    %cst_12 = arith.constant dense<0xFF800000> : vector<1x64xf32>
    %30 = vector.multi_reduction <maximumf>, %29, %cst_12 [2] : vector<1x64x64xf32> to vector<1x64xf32>
    %31 = vector.shape_cast %30 : vector<1x64xf32> to vector<1x64x1xf32>
    %32 = vector.broadcast %31 : vector<1x64x1xf32> to vector<1x64x64xf32>
    %33 = arith.subf %29, %32 : vector<1x64x64xf32>
    %34 = math.exp %33 : vector<1x64x64xf32>
    %cst_13 = arith.constant dense<0.000000e+00> : vector<1x64xf32>
    %35 = vector.multi_reduction <add>, %34, %cst_13 [2] : vector<1x64x64xf32> to vector<1x64xf32>
    %36 = vector.shape_cast %35 : vector<1x64xf32> to vector<1x64x1xf32>
    %37 = tpu.reciprocal %36 : vector<1x64x1xf32> -> vector<1x64x1xf32>
    %38 = vector.broadcast %37 : vector<1x64x1xf32> to vector<1x64x64xf32>
    %39 = arith.mulf %34, %38 : vector<1x64x64xf32>
    "tpu.trace_start"() <{level = 10 : i32, message = "bnm,bmd->bnd"}> : () -> ()
    %cst_14 = arith.constant dense<0.000000e+00> : vector<1x64x8xf32>
    %40 = tpu.matmul %39, %28, %cst_14 {dimension_numbers = #tpu.dot_dimension_numbers<[2], [1], [1], [2], [0, 0, 0, 1, 1, 2], [0], [0]>} : vector<1x64x64xf32>, vector<1x64x8xf32>, vector<1x64x8xf32> -> vector<1x64x8xf32>
    "tpu.trace_stop"() : () -> ()
    %41 = vector.extract_strided_slice %6 {offsets = [0, 0, 16], sizes = [1, 64, 8], strides = [1, 1, 1]} : vector<1x64x192xf32> to vector<1x64x8xf32>
    %cst_15 = arith.constant 0.353553385 : f32
    %42 = vector.broadcast %cst_15 : f32 to vector<1x64x8xf32>
    %43 = arith.mulf %41, %42 : vector<1x64x8xf32>
    %44 = vector.extract_strided_slice %6 {offsets = [0, 0, 80], sizes = [1, 64, 8], strides = [1, 1, 1]} : vector<1x64x192xf32> to vector<1x64x8xf32>
    %45 = vector.extract_strided_slice %6 {offsets = [0, 0, 144], sizes = [1, 64, 8], strides = [1, 1, 1]} : vector<1x64x192xf32> to vector<1x64x8xf32>
    "tpu.trace_start"() <{level = 10 : i32, message = "bnd,bmd->bnm"}> : () -> ()
    %cst_16 = arith.constant dense<0.000000e+00> : vector<1x64x64xf32>
    %46 = tpu.matmul %43, %44, %cst_16 {dimension_numbers = #tpu.dot_dimension_numbers<[2], [2], [1], [1], [0, 0, 0, 1, 1, 1], [0], [0]>} : vector<1x64x8xf32>, vector<1x64x8xf32>, vector<1x64x64xf32> -> vector<1x64x64xf32>
    "tpu.trace_stop"() : () -> ()
    %cst_17 = arith.constant dense<0xFF800000> : vector<1x64xf32>
    %47 = vector.multi_reduction <maximumf>, %46, %cst_17 [2] : vector<1x64x64xf32> to vector<1x64xf32>
    %48 = vector.shape_cast %47 : vector<1x64xf32> to vector<1x64x1xf32>
    %49 = vector.broadcast %48 : vector<1x64x1xf32> to vector<1x64x64xf32>
    %50 = arith.subf %46, %49 : vector<1x64x64xf32>
    %51 = math.exp %50 : vector<1x64x64xf32>
    %cst_18 = arith.constant dense<0.000000e+00> : vector<1x64xf32>
    %52 = vector.multi_reduction <add>, %51, %cst_18 [2] : vector<1x64x64xf32> to vector<1x64xf32>
    %53 = vector.shape_cast %52 : vector<1x64xf32> to vector<1x64x1xf32>
    %54 = tpu.reciprocal %53 : vector<1x64x1xf32> -> vector<1x64x1xf32>
    %55 = vector.broadcast %54 : vector<1x64x1xf32> to vector<1x64x64xf32>
    %56 = arith.mulf %51, %55 : vector<1x64x64xf32>
    "tpu.trace_start"() <{level = 10 : i32, message = "bnm,bmd->bnd"}> : () -> ()
    %cst_19 = arith.constant dense<0.000000e+00> : vector<1x64x8xf32>
    %57 = tpu.matmul %56, %45, %cst_19 {dimension_numbers = #tpu.dot_dimension_numbers<[2], [1], [1], [2], [0, 0, 0, 1, 1, 2], [0], [0]>} : vector<1x64x64xf32>, vector<1x64x8xf32>, vector<1x64x8xf32> -> vector<1x64x8xf32>
    "tpu.trace_stop"() : () -> ()
    %58 = vector.extract_strided_slice %6 {offsets = [0, 0, 24], sizes = [1, 64, 8], strides = [1, 1, 1]} : vector<1x64x192xf32> to vector<1x64x8xf32>
    %cst_20 = arith.constant 0.353553385 : f32
    %59 = vector.broadcast %cst_20 : f32 to vector<1x64x8xf32>
    %60 = arith.mulf %58, %59 : vector<1x64x8xf32>
    %61 = vector.extract_strided_slice %6 {offsets = [0, 0, 88], sizes = [1, 64, 8], strides = [1, 1, 1]} : vector<1x64x192xf32> to vector<1x64x8xf32>
    %62 = vector.extract_strided_slice %6 {offsets = [0, 0, 152], sizes = [1, 64, 8], strides = [1, 1, 1]} : vector<1x64x192xf32> to vector<1x64x8xf32>
    "tpu.trace_start"() <{level = 10 : i32, message = "bnd,bmd->bnm"}> : () -> ()
    %cst_21 = arith.constant dense<0.000000e+00> : vector<1x64x64xf32>
    %63 = tpu.matmul %60, %61, %cst_21 {dimension_numbers = #tpu.dot_dimension_numbers<[2], [2], [1], [1], [0, 0, 0, 1, 1, 1], [0], [0]>} : vector<1x64x8xf32>, vector<1x64x8xf32>, vector<1x64x64xf32> -> vector<1x64x64xf32>
    "tpu.trace_stop"() : () -> ()
    %cst_22 = arith.constant dense<0xFF800000> : vector<1x64xf32>
    %64 = vector.multi_reduction <maximumf>, %63, %cst_22 [2] : vector<1x64x64xf32> to vector<1x64xf32>
    %65 = vector.shape_cast %64 : vector<1x64xf32> to vector<1x64x1xf32>
    %66 = vector.broadcast %65 : vector<1x64x1xf32> to vector<1x64x64xf32>
    %67 = arith.subf %63, %66 : vector<1x64x64xf32>
    %68 = math.exp %67 : vector<1x64x64xf32>
    %cst_23 = arith.constant dense<0.000000e+00> : vector<1x64xf32>
    %69 = vector.multi_reduction <add>, %68, %cst_23 [2] : vector<1x64x64xf32> to vector<1x64xf32>
    %70 = vector.shape_cast %69 : vector<1x64xf32> to vector<1x64x1xf32>
    %71 = tpu.reciprocal %70 : vector<1x64x1xf32> -> vector<1x64x1xf32>
    %72 = vector.broadcast %71 : vector<1x64x1xf32> to vector<1x64x64xf32>
    %73 = arith.mulf %68, %72 : vector<1x64x64xf32>
    "tpu.trace_start"() <{level = 10 : i32, message = "bnm,bmd->bnd"}> : () -> ()
    %cst_24 = arith.constant dense<0.000000e+00> : vector<1x64x8xf32>
    %74 = tpu.matmul %73, %62, %cst_24 {dimension_numbers = #tpu.dot_dimension_numbers<[2], [1], [1], [2], [0, 0, 0, 1, 1, 2], [0], [0]>} : vector<1x64x64xf32>, vector<1x64x8xf32>, vector<1x64x8xf32> -> vector<1x64x8xf32>
    "tpu.trace_stop"() : () -> ()
    %75 = vector.extract_strided_slice %6 {offsets = [0, 0, 32], sizes = [1, 64, 8], strides = [1, 1, 1]} : vector<1x64x192xf32> to vector<1x64x8xf32>
    %cst_25 = arith.constant 0.353553385 : f32
    %76 = vector.broadcast %cst_25 : f32 to vector<1x64x8xf32>
    %77 = arith.mulf %75, %76 : vector<1x64x8xf32>
    %78 = vector.extract_strided_slice %6 {offsets = [0, 0, 96], sizes = [1, 64, 8], strides = [1, 1, 1]} : vector<1x64x192xf32> to vector<1x64x8xf32>
    %79 = vector.extract_strided_slice %6 {offsets = [0, 0, 160], sizes = [1, 64, 8], strides = [1, 1, 1]} : vector<1x64x192xf32> to vector<1x64x8xf32>
    "tpu.trace_start"() <{level = 10 : i32, message = "bnd,bmd->bnm"}> : () -> ()
    %cst_26 = arith.constant dense<0.000000e+00> : vector<1x64x64xf32>
    %80 = tpu.matmul %77, %78, %cst_26 {dimension_numbers = #tpu.dot_dimension_numbers<[2], [2], [1], [1], [0, 0, 0, 1, 1, 1], [0], [0]>} : vector<1x64x8xf32>, vector<1x64x8xf32>, vector<1x64x64xf32> -> vector<1x64x64xf32>
    "tpu.trace_stop"() : () -> ()
    %cst_27 = arith.constant dense<0xFF800000> : vector<1x64xf32>
    %81 = vector.multi_reduction <maximumf>, %80, %cst_27 [2] : vector<1x64x64xf32> to vector<1x64xf32>
    %82 = vector.shape_cast %81 : vector<1x64xf32> to vector<1x64x1xf32>
    %83 = vector.broadcast %82 : vector<1x64x1xf32> to vector<1x64x64xf32>
    %84 = arith.subf %80, %83 : vector<1x64x64xf32>
    %85 = math.exp %84 : vector<1x64x64xf32>
    %cst_28 = arith.constant dense<0.000000e+00> : vector<1x64xf32>
    %86 = vector.multi_reduction <add>, %85, %cst_28 [2] : vector<1x64x64xf32> to vector<1x64xf32>
    %87 = vector.shape_cast %86 : vector<1x64xf32> to vector<1x64x1xf32>
    %88 = tpu.reciprocal %87 : vector<1x64x1xf32> -> vector<1x64x1xf32>
    %89 = vector.broadcast %88 : vector<1x64x1xf32> to vector<1x64x64xf32>
    %90 = arith.mulf %85, %89 : vector<1x64x64xf32>
    "tpu.trace_start"() <{level = 10 : i32, message = "bnm,bmd->bnd"}> : () -> ()
    %cst_29 = arith.constant dense<0.000000e+00> : vector<1x64x8xf32>
    %91 = tpu.matmul %90, %79, %cst_29 {dimension_numbers = #tpu.dot_dimension_numbers<[2], [1], [1], [2], [0, 0, 0, 1, 1, 2], [0], [0]>} : vector<1x64x64xf32>, vector<1x64x8xf32>, vector<1x64x8xf32> -> vector<1x64x8xf32>
    "tpu.trace_stop"() : () -> ()
    %92 = vector.extract_strided_slice %6 {offsets = [0, 0, 40], sizes = [1, 64, 8], strides = [1, 1, 1]} : vector<1x64x192xf32> to vector<1x64x8xf32>
    %cst_30 = arith.constant 0.353553385 : f32
    %93 = vector.broadcast %cst_30 : f32 to vector<1x64x8xf32>
    %94 = arith.mulf %92, %93 : vector<1x64x8xf32>
    %95 = vector.extract_strided_slice %6 {offsets = [0, 0, 104], sizes = [1, 64, 8], strides = [1, 1, 1]} : vector<1x64x192xf32> to vector<1x64x8xf32>
    %96 = vector.extract_strided_slice %6 {offsets = [0, 0, 168], sizes = [1, 64, 8], strides = [1, 1, 1]} : vector<1x64x192xf32> to vector<1x64x8xf32>
    "tpu.trace_start"() <{level = 10 : i32, message = "bnd,bmd->bnm"}> : () -> ()
    %cst_31 = arith.constant dense<0.000000e+00> : vector<1x64x64xf32>
    %97 = tpu.matmul %94, %95, %cst_31 {dimension_numbers = #tpu.dot_dimension_numbers<[2], [2], [1], [1], [0, 0, 0, 1, 1, 1], [0], [0]>} : vector<1x64x8xf32>, vector<1x64x8xf32>, vector<1x64x64xf32> -> vector<1x64x64xf32>
    "tpu.trace_stop"() : () -> ()
    %cst_32 = arith.constant dense<0xFF800000> : vector<1x64xf32>
    %98 = vector.multi_reduction <maximumf>, %97, %cst_32 [2] : vector<1x64x64xf32> to vector<1x64xf32>
    %99 = vector.shape_cast %98 : vector<1x64xf32> to vector<1x64x1xf32>
    %100 = vector.broadcast %99 : vector<1x64x1xf32> to vector<1x64x64xf32>
    %101 = arith.subf %97, %100 : vector<1x64x64xf32>
    %102 = math.exp %101 : vector<1x64x64xf32>
    %cst_33 = arith.constant dense<0.000000e+00> : vector<1x64xf32>
    %103 = vector.multi_reduction <add>, %102, %cst_33 [2] : vector<1x64x64xf32> to vector<1x64xf32>
    %104 = vector.shape_cast %103 : vector<1x64xf32> to vector<1x64x1xf32>
    %105 = tpu.reciprocal %104 : vector<1x64x1xf32> -> vector<1x64x1xf32>
    %106 = vector.broadcast %105 : vector<1x64x1xf32> to vector<1x64x64xf32>
    %107 = arith.mulf %102, %106 : vector<1x64x64xf32>
    "tpu.trace_start"() <{level = 10 : i32, message = "bnm,bmd->bnd"}> : () -> ()
    %cst_34 = arith.constant dense<0.000000e+00> : vector<1x64x8xf32>
    %108 = tpu.matmul %107, %96, %cst_34 {dimension_numbers = #tpu.dot_dimension_numbers<[2], [1], [1], [2], [0, 0, 0, 1, 1, 2], [0], [0]>} : vector<1x64x64xf32>, vector<1x64x8xf32>, vector<1x64x8xf32> -> vector<1x64x8xf32>
    "tpu.trace_stop"() : () -> ()
    %109 = vector.extract_strided_slice %6 {offsets = [0, 0, 48], sizes = [1, 64, 8], strides = [1, 1, 1]} : vector<1x64x192xf32> to vector<1x64x8xf32>
    %cst_35 = arith.constant 0.353553385 : f32
    %110 = vector.broadcast %cst_35 : f32 to vector<1x64x8xf32>
    %111 = arith.mulf %109, %110 : vector<1x64x8xf32>
    %112 = vector.extract_strided_slice %6 {offsets = [0, 0, 112], sizes = [1, 64, 8], strides = [1, 1, 1]} : vector<1x64x192xf32> to vector<1x64x8xf32>
    %113 = vector.extract_strided_slice %6 {offsets = [0, 0, 176], sizes = [1, 64, 8], strides = [1, 1, 1]} : vector<1x64x192xf32> to vector<1x64x8xf32>
    "tpu.trace_start"() <{level = 10 : i32, message = "bnd,bmd->bnm"}> : () -> ()
    %cst_36 = arith.constant dense<0.000000e+00> : vector<1x64x64xf32>
    %114 = tpu.matmul %111, %112, %cst_36 {dimension_numbers = #tpu.dot_dimension_numbers<[2], [2], [1], [1], [0, 0, 0, 1, 1, 1], [0], [0]>} : vector<1x64x8xf32>, vector<1x64x8xf32>, vector<1x64x64xf32> -> vector<1x64x64xf32>
    "tpu.trace_stop"() : () -> ()
    %cst_37 = arith.constant dense<0xFF800000> : vector<1x64xf32>
    %115 = vector.multi_reduction <maximumf>, %114, %cst_37 [2] : vector<1x64x64xf32> to vector<1x64xf32>
    %116 = vector.shape_cast %115 : vector<1x64xf32> to vector<1x64x1xf32>
    %117 = vector.broadcast %116 : vector<1x64x1xf32> to vector<1x64x64xf32>
    %118 = arith.subf %114, %117 : vector<1x64x64xf32>
    %119 = math.exp %118 : vector<1x64x64xf32>
    %cst_38 = arith.constant dense<0.000000e+00> : vector<1x64xf32>
    %120 = vector.multi_reduction <add>, %119, %cst_38 [2] : vector<1x64x64xf32> to vector<1x64xf32>
    %121 = vector.shape_cast %120 : vector<1x64xf32> to vector<1x64x1xf32>
    %122 = tpu.reciprocal %121 : vector<1x64x1xf32> -> vector<1x64x1xf32>
    %123 = vector.broadcast %122 : vector<1x64x1xf32> to vector<1x64x64xf32>
    %124 = arith.mulf %119, %123 : vector<1x64x64xf32>
    "tpu.trace_start"() <{level = 10 : i32, message = "bnm,bmd->bnd"}> : () -> ()
    %cst_39 = arith.constant dense<0.000000e+00> : vector<1x64x8xf32>
    %125 = tpu.matmul %124, %113, %cst_39 {dimension_numbers = #tpu.dot_dimension_numbers<[2], [1], [1], [2], [0, 0, 0, 1, 1, 2], [0], [0]>} : vector<1x64x64xf32>, vector<1x64x8xf32>, vector<1x64x8xf32> -> vector<1x64x8xf32>
    "tpu.trace_stop"() : () -> ()
    %126 = vector.extract_strided_slice %6 {offsets = [0, 0, 56], sizes = [1, 64, 8], strides = [1, 1, 1]} : vector<1x64x192xf32> to vector<1x64x8xf32>
    %cst_40 = arith.constant 0.353553385 : f32
    %127 = vector.broadcast %cst_40 : f32 to vector<1x64x8xf32>
    %128 = arith.mulf %126, %127 : vector<1x64x8xf32>
    %129 = vector.extract_strided_slice %6 {offsets = [0, 0, 120], sizes = [1, 64, 8], strides = [1, 1, 1]} : vector<1x64x192xf32> to vector<1x64x8xf32>
    %130 = vector.extract_strided_slice %6 {offsets = [0, 0, 184], sizes = [1, 64, 8], strides = [1, 1, 1]} : vector<1x64x192xf32> to vector<1x64x8xf32>
    "tpu.trace_start"() <{level = 10 : i32, message = "bnd,bmd->bnm"}> : () -> ()
    %cst_41 = arith.constant dense<0.000000e+00> : vector<1x64x64xf32>
    %131 = tpu.matmul %128, %129, %cst_41 {dimension_numbers = #tpu.dot_dimension_numbers<[2], [2], [1], [1], [0, 0, 0, 1, 1, 1], [0], [0]>} : vector<1x64x8xf32>, vector<1x64x8xf32>, vector<1x64x64xf32> -> vector<1x64x64xf32>
    "tpu.trace_stop"() : () -> ()
    %cst_42 = arith.constant dense<0xFF800000> : vector<1x64xf32>
    %132 = vector.multi_reduction <maximumf>, %131, %cst_42 [2] : vector<1x64x64xf32> to vector<1x64xf32>
    %133 = vector.shape_cast %132 : vector<1x64xf32> to vector<1x64x1xf32>
    %134 = vector.broadcast %133 : vector<1x64x1xf32> to vector<1x64x64xf32>
    %135 = arith.subf %131, %134 : vector<1x64x64xf32>
    %136 = math.exp %135 : vector<1x64x64xf32>
    %cst_43 = arith.constant dense<0.000000e+00> : vector<1x64xf32>
    %137 = vector.multi_reduction <add>, %136, %cst_43 [2] : vector<1x64x64xf32> to vector<1x64xf32>
    %138 = vector.shape_cast %137 : vector<1x64xf32> to vector<1x64x1xf32>
    %139 = tpu.reciprocal %138 : vector<1x64x1xf32> -> vector<1x64x1xf32>
    %140 = vector.broadcast %139 : vector<1x64x1xf32> to vector<1x64x64xf32>
    %141 = arith.mulf %136, %140 : vector<1x64x64xf32>
    "tpu.trace_start"() <{level = 10 : i32, message = "bnm,bmd->bnd"}> : () -> ()
    %cst_44 = arith.constant dense<0.000000e+00> : vector<1x64x8xf32>
    %142 = tpu.matmul %141, %130, %cst_44 {dimension_numbers = #tpu.dot_dimension_numbers<[2], [1], [1], [2], [0, 0, 0, 1, 1, 2], [0], [0]>} : vector<1x64x64xf32>, vector<1x64x8xf32>, vector<1x64x8xf32> -> vector<1x64x8xf32>
    "tpu.trace_stop"() : () -> ()
    %143 = tpu.concatenate %23, %40, %57, %74, %91, %108, %125, %142 in 2 : vector<1x64x8xf32>, vector<1x64x8xf32>, vector<1x64x8xf32>, vector<1x64x8xf32>, vector<1x64x8xf32>, vector<1x64x8xf32>, vector<1x64x8xf32>, vector<1x64x8xf32> -> vector<1x64x64xf32>
    %144 = vector.shape_cast %143 : vector<1x64x64xf32> to vector<64x64xf32>
    %c0_45 = arith.constant 0 : index
    %c0_46 = arith.constant 0 : index
    %145 = vector.load %arg4[%c0_45, %c0_46] : memref<64x64xf32, #tpu.memory_space<vmem>>, vector<64x64xf32>
    %cst_47 = arith.constant dense<0.000000e+00> : vector<64x64xf32>
    %146 = tpu.matmul %144, %145, %cst_47 {dimension_numbers = #tpu.dot_dimension_numbers<[1], [0], [0], [1], [0, 0, 1, 1], [], []>} : vector<64x64xf32>, vector<64x64xf32>, vector<64x64xf32> -> vector<64x64xf32>
    %c0_48 = arith.constant 0 : index
    %c0_49 = arith.constant 0 : index
    %147 = vector.load %arg5[%c0_48, %c0_49] : memref<1x64xf32, #tpu.memory_space<vmem>>, vector<1x64xf32>
    %148 = vector.broadcast %147 : vector<1x64xf32> to vector<64x64xf32>
    %149 = arith.addf %146, %148 : vector<64x64xf32>
    %c0_50 = arith.constant 0 : index
    %150 = memref.load %arg6[%c0_50] : memref<1xf32, #tpu.memory_space<smem>>
    %151 = vector.broadcast %150 : f32 to vector<64x64xf32>
    %152 = arith.mulf %151, %149 : vector<64x64xf32>
    %153 = arith.addf %152, %0 : vector<64x64xf32>
    %c0_51 = arith.constant 0 : index
    %c0_52 = arith.constant 0 : index
    %154 = vector.load %arg7[%c0_51, %c0_52] : memref<64x64xf32, #tpu.memory_space<vmem>>, vector<64x64xf32>
    tpu.vector_store %arg7[%c0_51, %c0_52], %153 {strides = array<i32>} : memref<64x64xf32, #tpu.memory_space<vmem>>, vector<64x64xf32>,
    return
  }
  func.func @transform_0(%arg0: i32) -> (i32, i32) {
    %c0_i32 = arith.constant 0 : i32
    %c0_i32_0 = arith.constant 0 : i32
    return %arg0, %c0_i32 : i32, i32
  }
  func.func @transform_1(%arg0: i32) -> (i32, i32) {
    %c0_i32 = arith.constant 0 : i32
    %c0_i32_0 = arith.constant 0 : i32
    %c0_i32_1 = arith.constant 0 : i32
    return %c0_i32, %c0_i32_0 : i32, i32
  }
  func.func @transform_2(%arg0: i32) -> (i32, i32) {
    %c0_i32 = arith.constant 0 : i32
    %c0_i32_0 = arith.constant 0 : i32
    %c0_i32_1 = arith.constant 0 : i32
    return %c0_i32, %c0_i32_0 : i32, i32
  }
  func.func @transform_3(%arg0: i32) -> (i32, i32) {
    %c0_i32 = arith.constant 0 : i32
    %c0_i32_0 = arith.constant 0 : i32
    %c0_i32_1 = arith.constant 0 : i32
    return %c0_i32, %c0_i32_0 : i32, i32
  }
  func.func @transform_4(%arg0: i32) -> (i32, i32) {
    %c0_i32 = arith.constant 0 : i32
    %c0_i32_0 = arith.constant 0 : i32
    %c0_i32_1 = arith.constant 0 : i32
    return %c0_i32, %c0_i32_0 : i32, i32
  }
  func.func @transform_5(%arg0: i32) -> i32 {
    %c0_i32 = arith.constant 0 : i32
    %c0_i32_0 = arith.constant 0 : i32
    return %c0_i32 : i32
  }
  func.func @transform_6(%arg0: i32) -> (i32, i32) {
    %c0_i32 = arith.constant 0 : i32
    %c0_i32_0 = arith.constant 0 : i32
    return %arg0, %c0_i32 : i32, i32
  }
}

</mosaic_0001>

<bundles_post_ra>
// kernel: tpu_custom_call.1
= control target key start
LH: loop header
LB: loop body
LE: loop exit
PB: predicated region body
PF: predicated region fallthrough
CT: control target
= control target key end

     0   :  { %s6193_s23 = smov 0   ;;  %s7681_s0 = inlined_call_operand.vmem [shape: f32[128,64], index: 0, kind: input, shape index: {}]   ;;  %s7682_s1 = inlined_call_operand.vmem [shape: f32[64,192], index: 1, kind: input, shape index: {}]   ;;  %s7683_s2 = inlined_call_operand.vmem [shape: f32[1,192], index: 2, kind: input, shape index: {}]   ;;  %s7684_s3 = inlined_call_operand.vmem [shape: f32[64,64], index: 3, kind: input, shape index: {}]   ;;  %s7685_s4 = inlined_call_operand.vmem [shape: f32[1,64], index: 4, kind: input, shape index: {}]   ;;  %s7686_s5 = inlined_call_operand.<no memory space> [shape: f32[1], index: 5, kind: input, shape index: {}]   ;;  %s7687_s6 = inlined_call_operand.vmem [shape: f32[128,64], index: 6, kind: output, shape index: {}]  }
   0x1   :  { %11 = sst [smem:[#allocation2]] %s7686_s5 }
   0x2 LB: > { %s4215_s24 = sadd.s32 4294967295, %s6137_s23   ;;  %p4219_p0 = scmp.ge.s32.totalorder %s6137_s23, 1  ;;  %s6137_s23 = sphi %s6193_s23, %s17_s23  }
   0x3   : > { %p214_p1 = scmp.lt.s32.totalorder %s6137_s23, 3 }
   0x5   : > { %p215_p2 = pnand %p4219_p0, %p214_p1 }
   0x7   : > { %218 = sbr.rel (%p215_p2) target bundleno = 5424 (0x1530), region = 44 }
   0xe   : > { %v265_v0 = vld [vmem:[%s7682_s1 + $0x8] sm:$0xff]  ;;  %v267_v1 = vld [vmem:[%s7682_s1 + $0x18] sm:$0xff]  ;;  %v264_v2 = vld [vmem:[%s7682_s1] sm:$0xff]  ;;  %s4220_s30 = sshll.u32 %s4215_s24, 3  ;;  %v6139_v7 = vmov 0.0   ;;  %vm292_vm0 = vcmask 523264   ;;  %v282_v33 = vlaneseq }
   0xf   : > { %v5183_v3 = vpack.c.bf16 %v267_v1, %v265_v0  ;;  %v266_v4 = vld [vmem:[%s7682_s1 + $0x10] sm:$0xff]  ;;  %v269_v5 = vld [vmem:[%s7682_s1 + $0x28] sm:$0xff]  ;;  %v271_v6 = vld [vmem:[%s7682_s1 + $0x38] sm:$0xff]  ;;  %381 = vmatprep.mubr.f32.mxu0 %v6139_v7  ;;  %p245_p3 = scmp.lt.s32.totalorder %s4220_s30, 15  ;;  %vm462_vm1 = vcmask 64512   ;;  %s6140_s16 = smov 64  }
  0x10   : > { %v5185_v8 = vpack.c.bf16 %v266_v4, %v264_v2  ;;  %v5187_v9 = vpack.c.bf16 %v271_v6, %v269_v5  ;;  %v268_v10 = vld [vmem:[%s7682_s1 + $0x20] sm:$0xff]  ;;  %v270_v11 = vld [vmem:[%s7682_s1 + $0x30] sm:$0xff]  ;;  %v273_v12 = vld [vmem:[%s7682_s1 + $0x48] sm:$0xff]  ;;  %v283_v34 = vshrl.u32 %v282_v33, 7  ;;  %s6141_s17 = smov 56   ;;  %s6142_s18 = smov 120  }
  0x11   : > { %5184 = vmatprep.subr.bf16.mxu0 %v5183_v3  ;;  %v275_v13 = vld [vmem:[%s7682_s1 + $0x58] sm:$0xff]  ;;  %v5189_v14 = vpack.c.bf16 %v270_v11, %v268_v10  ;;  %v272_v16 = vld [vmem:[%s7682_s1 + $0x40] sm:$0xff]  ;;  %v274_v17 = vld [vmem:[%s7682_s1 + $0x50] sm:$0xff]  ;;  %s7741_s30 = smov (!%p245_p3, %s4220_s30), 15  ;;  %s6143_s19 = smov 48   ;;  %vm3935_vm3 = vcmask 130048  }
  0x12   : > { %5186 = vmatpush1.bf16.msra.mxu0 %v5185_v8  ;;  %v5191_v15 = vpack.c.bf16 %v275_v13, %v273_v12  ;;  %v277_v18 = vld [vmem:[%s7682_s1 + $0x68] sm:$0xff]  ;;  %v279_v19 = vld [vmem:[%s7682_s1 + $0x78] sm:$0xff]  ;;  %v5193_v20 = vpack.c.bf16 %v274_v17, %v272_v16  ;;  %v276_v22 = vld [vmem:[%s7682_s1 + $0x60] sm:$0xff]  ;;  %s4221_s10 = sshll.u32 %s7741_s30, 3  ;;  %v284_v35 = vsub.s32 0, %v283_v34  ;;  %v288_v38 = vsub.s32 1, %v283_v34 }
  0x13   : > { %5188 = vmatprep.subr.bf16.mxu0 %v5187_v9  ;;  %v5195_v21 = vpack.c.bf16 %v279_v19, %v277_v18  ;;  %v278_v23 = vld [vmem:[%s7682_s1 + $0x70] sm:$0xff]  ;;  %s6257_s13 = scalar_lea.vmem %s7681_s0, %s4221_s10  ;;  %v280_v36 = vld [vmem:[%s7683_s2] sm:$0x3]  ;;  %vm6352_vm2 = vmpackc.low %vm462_vm1, %vm462_vm1  ;;  %s6144_s20 = smov 112   ;;  %vm3944_vm4 = vcmask 195584   ;;  %vm3953_vm5 = vcmask 261120  }
  0x14   : > { %v5197_v24 = vpack.c.bf16 %v278_v23, %v276_v22  ;;  %v256_v25 = vld [vmem:[%s6257_s13] sm:$0xff]  ;;  %v257_v26 = vld [vmem:[%s6257_s13 + $0x8] sm:$0xff]  ;;  %v258_v27 = vld [vmem:[%s6257_s13 + $0x10] sm:$0xff]  ;;  %v285_v37 = vrot.slane %v280_v36, %v284_v35  ;;  %v289_v42 = vrot.slane %v280_v36, %v288_v38  ;;  %s6145_s21 = smov 40   ;;  %s6146_s22 = smov 104   ;;  %vm3962_vm6 = vcmask 326656  }
  0x15   : > { %v259_v28 = vld [vmem:[%s6257_s13 + $0x18] sm:$0xff]  ;;  %v260_v29 = vld [vmem:[%s6257_s13 + $0x20] sm:$0xff]  ;;  %v261_v30 = vld [vmem:[%s6257_s13 + $0x28] sm:$0xff]  ;;  %s6147_s24 = smov 32   ;;  %s6148_s25 = smov 96   ;;  %vm3971_vm7 = vcmask 392192  }
  0x16   : > { %5190 = vmatpush1.bf16.msra.mxu0 %v5189_v14  ;;  %v262_v31 = vld [vmem:[%s6257_s13 + $0x30] sm:$0xff]  ;;  %v263_v32 = vld [vmem:[%s6257_s13 + $0x38] sm:$0xff]  ;;  %s6149_s26 = smov 24   ;;  %s6150_s5 = smov 88   ;;  %vm3980_vm8 = vcmask 457728  }
  0x17   : > { %5192 = vmatprep.subr.bf16.mxu0 %v5191_v15  ;;  %s6151_s27 = smov 16   ;;  %s6152_s28 = smov 80  }
  0x18   : > { %s6153_s29 = smov 8   ;;  %s6154_s7 = smov 72  }
  0x19   : > { %s7652_s8 = scalar_lea.vmem %s7687_s6, %s4221_s10 }
  0x1a   : > { %5194 = vmatpush1.bf16.msra.mxu0 %v5193_v20 }
  0x1b   : > { %5196 = vmatprep.subr.bf16.mxu0 %v5195_v21 }
  0x1e   : > { %5198 = vmatpush1.bf16.msra.mxu0 %v5197_v24 }
  0x21   : > { %4224 = vmatmul.mubr.msk.f32.vlgmr.msra.gmra.mrb[0].mxu0 %vm292_vm0, %v256_v25 }
  0x22   : > { %387 = vmatprep.mubr.f32.mxu0 %v6139_v7 }
  0x25   : > { %4225 = vmatmul.mubr.msk.f32.gmra.mrb[2].mxu0 %vm292_vm0, %v257_v26 }
  0x26   : > { %393 = vmatprep.mubr.f32.mxu0 %v6139_v7 }
  0x29   : > { %4226 = vmatmul.mubr.msk.f32.gmra.mrb[4].mxu0 %vm292_vm0, %v258_v27 }
  0x2a   : > { %399 = vmatprep.mubr.f32.mxu0 %v6139_v7 }
  0x2d   : > { %4227 = vmatmul.mubr.msk.f32.gmra.mrb[6].mxu0 %vm292_vm0, %v259_v28 }
  0x2e   : > { %405 = vmatprep.mubr.f32.mxu0 %v6139_v7 }
  0x31   : > { %4228 = vmatmul.mubr.msk.f32.gmra.mrb[8].mxu0 %vm292_vm0, %v260_v29 }
  0x32   : > { %411 = vmatprep.mubr.f32.mxu0 %v6139_v7 }
  0x35   : > { %4229 = vmatmul.mubr.msk.f32.gmra.mrb[10].mxu0 %vm292_vm0, %v261_v30 }
  0x36   : > { %417 = vmatprep.mubr.f32.mxu0 %v6139_v7 }
  0x39   : > { %4230 = vmatmul.mubr.msk.f32.gmra.mrb[12].mxu0 %vm292_vm0, %v262_v31 }
  0x3a   : > { %423 = vmatprep.mubr.f32.mxu0 %v6139_v7 }
  0x3d   : > { %4231 = vmatmul.mubr.msk.f32.gmra.mrb[14].mxu0 %vm292_vm0, %v263_v32 }
  0xf4   : > { %v383_v39 = vpop.f32.mrb[0].mxu0 }
  0xf5   : > { %v384_v40 = vadd.f32 %v383_v39, %v285_v37  ;;  %v385_v41 = vpop.f32.mrb[1].mxu0 }
  0xf6   : > { %v386_v47 = vadd.f32 %v385_v41, %v289_v42 }
  0xf7   : > { %v6278_v43 = vmul.f32 0.35355338, %v384_v40 }
  0xf8   : > { %v389_v44 = vpop.f32.mrb[2].mxu0 }
  0xf9   : > { %v6280_v45 = vadd.f32 %v389_v44, %v285_v37  ;;  %v391_v46 = vpop.f32.mrb[3].mxu0  ;;  %4723 = vmatprep.mubr.msk.f32.mxu1 %vm462_vm1, %v6278_v43 }
  0xfa   : > { %v392_v48 = vadd.f32 %v391_v46, %v289_v42 }
  0xfb   : > { %v6285_v49 = vpack.i.bf16 %v6280_v45, %v384_v40  ;;  %v6332_v24 = vmul.f32 0.35355338, %v6280_v45 }
  0xfc   : > { %v395_v50 = vpop.f32.mrb[4].mxu0  ;;  %v5223_v51 = vpack.c.bf16 %v392_v48, %v386_v47  ;;  %v6287_v52 = vpack.i.bf16 %v392_v48, %v386_v47 }
  0xfd   : > { %v397_v53 = vpop.f32.mrb[5].mxu0  ;;  %5568 = vrot.lane.b32.xlu0 %v6285_v49, %s6140_s16  ;;  %v396_v55 = vadd.f32 %v395_v50, %v285_v37 }
  0xfe   : > { %5224 = vmatprep.subr.bf16.mxu0 %v5223_v51  ;;  %v398_v58 = vadd.f32 %v397_v53, %v289_v42 }
  0xff   : > { %5226 = vmatpush3.bf16.msra.mxu0 %v5223_v51  ;;  %v6311_v19 = vmul.f32 0.35355338, %v396_v55 }
 0x100   : > { %v401_v54 = vpop.f32.mrb[6].mxu0 }
 0x101   : > { %v402_v56 = vadd.f32 %v401_v54, %v285_v37  ;;  %v403_v57 = vpop.f32.mrb[7].mxu0 }
 0x102   : > { %v404_v59 = vadd.f32 %v403_v57, %v289_v42 }
 0x103   : > { %v6291_v60 = vpack.i.bf16 %v402_v56, %v396_v55  ;;  %v6336_v25 = vmul.f32 0.35355338, %v402_v56 }
 0x104   : > { %v407_v61 = vpop.f32.mrb[8].mxu0  ;;  %v5227_v62 = vpack.c.bf16 %v404_v59, %v398_v58  ;;  %v6293_v63 = vpack.i.bf16 %v404_v59, %v398_v58 }
 0x105   : > { %v409_v0 = vpop.f32.mrb[9].mxu0  ;;  %5573 = vrot.lane.b32.xlu0 %v6291_v60, %s6140_s16  ;;  %v408_v2 = vadd.f32 %v407_v61, %v285_v37 }
 0x106   : > { %5228 = vmatprep.subr.bf16.mxu0 %v5227_v62  ;;  %v410_v5 = vadd.f32 %v409_v0, %v289_v42 }
 0x107   : > { %5230 = vmatpush3.bf16.msra.mxu0 %v5227_v62  ;;  %v6319_v22 = vmul.f32 0.35355338, %v408_v2 }
 0x108   : > { %v413_v1 = vpop.f32.mrb[10].mxu0 }
 0x109   : > { %v414_v3 = vadd.f32 %v413_v1, %v285_v37  ;;  %v415_v4 = vpop.f32.mrb[11].mxu0  ;;  %5588 = vrot.lane.b32.xlu0 %v6285_v49, %s6141_s17 }
 0x10a   : > { %v416_v6 = vadd.f32 %v415_v4, %v289_v42 }
 0x10b   : > { %v6299_v7 = vpack.i.bf16 %v414_v3, %v408_v2  ;;  %v6340_v26 = vmul.f32 0.35355338, %v414_v3 }
 0x10c   : > { %v419_v8 = vpop.f32.mrb[12].mxu0  ;;  %v5231_v9 = vpack.c.bf16 %v416_v6, %v410_v5  ;;  %v6301_v10 = vpack.i.bf16 %v416_v6, %v410_v5 }
 0x10d   : > { %v421_v11 = vpop.f32.mrb[13].mxu0  ;;  %5578 = vrot.lane.b32.xlu1 %v6299_v7, %s6140_s16  ;;  %5598 = vrot.lane.b32.xlu0 %v6299_v7, %s6141_s17  ;;  %v420_v13 = vadd.f32 %v419_v8, %v285_v37 }
 0x10e   : > { %5232 = vmatprep.subr.bf16.mxu0 %v5231_v9  ;;  %v422_v16 = vadd.f32 %v421_v11, %v289_v42 }
 0x10f   : > { %5234 = vmatpush3.bf16.msra.mxu0 %v5231_v9  ;;  %v6325_v23 = vmul.f32 0.35355338, %v420_v13 }
 0x110   : > { %v425_v12 = vpop.f32.mrb[14].mxu0 }
 0x111   : > { %v426_v14 = vadd.f32 %v425_v12, %v285_v37  ;;  %v427_v15 = vpop.f32.mrb[15].mxu0  ;;  %825 = vrot.lane.b32.xlu0 %v6278_v43, %s6142_s18 }
 0x112   : > { %v428_v17 = vadd.f32 %v427_v15, %v289_v42 }
 0x113   : > { %v6309_v18 = vpack.i.bf16 %v426_v14, %v420_v13  ;;  %v6344_v27 = vmul.f32 0.35355338, %v426_v14 }
 0x114   : > { %v5235_v20 = vpack.c.bf16 %v428_v17, %v422_v16  ;;  %v6313_v21 = vpack.i.bf16 %v428_v17, %v422_v16 }
 0x115   : > { %5583 = vrot.lane.b32.xlu1 %v6309_v18, %s6140_s16  ;;  %829 = vrot.lane.b32.xlu0 %v6311_v19, %s6142_s18 }
 0x116   : > { %5236 = vmatprep.subr.bf16.mxu0 %v5235_v20 }
 0x117   : > { %5238 = vmatpush3.bf16.msra.mxu0 %v5235_v20 }
 0x119   : > { %5593 = vrot.lane.b32.xlu1 %v6291_v60, %s6141_s17  ;;  %833 = vrot.lane.b32.xlu0 %v6319_v22, %s6142_s18 }
 0x11d   : > { %5603 = vrot.lane.b32.xlu1 %v6309_v18, %s6141_s17  ;;  %837 = vrot.lane.b32.xlu0 %v6325_v23, %s6142_s18 }
 0x121   : > { %827 = vrot.lane.b32.xlu1 %v6332_v24, %s6142_s18 }
 0x125   : > { %831 = vrot.lane.b32.xlu1 %v6336_v25, %s6142_s18 }
 0x129   : > { %835 = vrot.lane.b32.xlu1 %v6340_v26, %s6142_s18 }
 0x12d   : > { %839 = vrot.lane.b32.xlu1 %v6344_v27, %s6142_s18 }
 0x131   : > { %5608 = vrot.lane.b32.xlu1 %v6287_v52, %s6142_s18 }
 0x16f   : > { %v5569_v28 = vpop.permute.xlu0 %5568 }
 0x170   : > { %v5571_v29 = vunpack.i.h.bf16 %v5569_v28  ;;  %v5570_v30 = vunpack.i.l.bf16 %v5569_v28 }
 0x172   : > { %v5199_v32 = vpack.c.bf16 %v5571_v29, %v5570_v30 }
 0x174   : > { %5201 = vmatprep.subr.msk.bf16.mxu1 %vm6352_vm2, %v5199_v32 }
 0x175   : > { %5204 = vmatpush3.bf16.xpose.msk.msra.mxu1 %vm6352_vm2, %v5199_v32 }
 0x177   : > { %v5574_v33 = vpop.permute.xlu0 %5573 }
 0x178   : > { %v5576_v34 = vunpack.i.h.bf16 %v5574_v33  ;;  %v5575_v35 = vunpack.i.l.bf16 %v5574_v33 }
 0x17a   : > { %v5205_v36 = vpack.c.bf16 %v5576_v34, %v5575_v35 }
 0x17b   : > { %v5589_v41 = vpop.permute.xlu0 %5588 }
 0x17c   : > { %5207 = vmatprep.subr.msk.bf16.mxu1 %vm6352_vm2, %v5205_v36  ;;  %v5591_v44 = vunpack.i.h.bf16 %v5589_v41  ;;  %v5590_v45 = vunpack.i.l.bf16 %v5589_v41 }
 0x17d   : > { %5210 = vmatpush3.bf16.xpose.msk.msra.mxu1 %vm6352_vm2, %v5205_v36 }
 0x17e   : > { %v5239_v51 = vpack.c.bf16 %v5591_v44, %v5590_v45 }
 0x17f   : > { %v5579_v37 = vpop.permute.xlu1 %5578  ;;  %v5599_v58 = vpop.permute.xlu0 %5598 }
 0x180   : > { %v5581_v38 = vunpack.i.h.bf16 %v5579_v37  ;;  %v5580_v39 = vunpack.i.l.bf16 %v5579_v37  ;;  %v5601_v61 = vunpack.i.h.bf16 %v5599_v58  ;;  %v5600_v62 = vunpack.i.l.bf16 %v5599_v58 }
 0x182   : > { %v5211_v40 = vpack.c.bf16 %v5581_v38, %v5580_v39  ;;  %v5251_v1 = vpack.c.bf16 %v5601_v61, %v5600_v62 }
 0x183   : > { %v826_v3 = vpop.permute.xlu0 %825 }
 0x184   : > { %5213 = vmatprep.subr.msk.bf16.mxu1 %vm6352_vm2, %v5211_v40 }
 0x185   : > { %5216 = vmatpush3.bf16.xpose.msk.msra.mxu1 %vm6352_vm2, %v5211_v40 }
 0x187   : > { %v5584_v42 = vpop.permute.xlu1 %5583  ;;  %v830_v13 = vpop.permute.xlu0 %829 }
 0x188   : > { %v5586_v46 = vunpack.i.h.bf16 %v5584_v42  ;;  %v5585_v47 = vunpack.i.l.bf16 %v5584_v42 }
 0x18a   : > { %v5217_v48 = vpack.c.bf16 %v5586_v46, %v5585_v47 }
 0x18b   : > { %v5594_v50 = vpop.permute.xlu1 %5593  ;;  %v834_v14 = vpop.permute.xlu0 %833 }
 0x18c   : > { %5219 = vmatprep.subr.msk.bf16.mxu1 %vm6352_vm2, %v5217_v48  ;;  %v5596_v54 = vunpack.i.h.bf16 %v5594_v50  ;;  %v5595_v55 = vunpack.i.l.bf16 %v5594_v50 }
 0x18d   : > { %5222 = vmatpush3.bf16.xpose.msk.msra.mxu1 %vm6352_vm2, %v5217_v48 }
 0x18e   : > { %5241 = vmatprep.subr.msk.bf16.mxu1 %vm6352_vm2, %v5239_v51  ;;  %v5245_v57 = vpack.c.bf16 %v5596_v54, %v5595_v55 }
 0x18f   : > { %v5604_v53 = vpop.permute.xlu1 %5603  ;;  %v838_v15 = vpop.permute.xlu0 %837 }
 0x190   : > { %v5606_v4 = vunpack.i.h.bf16 %v5604_v53  ;;  %v5605_v5 = vunpack.i.l.bf16 %v5604_v53 }
 0x192   : > { %v5257_v8 = vpack.c.bf16 %v5606_v4, %v5605_v5 }
 0x193   : > { %v828_v56 = vpop.permute.xlu1 %827 }
 0x194   : > { %4724 = vmatmul.mubr.msk.f32.vlgmr.msra.gmra.mrb[0].mxu1 %vm462_vm1, %v6332_v24 }
 0x195   : > { %4726 = vmatprep.mubr.msk.f32.mxu1 %vm462_vm1, %v6311_v19  ;;  %5244 = vmatpush3.bf16.xpose.msk.msra.mxu1 %vm6352_vm2, %v5239_v51 }
 0x196   : > { %5247 = vmatprep.subr.msk.bf16.mxu1 %vm6352_vm2, %v5245_v57 }
 0x197   : > { %v832_v59 = vpop.permute.xlu1 %831 }
 0x198   : > { %4727 = vmatmul.mubr.msk.f32.gmra.mrb[2].mxu1 %vm462_vm1, %v6336_v25 }
 0x199   : > { %4729 = vmatprep.mubr.msk.f32.mxu1 %vm462_vm1, %v6319_v22 }
 0x19b   : > { %v836_v0 = vpop.permute.xlu1 %835 }
 0x19c   : > { %4730 = vmatmul.mubr.msk.f32.gmra.mrb[4].mxu1 %vm462_vm1, %v6340_v26 }
 0x19d   : > { %4732 = vmatprep.mubr.msk.f32.mxu1 %vm462_vm1, %v6325_v23  ;;  %5250 = vmatpush3.bf16.xpose.msk.msra.mxu1 %vm6352_vm2, %v5245_v57 }
 0x19e   : > { %5253 = vmatprep.subr.msk.bf16.mxu1 %vm6352_vm2, %v5251_v1 }
 0x19f   : > { %v840_v2 = vpop.permute.xlu1 %839 }
 0x1a0   : > { %4733 = vmatmul.mubr.msk.f32.gmra.mrb[6].mxu1 %vm462_vm1, %v6344_v27 }
 0x1a1   : > { %4779 = vmatprep.mubr.msk.f32.mxu1 %vm462_vm1, %v826_v3 }
 0x1a3   : > { %v5609_v6 = vpop.permute.xlu1 %5608 }
 0x1a4   : > { %v5611_v9 = vunpack.i.h.bf16 %v5609_v6  ;;  %v5610_v11 = vunpack.i.l.bf16 %v5609_v6 }
 0x1a5   : > { %5256 = vmatpush3.bf16.xpose.msk.msra.mxu1 %vm6352_vm2, %v5251_v1 }
 0x1a6   : > { %5259 = vmatprep.subr.msk.bf16.mxu1 %vm6352_vm2, %v5257_v8  ;;  %v6401_v12 = vpack.c.bf16 %v5611_v9, %v5610_v11 }
 0x1a8   : > { %5264 = vmatprep.subr.bf16.mxu0 %v6401_v12 }
 0x1ad   : > { %5262 = vmatpush3.bf16.xpose.msk.msra.mxu1 %vm6352_vm2, %v5257_v8 }
 0x1b4   : > { %4780 = vmatmul.mubr.msk.f32.vlgmr.msra.gmra.mrb[8].mxu1 %vm462_vm1, %v828_v56 }
 0x1b5   : > { %4782 = vmatprep.mubr.msk.f32.mxu1 %vm462_vm1, %v830_v13 }
 0x1b8   : > { %4783 = vmatmul.mubr.msk.f32.gmra.mrb[10].mxu1 %vm462_vm1, %v832_v59 }
 0x1b9   : > { %4785 = vmatprep.mubr.msk.f32.mxu1 %vm462_vm1, %v834_v14 }
 0x1bc   : > { %4786 = vmatmul.mubr.msk.f32.gmra.mrb[12].mxu1 %vm462_vm1, %v836_v0 }
 0x1bd   : > { %4788 = vmatprep.mubr.msk.f32.mxu1 %vm462_vm1, %v838_v15 }
 0x1c0   : > { %4789 = vmatmul.mubr.msk.f32.gmra.mrb[14].mxu1 %vm462_vm1, %v840_v2 }
 0x267   : > { %v4725_v16 = vpop.f32.mrb[0].mxu1 }
 0x268   : > { %v569_v17 = vpop.f32.mrb[1].mxu1  ;;  %v611_v20 = vsel %vm292_vm0, %v4725_v16, -inf }
 0x269   : > { %612 = vmax.xlane.f32.xlu1 %v611_v20  ;;  %v608_v28 = vsel %vm292_vm0, %v569_v17, -inf }
 0x26a   : > { %609 = vmax.xlane.f32.xlu0 %v608_v28 }
 0x26b   : > { %v4728_v29 = vpop.f32.mrb[2].mxu1 }
 0x26c   : > { %v579_v30 = vpop.f32.mrb[3].mxu1  ;;  %v617_v32 = vsel %vm292_vm0, %v4728_v29, -inf }
 0x26d   : > { %v614_v35 = vsel %vm292_vm0, %v579_v30, -inf }
 0x26e   : > { %618 = vmax.xlane.f32.xlu0 %v617_v32 }
 0x26f   : > { %v6416_v33 = vpop.f32.mrb[4].mxu1 }
 0x270   : > { %v589_v34 = vpop.f32.mrb[5].mxu1  ;;  %v623_v39 = vsel %vm292_vm0, %v6416_v33, -inf }
 0x271   : > { %v620_v36 = vsel %vm292_vm0, %v589_v34, -inf }
 0x272   : > { %615 = vmax.xlane.f32.xlu0 %v614_v35  ;;  %621 = vmax.xlane.f32.xlu1 %v620_v36 }
 0x273   : > { %v6420_v37 = vpop.f32.mrb[6].mxu1 }
 0x274   : > { %v599_v38 = vpop.f32.mrb[7].mxu1  ;;  %v629_v41 = vsel %vm292_vm0, %v6420_v37, -inf }
 0x275   : > { %v626_v40 = vsel %vm292_vm0, %v599_v38, -inf }
 0x276   : > { %624 = vmax.xlane.f32.xlu0 %v623_v39  ;;  %627 = vmax.xlane.f32.xlu1 %v626_v40 }
 0x27a   : > { %630 = vmax.xlane.f32.xlu0 %v629_v41 }
 0x287   : > { %v6427_v42 = vpop.f32.mrb[8].mxu1 }
 0x288   : > { %v6429_v44 = vpop.f32.mrb[9].mxu1  ;;  %v997_v45 = vsel %vm292_vm0, %v6427_v42, -inf }
 0x289   : > { %998 = vmax.xlane.f32.xlu0 %v997_v45  ;;  %v994_v46 = vsel %vm292_vm0, %v6429_v44, -inf }
 0x28a   : > { %995 = vmax.xlane.f32.xlu1 %v994_v46 }
 0x28b   : > { %v6435_v47 = vpop.f32.mrb[10].mxu1 }
 0x28c   : > { %v6437_v48 = vpop.f32.mrb[11].mxu1  ;;  %v1003_v50 = vsel %vm292_vm0, %v6435_v47, -inf }
 0x28d   : > { %1004 = vmax.xlane.f32.xlu0 %v1003_v50  ;;  %v1000_v51 = vsel %vm292_vm0, %v6437_v48, -inf }
 0x28e   : > { %1001 = vmax.xlane.f32.xlu1 %v1000_v51 }
 0x28f   : > { %v6443_v53 = vpop.f32.mrb[12].mxu1 }
 0x290   : > { %v6445_v54 = vpop.f32.mrb[13].mxu1  ;;  %v1009_v55 = vsel %vm292_vm0, %v6443_v53, -inf }
 0x291   : > { %1010 = vmax.xlane.f32.xlu0 %v1009_v55  ;;  %v1006_v56 = vsel %vm292_vm0, %v6445_v54, -inf }
 0x292   : > { %1007 = vmax.xlane.f32.xlu1 %v1006_v56 }
 0x293   : > { %v6451_v57 = vpop.f32.mrb[14].mxu1 }
 0x294   : > { %v6453_v58 = vpop.f32.mrb[15].mxu1  ;;  %v1015_v59 = vsel %vm292_vm0, %v6451_v57, -inf }
 0x295   : > { %1016 = vmax.xlane.f32.xlu0 %v1015_v59  ;;  %v1012_v61 = vsel %vm292_vm0, %v6453_v58, -inf }
 0x2a3   : > { %5618 = vrot.lane.b32.xlu1 %v6301_v10, %s6142_s18 }
 0x2a7   : > { %5623 = vrot.lane.b32.xlu1 %v6313_v21, %s6142_s18 }
 0x2ab   : > { %5613 = vrot.lane.b32.xlu0 %v6293_v63, %s6142_s18 }
 0x2cb   : > { %1013 = vmax.xlane.f32.xlu1 %v1012_v61 }
 0x2f6   : > { %v613_v62 = vpop.xlane.xlu1 %612 }
 0x2f7   : > { %v633_v0 = vsub.f32 %v4725_v16, %v613_v62  ;;  %v610_v1 = vpop.xlane.xlu0 %609 }
 0x2f8   : > { %v632_v2 = vsub.f32 %v569_v17, %v610_v1 }
 0x2f9   : > { %v642_v3 = vmul.f32 1.442695, %v633_v0 }
 0x2fa   : > { %v640_v4 = vmul.f32 1.442695, %v632_v2 }
 0x2fb   : > { %5867 = vpow2.f32 %v642_v3  ;;  %v619_v5 = vpop.xlane.xlu0 %618 }
 0x2fc   : > { %5869 = vpow2.f32 %v640_v4  ;;  %v635_v6 = vsub.f32 %v4728_v29, %v619_v5 }
 0x2fe   : > { %v646_v8 = vmul.f32 1.442695, %v635_v6 }
 0x2ff   : > { %v616_v9 = vpop.xlane.xlu0 %615  ;;  %v622_v11 = vpop.xlane.xlu1 %621 }
 0x300   : > { %5871 = vpow2.f32 %v646_v8  ;;  %v634_v13 = vsub.f32 %v579_v30, %v616_v9  ;;  %v636_v14 = vsub.f32 %v589_v34, %v622_v11 }
 0x302   : > { %v644_v15 = vmul.f32 1.442695, %v634_v13  ;;  %v648_v20 = vmul.f32 1.442695, %v636_v14 }
 0x303   : > { %v625_v28 = vpop.xlane.xlu0 %624  ;;  %v628_v32 = vpop.xlane.xlu1 %627 }
 0x304   : > { %5873 = vpow2.f32 %v644_v15  ;;  %v637_v16 = vsub.f32 %v6416_v33, %v625_v28  ;;  %v638_v17 = vsub.f32 %v599_v38, %v628_v32 }
 0x305   : > { %v6466_v35 = vpop.eup %5867  ;;  %5875 = vpow2.f32 %v648_v20 }
 0x306   : > { %v6468_v36 = vpop.eup %5869  ;;  %v650_v29 = vmul.f32 1.442695, %v637_v16  ;;  %v652_v39 = vmul.f32 1.442695, %v638_v17  ;;  %v659_v40 = vsel %vm292_vm0, %v6466_v35, 0.0 }
 0x307   : > { %v631_v30 = vpop.xlane.xlu0 %630  ;;  %660 = vadd.xlane.f32.xlu0 %v659_v40  ;;  %v656_v34 = vsel %vm292_vm0, %v6468_v36, 0.0 }
 0x308   : > { %5877 = vpow2.f32 %v650_v29  ;;  %v639_v41 = vsub.f32 %v6420_v37, %v631_v30  ;;  %657 = vadd.xlane.f32.xlu1 %v656_v34 }
 0x309   : > { %5879 = vpow2.f32 %v652_v39 }
 0x30a   : > { %v6475_v33 = vpop.eup %5871  ;;  %v654_v38 = vmul.f32 1.442695, %v639_v41 }
 0x30b   : > { %v665_v45 = vsel %vm292_vm0, %v6475_v33, 0.0 }
 0x30c   : > { %5881 = vpow2.f32 %v654_v38  ;;  %666 = vadd.xlane.f32.xlu0 %v665_v45 }
 0x30e   : > { %v6479_v46 = vpop.eup %5873 }
 0x30f   : > { %v662_v50 = vsel %vm292_vm0, %v6479_v46, 0.0  ;;  %v6483_v51 = vpop.eup %5875 }
 0x310   : > { %663 = vadd.xlane.f32.xlu1 %v662_v50  ;;  %v668_v56 = vsel %vm292_vm0, %v6483_v51, 0.0 }
 0x312   : > { %v6485_v55 = vpop.eup %5877 }
 0x313   : > { %v671_v37 = vsel %vm292_vm0, %v6485_v55, 0.0  ;;  %v6491_v59 = vpop.eup %5879 }
 0x314   : > { %672 = vadd.xlane.f32.xlu0 %v671_v37  ;;  %669 = vadd.xlane.f32.xlu1 %v668_v56  ;;  %v674_v3 = vsel %vm292_vm0, %v6491_v59, 0.0 }
 0x316   : > { %v6493_v61 = vpop.eup %5881  ;;  %v999_v62 = vpop.xlane.xlu0 %998 }
 0x317   : > { %v1019_v0 = vsub.f32 %v6427_v42, %v999_v62  ;;  %v996_v1 = vpop.xlane.xlu1 %995  ;;  %v677_v2 = vsel %vm292_vm0, %v6493_v61, 0.0 }
 0x318   : > { %v1018_v4 = vsub.f32 %v6429_v44, %v996_v1  ;;  %678 = vadd.xlane.f32.xlu0 %v677_v2  ;;  %675 = vadd.xlane.f32.xlu1 %v674_v3 }
 0x319   : > { %v1028_v5 = vmul.f32 1.442695, %v1019_v0 }
 0x31a   : > { %v1026_v6 = vmul.f32 1.442695, %v1018_v4  ;;  %v1005_v8 = vpop.xlane.xlu0 %1004 }
 0x31b   : > { %5883 = vpow2.f32 %v1028_v5  ;;  %v1002_v9 = vpop.xlane.xlu1 %1001  ;;  %v1021_v50 = vsub.f32 %v6435_v47, %v1005_v8 }
 0x31c   : > { %5885 = vpow2.f32 %v1026_v6  ;;  %v1020_v11 = vsub.f32 %v6437_v48, %v1002_v9 }
 0x31d   : > { %v1032_v37 = vmul.f32 1.442695, %v1021_v50 }
 0x31e   : > { %v1030_v42 = vmul.f32 1.442695, %v1020_v11  ;;  %v1011_v13 = vpop.xlane.xlu0 %1010 }
 0x31f   : > { %v1023_v14 = vsub.f32 %v6443_v53, %v1011_v13  ;;  %v1008_v15 = vpop.xlane.xlu1 %1007 }
 0x320   : > { %5887 = vpow2.f32 %v1030_v42  ;;  %v1022_v20 = vsub.f32 %v6445_v54, %v1008_v15 }
 0x321   : > { %v1036_v28 = vmul.f32 1.442695, %v1023_v14 }
 0x322   : > { %v1034_v44 = vmul.f32 1.442695, %v1022_v20  ;;  %v1017_v32 = vpop.xlane.xlu0 %1016 }
 0x323   : > { %5889 = vpow2.f32 %v1036_v28  ;;  %v1025_v16 = vsub.f32 %v6451_v57, %v1017_v32  ;;  %v5619_v56 = vpop.permute.xlu1 %5618 }
 0x324   : > { %5891 = vpow2.f32 %v1034_v44 }
 0x325   : > { %v6505_v17 = vpop.eup %5883  ;;  %v1040_v48 = vmul.f32 1.442695, %v1025_v16  ;;  %v5621_v16 = vunpack.i.h.bf16 %v5619_v56 }
 0x326   : > { %v6507_v29 = vpop.eup %5885  ;;  %v1045_v39 = vsel %vm292_vm0, %v6505_v17, 0.0 }
 0x327   : > { %1046 = vadd.xlane.f32.xlu0 %v1045_v39  ;;  %v1042_v53 = vsel %vm292_vm0, %v6507_v29, 0.0  ;;  %5893 = vpow2.f32 %v1040_v48  ;;  %v6532_v62 = vpop.permute.xlu1 %5623  ;;  %v5620_v48 = vunpack.i.l.bf16 %v5619_v56 }
 0x328   : > { %1043 = vadd.xlane.f32.xlu1 %v1042_v53  ;;  %5895 = vpow2.f32 %v1032_v37 }
 0x32a   : > { %v6513_v54 = vpop.eup %5887 }
 0x32b   : > { %v1048_v57 = vsel %vm292_vm0, %v6513_v54, 0.0 }
 0x32c   : > { %1049 = vadd.xlane.f32.xlu0 %v1048_v57 }
 0x32d   : > { %v6517_v40 = vpop.eup %5889 }
 0x32e   : > { %v1057_v30 = vsel %vm292_vm0, %v6517_v40, 0.0  ;;  %v6521_v34 = vpop.eup %5891 }
 0x32f   : > { %v1054_v41 = vsel %vm292_vm0, %v6521_v34, 0.0 }
 0x330   : > { %1058 = vadd.xlane.f32.xlu0 %v1057_v30 }
 0x331   : > { %v6525_v38 = vpop.eup %5893 }
 0x332   : > { %v1063_v45 = vsel %vm292_vm0, %v6525_v38, 0.0  ;;  %v6534_v1 = vpop.eup %5895 }
 0x333   : > { %v1051_v4 = vsel %vm292_vm0, %v6534_v1, 0.0 }
 0x334   : > { %1055 = vadd.xlane.f32.xlu0 %v1054_v41  ;;  %v5625_v41 = vunpack.i.l.bf16 %v6532_v62 }
 0x338   : > { %1064 = vadd.xlane.f32.xlu0 %v1063_v45  ;;  %v5271_v45 = vpack.c.bf16 %v5621_v16, %v5620_v48 }
 0x339   : > { %5628 = vrot.lane.b32.xlu1 %v6285_v49, %s6143_s19 }
 0x358   : > { %v1014_v0 = vpop.xlane.xlu1 %1013 }
 0x359   : > { %v1024_v2 = vsub.f32 %v6453_v58, %v1014_v0  ;;  %v5614_v58 = vpop.permute.xlu0 %5613 }
 0x35a   : > { %v5616_v14 = vunpack.i.h.bf16 %v5614_v58  ;;  %v5615_v15 = vunpack.i.l.bf16 %v5614_v58 }
 0x35b   : > { %v1038_v3 = vmul.f32 1.442695, %v1024_v2 }
 0x35c   : > { %v5267_v39 = vpack.c.bf16 %v5616_v14, %v5615_v15 }
 0x35d   : > { %5897 = vpow2.f32 %v1038_v3  ;;  %1052 = vadd.xlane.f32.xlu1 %v1051_v4 }
 0x367   : > { %v6539_v5 = vpop.eup %5897 }
 0x368   : > { %v1060_v47 = vsel %vm292_vm0, %v6539_v5, 0.0 }
 0x369   : > { %1061 = vadd.xlane.f32.xlu0 %v1060_v47 }
 0x36e   : > { %5638 = vrot.lane.b32.xlu1 %v6299_v7, %s6143_s19 }
 0x372   : > { %5643 = vrot.lane.b32.xlu1 %v6309_v18, %s6143_s19 }
 0x376   : > { %1243 = vrot.lane.b32.xlu1 %v6278_v43, %s6144_s20 }
 0x37a   : > { %1245 = vrot.lane.b32.xlu1 %v6332_v24, %s6144_s20 }
 0x37e   : > { %1249 = vrot.lane.b32.xlu1 %v6336_v25, %s6144_s20 }
 0x37f   : > { %5633 = vrot.lane.b32.xlu0 %v6291_v60, %s6143_s19 }
 0x382   : > { %1253 = vrot.lane.b32.xlu1 %v6340_v26, %s6144_s20 }
 0x383   : > { %1247 = vrot.lane.b32.xlu0 %v6311_v19, %s6144_s20 }
 0x386   : > { %1257 = vrot.lane.b32.xlu1 %v6344_v27, %s6144_s20 }
 0x387   : > { %1251 = vrot.lane.b32.xlu0 %v6319_v22, %s6144_s20 }
 0x38b   : > { %1255 = vrot.lane.b32.xlu0 %v6325_v23, %s6144_s20 }
 0x394   : > { %v661_v6 = vpop.xlane.xlu0 %660 }
 0x395   : > { %5899 = vrcp.f32 %v661_v6  ;;  %v658_v8 = vpop.xlane.xlu1 %657 }
 0x396   : > { %5901 = vrcp.f32 %v658_v8 }
 0x399   : > { %v667_v9 = vpop.xlane.xlu0 %666 }
 0x39a   : > { %5903 = vrcp.f32 %v667_v9 }
 0x39d   : > { %v664_v11 = vpop.xlane.xlu1 %663 }
 0x39e   : > { %5905 = vrcp.f32 %v664_v11 }
 0x39f   : > { %v5900_v42 = vpop.eup %5899 }
 0x3a0   : > { %v5902_v13 = vpop.eup %5901  ;;  %v689_v32 = vmul.f32 %v5900_v42, %v6466_v35  ;;  %v5626_v35 = vunpack.i.h.bf16 %v6532_v62 }
 0x3a1   : > { %v673_v20 = vpop.xlane.xlu0 %672  ;;  %v670_v28 = vpop.xlane.xlu1 %669  ;;  %v688_v44 = vmul.f32 %v5902_v13, %v6468_v36 }
 0x3a2   : > { %5907 = vrcp.f32 %v673_v20  ;;  %v5275_v56 = vpack.c.bf16 %v5626_v35, %v5625_v41 }
 0x3a3   : > { %5909 = vrcp.f32 %v670_v28  ;;  %4751 = vmatprep.mubr.msk.f32.mxu0 %vm292_vm0, %v688_v44 }
 0x3a4   : > { %4752 = vmatmul.mubr.msk.f32.vlgmr.msra.gmra.mrb[16].mxu0 %vm292_vm0, %v689_v32  ;;  %v5904_v30 = vpop.eup %5903 }
 0x3a5   : > { %5266 = vmatpush3.bf16.msra.mxu0 %v6401_v12  ;;  %v679_v53 = vpop.xlane.xlu0 %678  ;;  %v676_v57 = vpop.xlane.xlu1 %675  ;;  %v691_v37 = vmul.f32 %v5904_v30, %v6475_v33 }
 0x3a6   : > { %5911 = vrcp.f32 %v679_v53  ;;  %5268 = vmatprep.subr.bf16.mxu0 %v5267_v39 }
 0x3a7   : > { %5913 = vrcp.f32 %v676_v57 }
 0x3a8   : > { %v5906_v36 = vpop.eup %5905 }
 0x3a9   : > { %5270 = vmatpush3.bf16.msra.mxu0 %v5267_v39  ;;  %v690_v50 = vmul.f32 %v5906_v36, %v6479_v46 }
 0x3aa   : > { %5272 = vmatprep.subr.bf16.mxu0 %v5271_v45 }
 0x3ab   : > { %4754 = vmatprep.mubr.msk.f32.mxu0 %vm292_vm0, %v690_v50 }
 0x3ac   : > { %v5908_v12 = vpop.eup %5907  ;;  %4755 = vmatmul.mubr.msk.f32.gmra.mrb[18].mxu0 %vm292_vm0, %v691_v37 }
 0x3ad   : > { %v5910_v0 = vpop.eup %5909  ;;  %5274 = vmatpush3.bf16.msra.mxu0 %v5271_v45  ;;  %v693_v2 = vmul.f32 %v5908_v12, %v6485_v55 }
 0x3ae   : > { %5276 = vmatprep.subr.bf16.mxu0 %v5275_v56  ;;  %v692_v62 = vmul.f32 %v5910_v0, %v6483_v51 }
 0x3b0   : > { %v5912_v3 = vpop.eup %5911  ;;  %4757 = vmatprep.mubr.msk.f32.mxu0 %vm292_vm0, %v692_v62 }
 0x3b1   : > { %v5914_v46 = vpop.eup %5913  ;;  %4758 = vmatmul.mubr.msk.f32.gmra.mrb[20].mxu0 %vm292_vm0, %v693_v2  ;;  %v695_v33 = vmul.f32 %v5912_v3, %v6493_v61 }
 0x3b2   : > { %5278 = vmatpush3.bf16.msra.mxu0 %v5275_v56  ;;  %v694_v4 = vmul.f32 %v5914_v46, %v6491_v59 }
 0x3b4   : > { %4760 = vmatprep.mubr.msk.f32.mxu0 %vm292_vm0, %v694_v4  ;;  %v1047_v47 = vpop.xlane.xlu0 %1046 }
 0x3b5   : > { %5915 = vrcp.f32 %v1047_v47  ;;  %4761 = vmatmul.mubr.msk.f32.gmra.mrb[22].mxu0 %vm292_vm0, %v695_v33  ;;  %v1044_v55 = vpop.xlane.xlu1 %1043 }
 0x3b6   : > { %5917 = vrcp.f32 %v1044_v55 }
 0x3b9   : > { %v1050_v51 = vpop.xlane.xlu0 %1049  ;;  %v5629_v58 = vpop.permute.xlu1 %5628 }
 0x3ba   : > { %5919 = vrcp.f32 %v1050_v51  ;;  %v5631_v6 = vunpack.i.h.bf16 %v5629_v58  ;;  %v5630_v8 = vunpack.i.l.bf16 %v5629_v58 }
 0x3bc   : > { %v5279_v9 = vpack.c.bf16 %v5631_v6, %v5630_v8 }
 0x3bd   : > { %v1059_v15 = vpop.xlane.xlu0 %1058 }
 0x3be   : > { %5281 = vmatprep.subr.msk.bf16.mxu0 %vm6352_vm2, %v5279_v9 }
 0x3bf   : > { %v5916_v61 = vpop.eup %5915 }
 0x3c0   : > { %v5918_v11 = vpop.eup %5917  ;;  %v1075_v42 = vmul.f32 %v5916_v61, %v6505_v17 }
 0x3c1   : > { %v1074_v59 = vmul.f32 %v5918_v11, %v6507_v29  ;;  %v1056_v20 = vpop.xlane.xlu0 %1055 }
 0x3c2   : > { %5921 = vrcp.f32 %v1056_v20 }
 0x3c3   : > { %4807 = vmatprep.mubr.msk.f32.mxu0 %vm292_vm0, %v1074_v59 }
 0x3c4   : > { %v5920_v13 = vpop.eup %5919  ;;  %4808 = vmatmul.mubr.msk.f32.vlgmr.msra.gmra.mrb[24].mxu0 %vm292_vm0, %v1075_v42 }
 0x3c5   : > { %5284 = vmatpush3.bf16.xpose.msk.msra.mxu0 %vm6352_vm2, %v5279_v9  ;;  %v1076_v14 = vmul.f32 %v5920_v13, %v6513_v54  ;;  %v1065_v29 = vpop.xlane.xlu0 %1064 }
 0x3c7   : > { %4810 = vmatprep.mubr.msk.f32.mxu0 %vm292_vm0, %v1076_v14 }
 0x3cc   : > { %v5922_v17 = vpop.eup %5921 }
 0x3cd   : > { %v1078_v39 = vmul.f32 %v5922_v17, %v6521_v34 }
 0x3ea   : > { %v1053_v28 = vpop.xlane.xlu1 %1052 }
 0x3eb   : > { %5923 = vrcp.f32 %v1053_v28 }
 0x3ec   : > { %5925 = vrcp.f32 %v1059_v15 }
 0x3ed   : > { %5927 = vrcp.f32 %v1065_v29 }
 0x3ee   : > { %v5639_v54 = vpop.permute.xlu1 %5638 }
 0x3ef   : > { %v5641_v30 = vunpack.i.h.bf16 %v5639_v54  ;;  %v5640_v36 = vunpack.i.l.bf16 %v5639_v54 }
 0x3f2   : > { %v5644_v50 = vpop.permute.xlu1 %5643 }
 0x3f3   : > { %v5646_v12 = vunpack.i.h.bf16 %v5644_v50  ;;  %v5645_v56 = vunpack.i.l.bf16 %v5644_v50 }
 0x3f5   : > { %v5924_v44 = vpop.eup %5923  ;;  %v5297_v62 = vpack.c.bf16 %v5646_v12, %v5645_v56 }
 0x3f6   : > { %v1062_v32 = vpop.xlane.xlu0 %1061  ;;  %v1077_v16 = vmul.f32 %v5924_v44, %v6534_v1  ;;  %v5926_v48 = vpop.eup %5925  ;;  %v5291_v1 = vpack.c.bf16 %v5641_v30, %v5640_v36 }
 0x3f7   : > { %5929 = vrcp.f32 %v1062_v32  ;;  %v1079_v57 = vmul.f32 %v5926_v48, %v6517_v40  ;;  %v5928_v34 = vpop.eup %5927  ;;  %v1244_v2 = vpop.permute.xlu1 %1243 }
 0x3f8   : > { %4811 = vmatmul.mubr.msk.f32.gmra.mrb[26].mxu0 %vm292_vm0, %v1077_v16  ;;  %v1081_v0 = vmul.f32 %v5928_v34, %v6525_v38 }
 0x3f9   : > { %4813 = vmatprep.mubr.msk.f32.mxu0 %vm292_vm0, %v1078_v39 }
 0x3fa   : > { %v5634_v53 = vpop.permute.xlu0 %5633 }
 0x3fb   : > { %v5636_v35 = vunpack.i.h.bf16 %v5634_v53  ;;  %v5635_v41 = vunpack.i.l.bf16 %v5634_v53  ;;  %v1246_v3 = vpop.permute.xlu1 %1245 }
 0x3fc   : > { %4814 = vmatmul.mubr.msk.f32.gmra.mrb[28].mxu0 %vm292_vm0, %v1079_v57 }
 0x3fd   : > { %v5285_v45 = vpack.c.bf16 %v5636_v35, %v5635_v41 }
 0x3ff   : > { %5287 = vmatprep.subr.msk.bf16.mxu0 %vm6352_vm2, %v5285_v45  ;;  %v1250_v38 = vpop.permute.xlu1 %1249 }
 0x400   : > { %5290 = vmatpush3.bf16.xpose.msk.msra.mxu0 %vm6352_vm2, %v5285_v45 }
 0x401   : > { %v5930_v37 = vpop.eup %5929  ;;  %5293 = vmatprep.subr.msk.bf16.mxu0 %vm6352_vm2, %v5291_v1 }
 0x402   : > { %v1080_v40 = vmul.f32 %v5930_v37, %v6539_v5  ;;  %v1248_v5 = vpop.permute.xlu0 %1247 }
 0x403   : > { %v1254_v33 = vpop.permute.xlu1 %1253 }
 0x404   : > { %4816 = vmatprep.mubr.msk.f32.mxu0 %vm292_vm0, %v1080_v40 }
 0x405   : > { %4817 = vmatmul.mubr.msk.f32.gmra.mrb[30].mxu0 %vm292_vm0, %v1081_v0 }
 0x406   : > { %4835 = vmatprep.mubr.msk.f32.mxu0 %vm462_vm1, %v1244_v2  ;;  %v1252_v46 = vpop.permute.xlu0 %1251 }
 0x407   : > { %v1258_v47 = vpop.permute.xlu1 %1257 }
 0x408   : > { %5296 = vmatpush3.bf16.xpose.msk.msra.mxu0 %vm6352_vm2, %v5291_v1 }
 0x409   : > { %5299 = vmatprep.subr.msk.bf16.mxu0 %vm6352_vm2, %v5297_v62 }
 0x40a   : > { %v1256_v4 = vpop.permute.xlu0 %1255 }
 0x410   : > { %5302 = vmatpush3.bf16.xpose.msk.msra.mxu0 %vm6352_vm2, %v5297_v62 }
 0x417   : > { %4836 = vmatmul.mubr.msk.f32.vlgmr.msra.gmra.mrb[32].mxu0 %vm462_vm1, %v1246_v3 }
 0x418   : > { %4838 = vmatprep.mubr.msk.f32.mxu0 %vm462_vm1, %v1248_v5 }
 0x41b   : > { %4839 = vmatmul.mubr.msk.f32.gmra.mrb[34].mxu0 %vm462_vm1, %v1250_v38 }
 0x41c   : > { %4841 = vmatprep.mubr.msk.f32.mxu0 %vm462_vm1, %v1252_v46 }
 0x41f   : > { %4842 = vmatmul.mubr.msk.f32.gmra.mrb[36].mxu0 %vm462_vm1, %v1254_v33 }
 0x420   : > { %4844 = vmatprep.mubr.msk.f32.mxu0 %vm462_vm1, %v1256_v4 }
 0x423   : > { %4845 = vmatmul.mubr.msk.f32.gmra.mrb[38].mxu0 %vm462_vm1, %v1258_v47 }
 0x477   : > { %v6624_v55 = vpop.f32.mrb[16].mxu0 }
 0x478   : > { %7690 = vst [vmem:[#allocation3_spill] sm:$0xff] %v6624_v55  ;;  %v6626_v51 = vpop.f32.mrb[17].mxu0 }
 0x479   : > { %7691 = vst [vmem:[#allocation4_spill] sm:$0xff] %v6626_v51 }
 0x47f   : > { %v6628_v58 = vpop.f32.mrb[18].mxu0 }
 0x480   : > { %7692 = vst [vmem:[#allocation5_spill] sm:$0xff] %v6628_v58  ;;  %v6630_v6 = vpop.f32.mrb[19].mxu0 }
 0x481   : > { %7693 = vst [vmem:[#allocation6_spill] sm:$0xff] %v6630_v6 }
 0x484   : > { %v6632_v8 = vpop.f32.mrb[20].mxu0 }
 0x485   : > { %7694 = vst [vmem:[#allocation7_spill] sm:$0xff] %v6632_v8  ;;  %v6634_v9 = vpop.f32.mrb[21].mxu0 }
 0x486   : > { %7695 = vst [vmem:[#allocation8_spill] sm:$0xff] %v6634_v9 }
 0x488   : > { %v6636_v61 = vpop.f32.mrb[22].mxu0 }
 0x489   : > { %7696 = vst [vmem:[#allocation9_spill] sm:$0xff] %v6636_v61  ;;  %v6638_v11 = vpop.f32.mrb[23].mxu0 }
 0x48a   : > { %7697 = vst [vmem:[#allocation10_spill] sm:$0xff] %v6638_v11 }
 0x497   : > { %v6640_v59 = vpop.f32.mrb[24].mxu0 }
 0x498   : > { %v6642_v42 = vpop.f32.mrb[25].mxu0 }
 0x4cb   : > { %v6644_v13 = vpop.f32.mrb[26].mxu0 }
 0x4cc   : > { %v6646_v14 = vpop.f32.mrb[27].mxu0 }
 0x4cf   : > { %v6648_v15 = vpop.f32.mrb[28].mxu0 }
 0x4d0   : > { %v6650_v20 = vpop.f32.mrb[29].mxu0 }
 0x4d8   : > { %v6652_v28 = vpop.f32.mrb[30].mxu0 }
 0x4d9   : > { %v6654_v29 = vpop.f32.mrb[31].mxu0 }
 0x4ea   : > { %v4837_v17 = vpop.f32.mrb[32].mxu0 }
 0x4eb   : > { %v1373_v44 = vpop.f32.mrb[33].mxu0  ;;  %v1415_v32 = vsel %vm292_vm0, %v4837_v17, -inf }
 0x4ec   : > { %1416 = vmax.xlane.f32.xlu1 %v1415_v32  ;;  %v1412_v16 = vsel %vm292_vm0, %v1373_v44, -inf }
 0x4ed   : > { %1413 = vmax.xlane.f32.xlu0 %v1412_v16 }
 0x4ee   : > { %v6658_v48 = vpop.f32.mrb[34].mxu0 }
 0x4ef   : > { %v1383_v39 = vpop.f32.mrb[35].mxu0  ;;  %v1421_v54 = vsel %vm292_vm0, %v6658_v48, -inf }
 0x4f0   : > { %v1418_v30 = vsel %vm292_vm0, %v1383_v39, -inf }
 0x4f1   : > { %1422 = vmax.xlane.f32.xlu0 %v1421_v54 }
 0x4f2   : > { %v4843_v53 = vpop.f32.mrb[36].mxu0 }
 0x4f3   : > { %v6662_v57 = vpop.f32.mrb[37].mxu0  ;;  %v1427_v41 = vsel %vm292_vm0, %v4843_v53, -inf }
 0x4f4   : > { %v1424_v1 = vsel %vm292_vm0, %v6662_v57, -inf }
 0x4f5   : > { %1419 = vmax.xlane.f32.xlu0 %v1418_v30 }
 0x4f6   : > { %v6665_v36 = vpop.f32.mrb[38].mxu0 }
 0x4f7   : > { %v6667_v35 = vpop.f32.mrb[39].mxu0  ;;  %v1433_v45 = vsel %vm292_vm0, %v6665_v36, -inf }
 0x4f8   : > { %v1430_v50 = vsel %vm292_vm0, %v6667_v35, -inf }
 0x4f9   : > { %1428 = vmax.xlane.f32.xlu0 %v1427_v41 }
 0x4fd   : > { %5648 = vrot.lane.b32.xlu1 %v6287_v52, %s6144_s20  ;;  %1434 = vmax.xlane.f32.xlu0 %v1433_v45 }
 0x513   : > { %5653 = vrot.lane.b32.xlu0 %v6293_v63, %s6144_s20 }
 0x521   : > { %1425 = vmax.xlane.f32.xlu1 %v1424_v1 }
 0x532   : > { %5658 = vrot.lane.b32.xlu1 %v6301_v10, %s6144_s20 }
 0x556   : > { %1431 = vmax.xlane.f32.xlu1 %v1430_v50 }
 0x567   : > { %5663 = vrot.lane.b32.xlu1 %v6313_v21, %s6144_s20 }
 0x579   : > { %v1417_v34 = vpop.xlane.xlu1 %1416 }
 0x57a   : > { %v1437_v37 = vsub.f32 %v4837_v17, %v1417_v34  ;;  %v1414_v40 = vpop.xlane.xlu0 %1413 }
 0x57b   : > { %v1436_v12 = vsub.f32 %v1373_v44, %v1414_v40 }
 0x57c   : > { %v1446_v56 = vmul.f32 1.442695, %v1437_v37 }
 0x57d   : > { %v1444_v0 = vmul.f32 1.442695, %v1436_v12  ;;  %v5649_v2 = vpop.permute.xlu1 %5648 }
 0x57e   : > { %5931 = vpow2.f32 %v1446_v56  ;;  %v5651_v62 = vunpack.i.h.bf16 %v5649_v2  ;;  %v5650_v3 = vunpack.i.l.bf16 %v5649_v2  ;;  %v1423_v5 = vpop.xlane.xlu0 %1422 }
 0x57f   : > { %5933 = vpow2.f32 %v1444_v0  ;;  %v1439_v12 = vsub.f32 %v6658_v48, %v1423_v5 }
 0x580   : > { %v5303_v38 = vpack.c.bf16 %v5651_v62, %v5650_v3 }
 0x581   : > { %v1450_v0 = vmul.f32 1.442695, %v1439_v12 }
 0x582   : > { %5304 = vmatprep.subr.bf16.mxu1 %v5303_v38  ;;  %v1420_v46 = vpop.xlane.xlu0 %1419 }
 0x583   : > { %v1438_v33 = vsub.f32 %v1383_v39, %v1420_v46  ;;  %5306 = vmatpush3.bf16.msra.mxu1 %v5303_v38 }
 0x585   : > { %v1448_v4 = vmul.f32 1.442695, %v1438_v33 }
 0x586   : > { %v1429_v47 = vpop.xlane.xlu0 %1428 }
 0x587   : > { %5935 = vpow2.f32 %v1448_v4  ;;  %v1441_v32 = vsub.f32 %v4843_v53, %v1429_v47 }
 0x588   : > { %v6684_v17 = vpop.eup %5931 }
 0x589   : > { %v6686_v44 = vpop.eup %5933  ;;  %v1454_v16 = vmul.f32 1.442695, %v1441_v32  ;;  %v1463_v54 = vsel %vm292_vm0, %v6684_v17, 0.0 }
 0x58a   : > { %1464 = vadd.xlane.f32.xlu0 %v1463_v54  ;;  %v1435_v30 = vpop.xlane.xlu0 %1434  ;;  %v1460_v41 = vsel %vm292_vm0, %v6686_v44, 0.0 }
 0x58b   : > { %5937 = vpow2.f32 %v1454_v16  ;;  %1461 = vadd.xlane.f32.xlu1 %v1460_v41  ;;  %v1443_v56 = vsub.f32 %v6665_v36, %v1435_v30 }
 0x58c   : > { %5939 = vpow2.f32 %v1450_v0 }
 0x58d   : > { %v1458_v3 = vmul.f32 1.442695, %v1443_v56 }
 0x58e   : > { %v5654_v39 = vpop.permute.xlu0 %5653 }
 0x58f   : > { %v5656_v45 = vunpack.i.h.bf16 %v5654_v39  ;;  %v5655_v1 = vunpack.i.l.bf16 %v5654_v39 }
 0x591   : > { %v6692_v50 = vpop.eup %5935  ;;  %v5307_v53 = vpack.c.bf16 %v5656_v45, %v5655_v1 }
 0x592   : > { %v1466_v34 = vsel %vm292_vm0, %v6692_v50, 0.0 }
 0x593   : > { %1467 = vadd.xlane.f32.xlu0 %v1466_v34  ;;  %5308 = vmatprep.subr.bf16.mxu1 %v5307_v53 }
 0x594   : > { %5310 = vmatpush3.bf16.msra.mxu1 %v5307_v53 }
 0x595   : > { %v6696_v37 = vpop.eup %5937 }
 0x596   : > { %v1475_v40 = vsel %vm292_vm0, %v6696_v37, 0.0  ;;  %v6705_v32 = vpop.eup %5939 }
 0x597   : > { %1476 = vadd.xlane.f32.xlu0 %v1475_v40 }
 0x59c   : > { %5668 = vrot.lane.b32.xlu1 %v6285_v49, %s6145_s21 }
 0x5ae   : > { %v1426_v2 = vpop.xlane.xlu1 %1425 }
 0x5af   : > { %v1440_v62 = vsub.f32 %v6662_v57, %v1426_v2  ;;  %v1469_v57 = vsel %vm292_vm0, %v6705_v32, 0.0 }
 0x5b1   : > { %v1452_v38 = vmul.f32 1.442695, %v1440_v62 }
 0x5b2   : > { %v5659_v46 = vpop.permute.xlu1 %5658 }
 0x5b3   : > { %5941 = vpow2.f32 %v1452_v38  ;;  %v5661_v33 = vunpack.i.h.bf16 %v5659_v46  ;;  %v5660_v4 = vunpack.i.l.bf16 %v5659_v46 }
 0x5b4   : > { %5943 = vpow2.f32 %v1458_v3 }
 0x5b5   : > { %v5311_v47 = vpack.c.bf16 %v5661_v33, %v5660_v4 }
 0x5b7   : > { %5312 = vmatprep.subr.bf16.mxu1 %v5311_v47 }
 0x5b8   : > { %5314 = vmatpush3.bf16.msra.mxu1 %v5311_v47 }
 0x5bd   : > { %v6707_v48 = vpop.eup %5941 }
 0x5be   : > { %v1472_v36 = vsel %vm292_vm0, %v6707_v48, 0.0  ;;  %v6711_v5 = vpop.eup %5943 }
 0x5bf   : > { %1473 = vadd.xlane.f32.xlu0 %v1472_v36  ;;  %v1481_v16 = vsel %vm292_vm0, %v6711_v5, 0.0 }
 0x5c0   : > { %1470 = vadd.xlane.f32.xlu1 %v1469_v57 }
 0x5c3   : > { %1482 = vadd.xlane.f32.xlu0 %v1481_v16 }
 0x5d1   : > { %5678 = vrot.lane.b32.xlu1 %v6299_v7, %s6145_s21 }
 0x5d5   : > { %5683 = vrot.lane.b32.xlu1 %v6309_v18, %s6145_s21 }
 0x5d9   : > { %1653 = vrot.lane.b32.xlu1 %v6278_v43, %s6146_s22 }
 0x5dd   : > { %1655 = vrot.lane.b32.xlu1 %v6332_v24, %s6146_s22 }
 0x5e1   : > { %1659 = vrot.lane.b32.xlu1 %v6336_v25, %s6146_s22 }
 0x5e3   : > { %v1432_v54 = vpop.xlane.xlu1 %1431 }
 0x5e4   : > { %v1442_v30 = vsub.f32 %v6667_v35, %v1432_v54 }
 0x5e5   : > { %1663 = vrot.lane.b32.xlu1 %v6340_v26, %s6146_s22 }
 0x5e6   : > { %v1456_v41 = vmul.f32 1.442695, %v1442_v30 }
 0x5e7   : > { %v5664_v39 = vpop.permute.xlu1 %5663 }
 0x5e8   : > { %5945 = vpow2.f32 %v1456_v41  ;;  %v5666_v45 = vunpack.i.h.bf16 %v5664_v39  ;;  %v5665_v1 = vunpack.i.l.bf16 %v5664_v39 }
 0x5e9   : > { %1667 = vrot.lane.b32.xlu1 %v6344_v27, %s6146_s22 }
 0x5ea   : > { %v5315_v53 = vpack.c.bf16 %v5666_v45, %v5665_v1 }
 0x5ec   : > { %5316 = vmatprep.subr.bf16.mxu1 %v5315_v53 }
 0x5ed   : > { %5318 = vmatpush3.bf16.msra.mxu1 %v5315_v53 }
 0x5f2   : > { %v5946_v34 = vpop.eup %5945 }
 0x5f3   : > { %v1478_v40 = vsel %vm292_vm0, %v5946_v34, 0.0 }
 0x5f4   : > { %1479 = vadd.xlane.f32.xlu0 %v1478_v40 }
 0x60a   : > { %5673 = vrot.lane.b32.xlu0 %v6291_v60, %s6145_s21 }
 0x60e   : > { %1657 = vrot.lane.b32.xlu0 %v6311_v19, %s6146_s22 }
 0x612   : > { %1661 = vrot.lane.b32.xlu0 %v6319_v22, %s6146_s22 }
 0x616   : > { %1665 = vrot.lane.b32.xlu0 %v6325_v23, %s6146_s22 }
 0x617   : > { %v1465_v35 = vpop.xlane.xlu0 %1464 }
 0x618   : > { %5947 = vrcp.f32 %v1465_v35  ;;  %v1462_v12 = vpop.xlane.xlu1 %1461 }
 0x619   : > { %5949 = vrcp.f32 %v1462_v12 }
 0x61c   : > { %v5669_v56 = vpop.permute.xlu1 %5668 }
 0x61d   : > { %v5671_v0 = vunpack.i.h.bf16 %v5669_v56  ;;  %v5670_v2 = vunpack.i.l.bf16 %v5669_v56 }
 0x61f   : > { %v5319_v62 = vpack.c.bf16 %v5671_v0, %v5670_v2 }
 0x620   : > { %v1468_v3 = vpop.xlane.xlu0 %1467 }
 0x621   : > { %5951 = vrcp.f32 %v1468_v3  ;;  %5321 = vmatprep.subr.msk.bf16.mxu1 %vm6352_vm2, %v5319_v62 }
 0x622   : > { %v5948_v38 = vpop.eup %5947 }
 0x623   : > { %v5950_v46 = vpop.eup %5949  ;;  %v1493_v4 = vmul.f32 %v5948_v38, %v6684_v17 }
 0x624   : > { %v1492_v33 = vmul.f32 %v5950_v46, %v6686_v44  ;;  %v1477_v57 = vpop.xlane.xlu0 %1476 }
 0x626   : > { %4863 = vmatprep.mubr.msk.f32.mxu1 %vm292_vm0, %v1492_v33 }
 0x627   : > { %4864 = vmatmul.mubr.msk.f32.vlgmr.msra.gmra.mrb[16].mxu1 %vm292_vm0, %v1493_v4 }
 0x628   : > { %5324 = vmatpush3.bf16.xpose.msk.msra.mxu1 %vm6352_vm2, %v5319_v62 }
 0x62b   : > { %v5952_v47 = vpop.eup %5951 }
 0x62c   : > { %v1494_v36 = vmul.f32 %v5952_v47, %v6692_v50 }
 0x62e   : > { %4866 = vmatprep.mubr.msk.f32.mxu1 %vm292_vm0, %v1494_v36 }
 0x64c   : > { %v1474_v16 = vpop.xlane.xlu0 %1473 }
 0x64d   : > { %5953 = vrcp.f32 %v1474_v16  ;;  %v1471_v54 = vpop.xlane.xlu1 %1470 }
 0x64e   : > { %5955 = vrcp.f32 %v1471_v54 }
 0x64f   : > { %5957 = vrcp.f32 %v1477_v57 }
 0x650   : > { %v1483_v45 = vpop.xlane.xlu0 %1482 }
 0x651   : > { %5959 = vrcp.f32 %v1483_v45  ;;  %v5679_v53 = vpop.permute.xlu1 %5678 }
 0x652   : > { %v5681_v35 = vunpack.i.h.bf16 %v5679_v53  ;;  %v5680_v12 = vunpack.i.l.bf16 %v5679_v53 }
 0x655   : > { %v5684_v2 = vpop.permute.xlu1 %5683 }
 0x656   : > { %v5686_v38 = vunpack.i.h.bf16 %v5684_v2  ;;  %v5685_v46 = vunpack.i.l.bf16 %v5684_v2 }
 0x657   : > { %v5954_v44 = vpop.eup %5953 }
 0x658   : > { %v5956_v17 = vpop.eup %5955  ;;  %v1496_v39 = vmul.f32 %v5954_v44, %v6707_v48  ;;  %v5331_v48 = vpack.c.bf16 %v5681_v35, %v5680_v12  ;;  %v5337_v47 = vpack.c.bf16 %v5686_v38, %v5685_v46 }
 0x659   : > { %v1495_v30 = vmul.f32 %v5956_v17, %v6705_v32  ;;  %v5958_v41 = vpop.eup %5957  ;;  %v1654_v4 = vpop.permute.xlu1 %1653 }
 0x65a   : > { %v1497_v50 = vmul.f32 %v5958_v41, %v6696_v37 }
 0x65b   : > { %4867 = vmatmul.mubr.msk.f32.gmra.mrb[18].mxu1 %vm292_vm0, %v1495_v30  ;;  %v5960_v62 = vpop.eup %5959 }
 0x65c   : > { %4869 = vmatprep.mubr.msk.f32.mxu1 %vm292_vm0, %v1496_v39  ;;  %v1499_v33 = vmul.f32 %v5960_v62, %v6711_v5 }
 0x65d   : > { %v1656_v36 = vpop.permute.xlu1 %1655 }
 0x65f   : > { %4870 = vmatmul.mubr.msk.f32.gmra.mrb[20].mxu1 %vm292_vm0, %v1497_v50 }
 0x661   : > { %v1660_v5 = vpop.permute.xlu1 %1659 }
 0x665   : > { %v1664_v16 = vpop.permute.xlu1 %1663 }
 0x669   : > { %v1668_v44 = vpop.permute.xlu1 %1667 }
 0x681   : > { %v1480_v1 = vpop.xlane.xlu0 %1479 }
 0x682   : > { %5961 = vrcp.f32 %v1480_v1 }
 0x685   : > { %v5674_v40 = vpop.permute.xlu0 %5673 }
 0x686   : > { %v5676_v32 = vunpack.i.h.bf16 %v5674_v40  ;;  %v5675_v56 = vunpack.i.l.bf16 %v5674_v40 }
 0x688   : > { %v5325_v0 = vpack.c.bf16 %v5676_v32, %v5675_v56 }
 0x68a   : > { %5327 = vmatprep.subr.msk.bf16.mxu1 %vm6352_vm2, %v5325_v0 }
 0x68b   : > { %5330 = vmatpush3.bf16.xpose.msk.msra.mxu1 %vm6352_vm2, %v5325_v0 }
 0x68c   : > { %v5962_v37 = vpop.eup %5961  ;;  %5333 = vmatprep.subr.msk.bf16.mxu1 %vm6352_vm2, %v5331_v48 }
 0x68d   : > { %v1498_v3 = vmul.f32 %v5962_v37, %v5946_v34  ;;  %v1658_v34 = vpop.permute.xlu0 %1657 }
 0x68f   : > { %4872 = vmatprep.mubr.msk.f32.mxu1 %vm292_vm0, %v1498_v3 }
 0x690   : > { %4873 = vmatmul.mubr.msk.f32.gmra.mrb[22].mxu1 %vm292_vm0, %v1499_v33 }
 0x691   : > { %4891 = vmatprep.mubr.msk.f32.mxu1 %vm462_vm1, %v1654_v4  ;;  %v1662_v57 = vpop.permute.xlu0 %1661 }
 0x693   : > { %5336 = vmatpush3.bf16.xpose.msk.msra.mxu1 %vm6352_vm2, %v5331_v48 }
 0x694   : > { %5339 = vmatprep.subr.msk.bf16.mxu1 %vm6352_vm2, %v5337_v47 }
 0x695   : > { %v1666_v54 = vpop.permute.xlu0 %1665 }
 0x69b   : > { %5342 = vmatpush3.bf16.xpose.msk.msra.mxu1 %vm6352_vm2, %v5337_v47 }
 0x6a2   : > { %4892 = vmatmul.mubr.msk.f32.vlgmr.msra.gmra.mrb[24].mxu1 %vm462_vm1, %v1656_v36 }
 0x6a3   : > { %4894 = vmatprep.mubr.msk.f32.mxu1 %vm462_vm1, %v1658_v34 }
 0x6a6   : > { %4895 = vmatmul.mubr.msk.f32.gmra.mrb[26].mxu1 %vm462_vm1, %v1660_v5 }
 0x6a7   : > { %4897 = vmatprep.mubr.msk.f32.mxu1 %vm462_vm1, %v1662_v57 }
 0x6aa   : > { %4898 = vmatmul.mubr.msk.f32.gmra.mrb[28].mxu1 %vm462_vm1, %v1664_v16 }
 0x6ab   : > { %4900 = vmatprep.mubr.msk.f32.mxu1 %vm462_vm1, %v1666_v54 }
 0x6ae   : > { %4901 = vmatmul.mubr.msk.f32.gmra.mrb[30].mxu1 %vm462_vm1, %v1668_v44 }
 0x6fa   : > { %v6780_v17 = vpop.f32.mrb[16].mxu1 }
 0x6fb   : > { %v6782_v30 = vpop.f32.mrb[17].mxu1 }
 0x72e   : > { %v6784_v41 = vpop.f32.mrb[18].mxu1 }
 0x72f   : > { %7698 = vst [vmem:[#allocation11_spill] sm:$0xff] %v6784_v41  ;;  %v6786_v39 = vpop.f32.mrb[19].mxu1 }
 0x730   : > { %7699 = vst [vmem:[#allocation12_spill] sm:$0xff] %v6786_v39 }
 0x732   : > { %v6788_v50 = vpop.f32.mrb[20].mxu1 }
 0x733   : > { %v6790_v45 = vpop.f32.mrb[21].mxu1 }
 0x763   : > { %v6792_v1 = vpop.f32.mrb[22].mxu1 }
 0x764   : > { %7700 = vst [vmem:[#allocation13_spill] sm:$0xff] %v6792_v1  ;;  %v6794_v53 = vpop.f32.mrb[23].mxu1 }
 0x775   : > { %v4893_v40 = vpop.f32.mrb[24].mxu1 }
 0x776   : > { %v1783_v35 = vpop.f32.mrb[25].mxu1  ;;  %v1825_v12 = vsel %vm292_vm0, %v4893_v40, -inf }
 0x777   : > { %1826 = vmax.xlane.f32.xlu1 %v1825_v12  ;;  %v1822_v32 = vsel %vm292_vm0, %v1783_v35, -inf }
 0x778   : > { %1823 = vmax.xlane.f32.xlu0 %v1822_v32 }
 0x779   : > { %v6798_v56 = vpop.f32.mrb[26].mxu1 }
 0x77a   : > { %v1793_v0 = vpop.f32.mrb[27].mxu1  ;;  %v1831_v48 = vsel %vm292_vm0, %v6798_v56, -inf }
 0x77b   : > { %v1828_v37 = vsel %vm292_vm0, %v1793_v0, -inf }
 0x77c   : > { %1832 = vmax.xlane.f32.xlu0 %v1831_v48 }
 0x77d   : > { %v4899_v2 = vpop.f32.mrb[28].mxu1 }
 0x77e   : > { %v6802_v62 = vpop.f32.mrb[29].mxu1  ;;  %v1837_v46 = vsel %vm292_vm0, %v4899_v2, -inf }
 0x77f   : > { %v1834_v4 = vsel %vm292_vm0, %v6802_v62, -inf }
 0x780   : > { %1829 = vmax.xlane.f32.xlu0 %v1828_v37 }
 0x781   : > { %v6805_v3 = vpop.f32.mrb[30].mxu1 }
 0x782   : > { %v6807_v38 = vpop.f32.mrb[31].mxu1  ;;  %v1843_v33 = vsel %vm292_vm0, %v6805_v3, -inf }
 0x783   : > { %v1840_v47 = vsel %vm292_vm0, %v6807_v38, -inf }
 0x784   : > { %1838 = vmax.xlane.f32.xlu0 %v1837_v46 }
 0x788   : > { %5688 = vrot.lane.b32.xlu1 %v6287_v52, %s6146_s22  ;;  %1844 = vmax.xlane.f32.xlu0 %v1843_v33 }
 0x79e   : > { %5693 = vrot.lane.b32.xlu0 %v6293_v63, %s6146_s22 }
 0x7ac   : > { %1835 = vmax.xlane.f32.xlu1 %v1834_v4 }
 0x7bd   : > { %5698 = vrot.lane.b32.xlu1 %v6301_v10, %s6146_s22 }
 0x7e1   : > { %1841 = vmax.xlane.f32.xlu1 %v1840_v47 }
 0x7f2   : > { %5703 = vrot.lane.b32.xlu1 %v6313_v21, %s6146_s22 }
 0x804   : > { %v1827_v36 = vpop.xlane.xlu1 %1826 }
 0x805   : > { %v1847_v34 = vsub.f32 %v4893_v40, %v1827_v36  ;;  %v1824_v5 = vpop.xlane.xlu0 %1823 }
 0x806   : > { %v1846_v57 = vsub.f32 %v1783_v35, %v1824_v5 }
 0x807   : > { %v1856_v16 = vmul.f32 1.442695, %v1847_v34 }
 0x808   : > { %v1854_v54 = vmul.f32 1.442695, %v1846_v57  ;;  %v5689_v44 = vpop.permute.xlu1 %5688 }
 0x809   : > { %5963 = vpow2.f32 %v1856_v16  ;;  %v5691_v12 = vunpack.i.h.bf16 %v5689_v44  ;;  %v5690_v32 = vunpack.i.l.bf16 %v5689_v44  ;;  %v1833_v48 = vpop.xlane.xlu0 %1832 }
 0x80a   : > { %5965 = vpow2.f32 %v1854_v54 }
 0x80b   : > { %v5343_v37 = vpack.c.bf16 %v5691_v12, %v5690_v32 }
 0x80d   : > { %5344 = vmatprep.subr.bf16.mxu0 %v5343_v37  ;;  %v1830_v46 = vpop.xlane.xlu0 %1829 }
 0x80e   : > { %v1848_v33 = vsub.f32 %v1793_v0, %v1830_v46  ;;  %5346 = vmatpush3.bf16.msra.mxu0 %v5343_v37  ;;  %v1849_v37 = vsub.f32 %v6798_v56, %v1833_v48 }
 0x810   : > { %v1858_v4 = vmul.f32 1.442695, %v1848_v33  ;;  %v1860_v33 = vmul.f32 1.442695, %v1849_v37 }
 0x811   : > { %v1839_v47 = vpop.xlane.xlu0 %1838 }
 0x812   : > { %5967 = vpow2.f32 %v1858_v4  ;;  %v1851_v61 = vsub.f32 %v4899_v2, %v1839_v47 }
 0x813   : > { %v6824_v40 = vpop.eup %5963 }
 0x814   : > { %v6826_v35 = vpop.eup %5965  ;;  %v1864_v36 = vmul.f32 1.442695, %v1851_v61  ;;  %v1873_v34 = vsel %vm292_vm0, %v6824_v40, 0.0 }
 0x815   : > { %1874 = vadd.xlane.f32.xlu0 %v1873_v34  ;;  %v1845_v5 = vpop.xlane.xlu0 %1844  ;;  %v1870_v57 = vsel %vm292_vm0, %v6826_v35, 0.0 }
 0x816   : > { %5969 = vpow2.f32 %v1864_v36  ;;  %1871 = vadd.xlane.f32.xlu1 %v1870_v57  ;;  %v1853_v46 = vsub.f32 %v6805_v3, %v1845_v5 }
 0x817   : > { %5971 = vpow2.f32 %v1860_v33 }
 0x818   : > { %v1868_v36 = vmul.f32 1.442695, %v1853_v46 }
 0x819   : > { %v5694_v0 = vpop.permute.xlu0 %5693 }
 0x81a   : > { %v5696_v16 = vunpack.i.h.bf16 %v5694_v0  ;;  %v5695_v54 = vunpack.i.l.bf16 %v5694_v0 }
 0x81c   : > { %v6832_v44 = vpop.eup %5967  ;;  %v5347_v2 = vpack.c.bf16 %v5696_v16, %v5695_v54 }
 0x81d   : > { %v1876_v12 = vsel %vm292_vm0, %v6832_v44, 0.0 }
 0x81e   : > { %1877 = vadd.xlane.f32.xlu0 %v1876_v12  ;;  %5348 = vmatprep.subr.bf16.mxu0 %v5347_v2 }
 0x81f   : > { %5350 = vmatpush3.bf16.msra.mxu0 %v5347_v2 }
 0x820   : > { %v6836_v61 = vpop.eup %5969 }
 0x821   : > { %v1885_v32 = vsel %vm292_vm0, %v6836_v61, 0.0  ;;  %v6845_v2 = vpop.eup %5971 }
 0x822   : > { %1886 = vadd.xlane.f32.xlu0 %v1885_v32 }
 0x827   : > { %5708 = vrot.lane.b32.xlu1 %v6285_v49, %s6147_s24 }
 0x839   : > { %v1836_v4 = vpop.xlane.xlu1 %1835 }
 0x83a   : > { %v1850_v47 = vsub.f32 %v6802_v62, %v1836_v4  ;;  %v1879_v62 = vsel %vm292_vm0, %v6845_v2, 0.0 }
 0x83c   : > { %v1862_v34 = vmul.f32 1.442695, %v1850_v47 }
 0x83d   : > { %v5699_v57 = vpop.permute.xlu1 %5698 }
 0x83e   : > { %5973 = vpow2.f32 %v1862_v34  ;;  %v5701_v0 = vunpack.i.h.bf16 %v5699_v57  ;;  %v5700_v16 = vunpack.i.l.bf16 %v5699_v57 }
 0x83f   : > { %5975 = vpow2.f32 %v1868_v36 }
 0x840   : > { %v5351_v54 = vpack.c.bf16 %v5701_v0, %v5700_v16 }
 0x842   : > { %5352 = vmatprep.subr.bf16.mxu0 %v5351_v54 }
 0x843   : > { %5354 = vmatpush3.bf16.msra.mxu0 %v5351_v54 }
 0x848   : > { %v6847_v56 = vpop.eup %5973 }
 0x849   : > { %v1882_v3 = vsel %vm292_vm0, %v6847_v56, 0.0  ;;  %v6851_v48 = vpop.eup %5975 }
 0x84a   : > { %1883 = vadd.xlane.f32.xlu0 %v1882_v3  ;;  %v1891_v5 = vsel %vm292_vm0, %v6851_v48, 0.0 }
 0x84b   : > { %1880 = vadd.xlane.f32.xlu1 %v1879_v62 }
 0x84e   : > { %1892 = vadd.xlane.f32.xlu0 %v1891_v5 }
 0x85c   : > { %5718 = vrot.lane.b32.xlu1 %v6299_v7, %s6147_s24 }
 0x860   : > { %5723 = vrot.lane.b32.xlu1 %v6309_v18, %s6147_s24 }
 0x864   : > { %2063 = vrot.lane.b32.xlu1 %v6278_v43, %s6148_s25 }
 0x868   : > { %2065 = vrot.lane.b32.xlu1 %v6332_v24, %s6148_s25 }
 0x86c   : > { %2069 = vrot.lane.b32.xlu1 %v6336_v25, %s6148_s25 }
 0x86e   : > { %v1842_v12 = vpop.xlane.xlu1 %1841 }
 0x86f   : > { %v1852_v32 = vsub.f32 %v6807_v38, %v1842_v12 }
 0x870   : > { %2073 = vrot.lane.b32.xlu1 %v6340_v26, %s6148_s25 }
 0x871   : > { %v1866_v37 = vmul.f32 1.442695, %v1852_v32 }
 0x872   : > { %v5704_v46 = vpop.permute.xlu1 %5703 }
 0x873   : > { %5977 = vpow2.f32 %v1866_v37  ;;  %v5706_v33 = vunpack.i.h.bf16 %v5704_v46  ;;  %v5705_v4 = vunpack.i.l.bf16 %v5704_v46 }
 0x874   : > { %2077 = vrot.lane.b32.xlu1 %v6344_v27, %s6148_s25 }
 0x875   : > { %v5355_v47 = vpack.c.bf16 %v5706_v33, %v5705_v4 }
 0x877   : > { %5356 = vmatprep.subr.bf16.mxu0 %v5355_v47 }
 0x878   : > { %5358 = vmatpush3.bf16.msra.mxu0 %v5355_v47 }
 0x87d   : > { %v5978_v36 = vpop.eup %5977 }
 0x87e   : > { %v1888_v34 = vsel %vm292_vm0, %v5978_v36, 0.0 }
 0x87f   : > { %1889 = vadd.xlane.f32.xlu0 %v1888_v34 }
 0x895   : > { %5713 = vrot.lane.b32.xlu0 %v6291_v60, %s6147_s24 }
 0x899   : > { %2067 = vrot.lane.b32.xlu0 %v6311_v19, %s6148_s25 }
 0x89d   : > { %2071 = vrot.lane.b32.xlu0 %v6319_v22, %s6148_s25 }
 0x8a1   : > { %2075 = vrot.lane.b32.xlu0 %v6325_v23, %s6148_s25 }
 0x8a2   : > { %v1875_v38 = vpop.xlane.xlu0 %1874 }
 0x8a3   : > { %5979 = vrcp.f32 %v1875_v38  ;;  %v1872_v57 = vpop.xlane.xlu1 %1871 }
 0x8a4   : > { %5981 = vrcp.f32 %v1872_v57 }
 0x8a7   : > { %v5709_v0 = vpop.permute.xlu1 %5708 }
 0x8a8   : > { %v5711_v16 = vunpack.i.h.bf16 %v5709_v0  ;;  %v5710_v54 = vunpack.i.l.bf16 %v5709_v0 }
 0x8aa   : > { %v5359_v3 = vpack.c.bf16 %v5711_v16, %v5710_v54 }
 0x8ab   : > { %v1878_v62 = vpop.xlane.xlu0 %1877 }
 0x8ac   : > { %5983 = vrcp.f32 %v1878_v62  ;;  %5361 = vmatprep.subr.msk.bf16.mxu0 %vm6352_vm2, %v5359_v3 }
 0x8ad   : > { %v5980_v5 = vpop.eup %5979 }
 0x8ae   : > { %v5982_v12 = vpop.eup %5981  ;;  %v1903_v37 = vmul.f32 %v5980_v5, %v6824_v40 }
 0x8af   : > { %v1902_v32 = vmul.f32 %v5982_v12, %v6826_v35  ;;  %v1887_v4 = vpop.xlane.xlu0 %1886 }
 0x8b1   : > { %4919 = vmatprep.mubr.msk.f32.mxu0 %vm292_vm0, %v1902_v32 }
 0x8b2   : > { %4920 = vmatmul.mubr.msk.f32.vlgmr.msra.gmra.mrb[40].mxu0 %vm292_vm0, %v1903_v37 }
 0x8b3   : > { %5364 = vmatpush3.bf16.xpose.msk.msra.mxu0 %vm6352_vm2, %v5359_v3 }
 0x8b6   : > { %v5984_v46 = vpop.eup %5983 }
 0x8b7   : > { %v1904_v33 = vmul.f32 %v5984_v46, %v6832_v44 }
 0x8b9   : > { %4922 = vmatprep.mubr.msk.f32.mxu0 %vm292_vm0, %v1904_v33 }
 0x8d7   : > { %v1884_v47 = vpop.xlane.xlu0 %1883 }
 0x8d8   : > { %5985 = vrcp.f32 %v1884_v47  ;;  %v1881_v34 = vpop.xlane.xlu1 %1880 }
 0x8d9   : > { %5987 = vrcp.f32 %v1881_v34 }
 0x8da   : > { %5989 = vrcp.f32 %v1887_v4 }
 0x8db   : > { %v1893_v16 = vpop.xlane.xlu0 %1892 }
 0x8dc   : > { %5991 = vrcp.f32 %v1893_v16  ;;  %v5719_v3 = vpop.permute.xlu1 %5718 }
 0x8dd   : > { %v5721_v5 = vunpack.i.h.bf16 %v5719_v3  ;;  %v5720_v12 = vunpack.i.l.bf16 %v5719_v3 }
 0x8e0   : > { %v5724_v46 = vpop.permute.xlu1 %5723 }
 0x8e1   : > { %v5726_v47 = vunpack.i.h.bf16 %v5724_v46  ;;  %v5725_v34 = vunpack.i.l.bf16 %v5724_v46 }
 0x8e2   : > { %v5986_v35 = vpop.eup %5985 }
 0x8e3   : > { %v5988_v40 = vpop.eup %5987  ;;  %v1906_v0 = vmul.f32 %v5986_v35, %v6847_v56  ;;  %v5371_v56 = vpack.c.bf16 %v5721_v5, %v5720_v12 }
 0x8e4   : > { %v1905_v38 = vmul.f32 %v5988_v40, %v6845_v2  ;;  %v5990_v57 = vpop.eup %5989  ;;  %v2064_v40 = vpop.permute.xlu1 %2063 }
 0x8e5   : > { %v1907_v44 = vmul.f32 %v5990_v57, %v6836_v61 }
 0x8e6   : > { %4923 = vmatmul.mubr.msk.f32.gmra.mrb[42].mxu0 %vm292_vm0, %v1905_v38  ;;  %v5992_v33 = vpop.eup %5991  ;;  %v5377_v38 = vpack.c.bf16 %v5726_v47, %v5725_v34 }
 0x8e7   : > { %4925 = vmatprep.mubr.msk.f32.mxu0 %vm292_vm0, %v1906_v0  ;;  %v1909_v35 = vmul.f32 %v5992_v33, %v6851_v48 }
 0x8e8   : > { %v2066_v57 = vpop.permute.xlu1 %2065 }
 0x8ea   : > { %4926 = vmatmul.mubr.msk.f32.gmra.mrb[44].mxu0 %vm292_vm0, %v1907_v44 }
 0x8ec   : > { %v2070_v48 = vpop.permute.xlu1 %2069 }
 0x8f0   : > { %v2074_v44 = vpop.permute.xlu1 %2073 }
 0x90c   : > { %v1890_v54 = vpop.xlane.xlu0 %1889 }
 0x90d   : > { %5993 = vrcp.f32 %v1890_v54  ;;  %v2078_v54 = vpop.permute.xlu1 %2077 }
 0x910   : > { %v5714_v62 = vpop.permute.xlu0 %5713 }
 0x911   : > { %v5716_v2 = vunpack.i.h.bf16 %v5714_v62  ;;  %v5715_v32 = vunpack.i.l.bf16 %v5714_v62 }
 0x913   : > { %v5365_v37 = vpack.c.bf16 %v5716_v2, %v5715_v32 }
 0x915   : > { %5367 = vmatprep.subr.msk.bf16.mxu0 %vm6352_vm2, %v5365_v37 }
 0x916   : > { %5370 = vmatpush3.bf16.xpose.msk.msra.mxu0 %vm6352_vm2, %v5365_v37 }
 0x917   : > { %v5994_v61 = vpop.eup %5993  ;;  %5373 = vmatprep.subr.msk.bf16.mxu0 %vm6352_vm2, %v5371_v56 }
 0x918   : > { %v1908_v4 = vmul.f32 %v5994_v61, %v5978_v36  ;;  %v2068_v36 = vpop.permute.xlu0 %2067 }
 0x91a   : > { %4928 = vmatprep.mubr.msk.f32.mxu0 %vm292_vm0, %v1908_v4 }
 0x91b   : > { %4929 = vmatmul.mubr.msk.f32.gmra.mrb[46].mxu0 %vm292_vm0, %v1909_v35 }
 0x91c   : > { %4947 = vmatprep.mubr.msk.f32.mxu0 %vm462_vm1, %v2064_v40  ;;  %v2072_v0 = vpop.permute.xlu0 %2071 }
 0x91e   : > { %5376 = vmatpush3.bf16.xpose.msk.msra.mxu0 %vm6352_vm2, %v5371_v56 }
 0x91f   : > { %5379 = vmatprep.subr.msk.bf16.mxu0 %vm6352_vm2, %v5377_v38 }
 0x920   : > { %v2076_v16 = vpop.permute.xlu0 %2075 }
 0x926   : > { %5382 = vmatpush3.bf16.xpose.msk.msra.mxu0 %vm6352_vm2, %v5377_v38 }
 0x92d   : > { %4948 = vmatmul.mubr.msk.f32.vlgmr.msra.gmra.mrb[48].mxu0 %vm462_vm1, %v2066_v57 }
 0x92e   : > { %4950 = vmatprep.mubr.msk.f32.mxu0 %vm462_vm1, %v2068_v36 }
 0x931   : > { %4951 = vmatmul.mubr.msk.f32.gmra.mrb[50].mxu0 %vm462_vm1, %v2070_v48 }
 0x932   : > { %4953 = vmatprep.mubr.msk.f32.mxu0 %vm462_vm1, %v2072_v0 }
 0x935   : > { %4954 = vmatmul.mubr.msk.f32.gmra.mrb[52].mxu0 %vm462_vm1, %v2074_v44 }
 0x936   : > { %4956 = vmatprep.mubr.msk.f32.mxu0 %vm462_vm1, %v2076_v16 }
 0x939   : > { %4957 = vmatmul.mubr.msk.f32.gmra.mrb[54].mxu0 %vm462_vm1, %v2078_v54 }
 0x985   : > { %v6920_v3 = vpop.f32.mrb[40].mxu0 }
 0x986   : > { %v6922_v62 = vpop.f32.mrb[41].mxu0 }
 0x9b9   : > { %v6924_v5 = vpop.f32.mrb[42].mxu0 }
 0x9ba   : > { %7701 = vst [vmem:[#allocation14_spill] sm:$0xff] %v6924_v5  ;;  %v6926_v12 = vpop.f32.mrb[43].mxu0 }
 0x9bb   : > { %7702 = vst [vmem:[#allocation15_spill] sm:$0xff] %v6926_v12 }
 0x9bd   : > { %v6928_v2 = vpop.f32.mrb[44].mxu0 }
 0x9be   : > { %v6930_v32 = vpop.f32.mrb[45].mxu0 }
 0x9ee   : > { %v6932_v37 = vpop.f32.mrb[46].mxu0 }
 0x9ef   : > { %7703 = vst [vmem:[#allocation16_spill] sm:$0xff] %v6932_v37  ;;  %v6934_v56 = vpop.f32.mrb[47].mxu0 }
 0x9f0   : > { %7704 = vst [vmem:[#allocation17_spill] sm:$0xff] %v6934_v56 }
 0xa00   : > { %v4949_v46 = vpop.f32.mrb[48].mxu0 }
 0xa01   : > { %v2193_v33 = vpop.f32.mrb[49].mxu0  ;;  %v2235_v61 = vsel %vm292_vm0, %v4949_v46, -inf }
 0xa02   : > { %2236 = vmax.xlane.f32.xlu1 %v2235_v61  ;;  %v2232_v4 = vsel %vm292_vm0, %v2193_v33, -inf }
 0xa03   : > { %2233 = vmax.xlane.f32.xlu0 %v2232_v4 }
 0xa04   : > { %v6938_v47 = vpop.f32.mrb[50].mxu0 }
 0xa05   : > { %v2203_v34 = vpop.f32.mrb[51].mxu0  ;;  %v2241_v35 = vsel %vm292_vm0, %v6938_v47, -inf }
 0xa06   : > { %v2238_v57 = vsel %vm292_vm0, %v2203_v34, -inf }
 0xa07   : > { %2242 = vmax.xlane.f32.xlu0 %v2241_v35 }
 0xa08   : > { %v4955_v40 = vpop.f32.mrb[52].mxu0 }
 0xa09   : > { %v6942_v38 = vpop.f32.mrb[53].mxu0  ;;  %v2247_v0 = vsel %vm292_vm0, %v4955_v40, -inf }
 0xa0a   : > { %v2244_v16 = vsel %vm292_vm0, %v6942_v38, -inf }
 0xa0b   : > { %2239 = vmax.xlane.f32.xlu0 %v2238_v57 }
 0xa0c   : > { %v6945_v36 = vpop.f32.mrb[54].mxu0 }
 0xa0d   : > { %v6947_v48 = vpop.f32.mrb[55].mxu0  ;;  %v2253_v44 = vsel %vm292_vm0, %v6945_v36, -inf }
 0xa0e   : > { %v2250_v54 = vsel %vm292_vm0, %v6947_v48, -inf }
 0xa0f   : > { %2248 = vmax.xlane.f32.xlu0 %v2247_v0 }
 0xa13   : > { %5728 = vrot.lane.b32.xlu1 %v6287_v52, %s6148_s25  ;;  %2254 = vmax.xlane.f32.xlu0 %v2253_v44 }
 0xa29   : > { %5733 = vrot.lane.b32.xlu0 %v6293_v63, %s6148_s25 }
 0xa37   : > { %2245 = vmax.xlane.f32.xlu1 %v2244_v16 }
 0xa48   : > { %5738 = vrot.lane.b32.xlu1 %v6301_v10, %s6148_s25 }
 0xa6c   : > { %2251 = vmax.xlane.f32.xlu1 %v2250_v54 }
 0xa7d   : > { %5743 = vrot.lane.b32.xlu1 %v6313_v21, %s6148_s25 }
 0xa8f   : > { %v2237_v61 = vpop.xlane.xlu1 %2236 }
 0xa90   : > { %v2257_v4 = vsub.f32 %v4949_v46, %v2237_v61  ;;  %v2234_v35 = vpop.xlane.xlu0 %2233 }
 0xa91   : > { %v2256_v57 = vsub.f32 %v2193_v33, %v2234_v35 }
 0xa92   : > { %v2266_v0 = vmul.f32 1.442695, %v2257_v4 }
 0xa93   : > { %v2264_v44 = vmul.f32 1.442695, %v2256_v57  ;;  %v5729_v58 = vpop.permute.xlu1 %5728 }
 0xa94   : > { %5995 = vpow2.f32 %v2266_v0  ;;  %v5731_v11 = vunpack.i.h.bf16 %v5729_v58  ;;  %v5730_v16 = vunpack.i.l.bf16 %v5729_v58  ;;  %v2243_v6 = vpop.xlane.xlu0 %2242 }
 0xa95   : > { %5997 = vpow2.f32 %v2264_v44  ;;  %v2259_v57 = vsub.f32 %v6938_v47, %v2243_v6 }
 0xa96   : > { %v5383_v8 = vpack.c.bf16 %v5731_v11, %v5730_v16 }
 0xa97   : > { %v2270_v44 = vmul.f32 1.442695, %v2259_v57 }
 0xa98   : > { %5384 = vmatprep.subr.bf16.mxu1 %v5383_v8  ;;  %v2240_v55 = vpop.xlane.xlu0 %2239 }
 0xa99   : > { %v2258_v9 = vsub.f32 %v2203_v34, %v2240_v55  ;;  %5386 = vmatpush3.bf16.msra.mxu1 %v5383_v8 }
 0xa9b   : > { %v2268_v54 = vmul.f32 1.442695, %v2258_v9 }
 0xa9c   : > { %v2249_v51 = vpop.xlane.xlu0 %2248 }
 0xa9d   : > { %5999 = vpow2.f32 %v2268_v54  ;;  %v2261_v5 = vsub.f32 %v4955_v40, %v2249_v51 }
 0xa9e   : > { %v6964_v46 = vpop.eup %5995 }
 0xa9f   : > { %v6966_v33 = vpop.eup %5997  ;;  %v2274_v61 = vmul.f32 1.442695, %v2261_v5  ;;  %v2283_v4 = vsel %vm292_vm0, %v6964_v46, 0.0 }
 0xaa0   : > { %2284 = vadd.xlane.f32.xlu0 %v2283_v4  ;;  %v2255_v58 = vpop.xlane.xlu0 %2254  ;;  %v2280_v11 = vsel %vm292_vm0, %v6966_v33, 0.0 }
 0xaa1   : > { %6001 = vpow2.f32 %v2274_v61  ;;  %2281 = vadd.xlane.f32.xlu1 %v2280_v11  ;;  %v2263_v0 = vsub.f32 %v6945_v36, %v2255_v58 }
 0xaa2   : > { %6003 = vpow2.f32 %v2270_v44 }
 0xaa3   : > { %v2278_v61 = vmul.f32 1.442695, %v2263_v0 }
 0xaa4   : > { %v5734_v55 = vpop.permute.xlu0 %5733 }
 0xaa5   : > { %v5736_v8 = vunpack.i.h.bf16 %v5734_v55  ;;  %v5735_v9 = vunpack.i.l.bf16 %v5734_v55 }
 0xaa7   : > { %v6972_v34 = vpop.eup %5999  ;;  %v5387_v51 = vpack.c.bf16 %v5736_v8, %v5735_v9 }
 0xaa8   : > { %v2286_v40 = vsel %vm292_vm0, %v6972_v34, 0.0 }
 0xaa9   : > { %2287 = vadd.xlane.f32.xlu0 %v2286_v40  ;;  %5388 = vmatprep.subr.bf16.mxu1 %v5387_v51 }
 0xaaa   : > { %5390 = vmatpush3.bf16.msra.mxu1 %v5387_v51 }
 0xaab   : > { %v6976_v5 = vpop.eup %6001 }
 0xaac   : > { %v2295_v35 = vsel %vm292_vm0, %v6976_v5, 0.0  ;;  %v6985_v51 = vpop.eup %6003 }
 0xaad   : > { %2296 = vadd.xlane.f32.xlu0 %v2295_v35 }
 0xab2   : > { %5748 = vrot.lane.b32.xlu1 %v6285_v49, %s6149_s26 }
 0xac4   : > { %v2246_v16 = vpop.xlane.xlu1 %2245 }
 0xac5   : > { %v2260_v54 = vsub.f32 %v6942_v38, %v2246_v16  ;;  %v2289_v38 = vsel %vm292_vm0, %v6985_v51, 0.0 }
 0xac7   : > { %v2272_v4 = vmul.f32 1.442695, %v2260_v54 }
 0xac8   : > { %v5739_v11 = vpop.permute.xlu1 %5738 }
 0xac9   : > { %6005 = vpow2.f32 %v2272_v4  ;;  %v5741_v55 = vunpack.i.h.bf16 %v5739_v11  ;;  %v5740_v8 = vunpack.i.l.bf16 %v5739_v11 }
 0xaca   : > { %6007 = vpow2.f32 %v2278_v61 }
 0xacb   : > { %v5391_v9 = vpack.c.bf16 %v5741_v55, %v5740_v8 }
 0xacd   : > { %5392 = vmatprep.subr.bf16.mxu1 %v5391_v9 }
 0xace   : > { %5394 = vmatpush3.bf16.msra.mxu1 %v5391_v9 }
 0xad3   : > { %v6987_v6 = vpop.eup %6005 }
 0xad4   : > { %v2292_v47 = vsel %vm292_vm0, %v6987_v6, 0.0  ;;  %v6991_v36 = vpop.eup %6007 }
 0xad5   : > { %2293 = vadd.xlane.f32.xlu0 %v2292_v47  ;;  %v2301_v58 = vsel %vm292_vm0, %v6991_v36, 0.0 }
 0xad6   : > { %2290 = vadd.xlane.f32.xlu1 %v2289_v38 }
 0xad9   : > { %2302 = vadd.xlane.f32.xlu0 %v2301_v58 }
 0xae7   : > { %5758 = vrot.lane.b32.xlu1 %v6299_v7, %s6149_s26 }
 0xaeb   : > { %5763 = vrot.lane.b32.xlu1 %v6309_v18, %s6149_s26 }
 0xaef   : > { %2473 = vrot.lane.b32.xlu1 %v6278_v43, %s6150_s5 }
 0xaf3   : > { %2475 = vrot.lane.b32.xlu1 %v6332_v24, %s6150_s5 }
 0xaf7   : > { %2479 = vrot.lane.b32.xlu1 %v6336_v25, %s6150_s5 }
 0xaf9   : > { %v2252_v40 = vpop.xlane.xlu1 %2251 }
 0xafa   : > { %v2262_v35 = vsub.f32 %v6947_v48, %v2252_v40 }
 0xafb   : > { %2483 = vrot.lane.b32.xlu1 %v6340_v26, %s6150_s5 }
 0xafc   : > { %v2276_v57 = vmul.f32 1.442695, %v2262_v35 }
 0xafd   : > { %v5744_v0 = vpop.permute.xlu1 %5743 }
 0xafe   : > { %6009 = vpow2.f32 %v2276_v57  ;;  %v5746_v44 = vunpack.i.h.bf16 %v5744_v0  ;;  %v5745_v16 = vunpack.i.l.bf16 %v5744_v0 }
 0xaff   : > { %2487 = vrot.lane.b32.xlu1 %v6344_v27, %s6150_s5 }
 0xb00   : > { %v5395_v54 = vpack.c.bf16 %v5746_v44, %v5745_v16 }
 0xb02   : > { %5396 = vmatprep.subr.bf16.mxu1 %v5395_v54 }
 0xb03   : > { %5398 = vmatpush3.bf16.msra.mxu1 %v5395_v54 }
 0xb08   : > { %v6010_v61 = vpop.eup %6009 }
 0xb09   : > { %v2298_v4 = vsel %vm292_vm0, %v6010_v61, 0.0 }
 0xb0a   : > { %2299 = vadd.xlane.f32.xlu0 %v2298_v4 }
 0xb20   : > { %5753 = vrot.lane.b32.xlu0 %v6291_v60, %s6149_s26 }
 0xb24   : > { %2477 = vrot.lane.b32.xlu0 %v6311_v19, %s6150_s5 }
 0xb28   : > { %2481 = vrot.lane.b32.xlu0 %v6319_v22, %s6150_s5 }
 0xb2c   : > { %2485 = vrot.lane.b32.xlu0 %v6325_v23, %s6150_s5 }
 0xb2d   : > { %v2285_v48 = vpop.xlane.xlu0 %2284 }
 0xb2e   : > { %6011 = vrcp.f32 %v2285_v48  ;;  %v2282_v11 = vpop.xlane.xlu1 %2281 }
 0xb2f   : > { %6013 = vrcp.f32 %v2282_v11 }
 0xb32   : > { %v5749_v55 = vpop.permute.xlu1 %5748 }
 0xb33   : > { %v5751_v8 = vunpack.i.h.bf16 %v5749_v55  ;;  %v5750_v9 = vunpack.i.l.bf16 %v5749_v55 }
 0xb35   : > { %v5399_v47 = vpack.c.bf16 %v5751_v8, %v5750_v9 }
 0xb36   : > { %v2288_v38 = vpop.xlane.xlu0 %2287 }
 0xb37   : > { %6015 = vrcp.f32 %v2288_v38  ;;  %5401 = vmatprep.subr.msk.bf16.mxu1 %vm6352_vm2, %v5399_v47 }
 0xb38   : > { %v6012_v58 = vpop.eup %6011 }
 0xb39   : > { %v6014_v40 = vpop.eup %6013  ;;  %v2313_v57 = vmul.f32 %v6012_v58, %v6964_v46 }
 0xb3a   : > { %v2312_v35 = vmul.f32 %v6014_v40, %v6966_v33  ;;  %v2297_v16 = vpop.xlane.xlu0 %2296 }
 0xb3c   : > { %4975 = vmatprep.mubr.msk.f32.mxu1 %vm292_vm0, %v2312_v35 }
 0xb3d   : > { %4976 = vmatmul.mubr.msk.f32.vlgmr.msra.gmra.mrb[32].mxu1 %vm292_vm0, %v2313_v57 }
 0xb3e   : > { %5404 = vmatpush3.bf16.xpose.msk.msra.mxu1 %vm6352_vm2, %v5399_v47 }
 0xb41   : > { %v6016_v0 = vpop.eup %6015 }
 0xb42   : > { %v2314_v44 = vmul.f32 %v6016_v0, %v6972_v34 }
 0xb44   : > { %4978 = vmatprep.mubr.msk.f32.mxu1 %vm292_vm0, %v2314_v44 }
 0xb62   : > { %v2294_v54 = vpop.xlane.xlu0 %2293 }
 0xb63   : > { %6017 = vrcp.f32 %v2294_v54  ;;  %v2291_v4 = vpop.xlane.xlu1 %2290 }
 0xb64   : > { %6019 = vrcp.f32 %v2291_v4 }
 0xb65   : > { %6021 = vrcp.f32 %v2297_v16 }
 0xb66   : > { %v2303_v8 = vpop.xlane.xlu0 %2302 }
 0xb67   : > { %6023 = vrcp.f32 %v2303_v8  ;;  %v5759_v47 = vpop.permute.xlu1 %5758 }
 0xb68   : > { %v5761_v58 = vunpack.i.h.bf16 %v5759_v47  ;;  %v5760_v40 = vunpack.i.l.bf16 %v5759_v47 }
 0xb6b   : > { %v5764_v0 = vpop.permute.xlu1 %5763 }
 0xb6c   : > { %v5766_v54 = vunpack.i.h.bf16 %v5764_v0  ;;  %v5765_v4 = vunpack.i.l.bf16 %v5764_v0 }
 0xb6d   : > { %v6018_v33 = vpop.eup %6017 }
 0xb6e   : > { %v6020_v46 = vpop.eup %6019  ;;  %v2316_v55 = vmul.f32 %v6018_v33, %v6987_v6  ;;  %v5411_v6 = vpack.c.bf16 %v5761_v58, %v5760_v40 }
 0xb6f   : > { %v2315_v48 = vmul.f32 %v6020_v46, %v6985_v51  ;;  %v6022_v11 = vpop.eup %6021  ;;  %v2474_v46 = vpop.permute.xlu1 %2473 }
 0xb70   : > { %v2317_v34 = vmul.f32 %v6022_v11, %v6976_v5 }
 0xb71   : > { %4979 = vmatmul.mubr.msk.f32.gmra.mrb[34].mxu1 %vm292_vm0, %v2315_v48  ;;  %v6024_v44 = vpop.eup %6023  ;;  %v5417_v48 = vpack.c.bf16 %v5766_v54, %v5765_v4 }
 0xb72   : > { %4981 = vmatprep.mubr.msk.f32.mxu1 %vm292_vm0, %v2316_v55  ;;  %v2319_v33 = vmul.f32 %v6024_v44, %v6991_v36 }
 0xb73   : > { %v2476_v11 = vpop.permute.xlu1 %2475 }
 0xb75   : > { %4982 = vmatmul.mubr.msk.f32.gmra.mrb[36].mxu1 %vm292_vm0, %v2317_v34 }
 0xb77   : > { %v2480_v36 = vpop.permute.xlu1 %2479 }
 0xb7b   : > { %v2484_v34 = vpop.permute.xlu1 %2483 }
 0xb97   : > { %v2300_v9 = vpop.xlane.xlu0 %2299 }
 0xb98   : > { %6025 = vrcp.f32 %v2300_v9  ;;  %v2488_v9 = vpop.permute.xlu1 %2487 }
 0xb9b   : > { %v5754_v38 = vpop.permute.xlu0 %5753 }
 0xb9c   : > { %v5756_v51 = vunpack.i.h.bf16 %v5754_v38  ;;  %v5755_v35 = vunpack.i.l.bf16 %v5754_v38 }
 0xb9e   : > { %v5405_v57 = vpack.c.bf16 %v5756_v51, %v5755_v35 }
 0xba0   : > { %5407 = vmatprep.subr.msk.bf16.mxu1 %vm6352_vm2, %v5405_v57 }
 0xba1   : > { %5410 = vmatpush3.bf16.xpose.msk.msra.mxu1 %vm6352_vm2, %v5405_v57 }
 0xba2   : > { %v6026_v5 = vpop.eup %6025  ;;  %5413 = vmatprep.subr.msk.bf16.mxu1 %vm6352_vm2, %v5411_v6 }
 0xba3   : > { %v2318_v16 = vmul.f32 %v6026_v5, %v6010_v61  ;;  %v2478_v61 = vpop.permute.xlu0 %2477 }
 0xba5   : > { %4984 = vmatprep.mubr.msk.f32.mxu1 %vm292_vm0, %v2318_v16 }
 0xba6   : > { %4985 = vmatmul.mubr.msk.f32.gmra.mrb[38].mxu1 %vm292_vm0, %v2319_v33 }
 0xba7   : > { %5003 = vmatprep.mubr.msk.f32.mxu1 %vm462_vm1, %v2474_v46  ;;  %v2482_v55 = vpop.permute.xlu0 %2481 }
 0xba9   : > { %5416 = vmatpush3.bf16.xpose.msk.msra.mxu1 %vm6352_vm2, %v5411_v6 }
 0xbaa   : > { %5419 = vmatprep.subr.msk.bf16.mxu1 %vm6352_vm2, %v5417_v48 }
 0xbab   : > { %v2486_v8 = vpop.permute.xlu0 %2485 }
 0xbb1   : > { %5422 = vmatpush3.bf16.xpose.msk.msra.mxu1 %vm6352_vm2, %v5417_v48 }
 0xbb8   : > { %5004 = vmatmul.mubr.msk.f32.vlgmr.msra.gmra.mrb[40].mxu1 %vm462_vm1, %v2476_v11 }
 0xbb9   : > { %5006 = vmatprep.mubr.msk.f32.mxu1 %vm462_vm1, %v2478_v61 }
 0xbbc   : > { %5007 = vmatmul.mubr.msk.f32.gmra.mrb[42].mxu1 %vm462_vm1, %v2480_v36 }
 0xbbd   : > { %5009 = vmatprep.mubr.msk.f32.mxu1 %vm462_vm1, %v2482_v55 }
 0xbc0   : > { %5010 = vmatmul.mubr.msk.f32.gmra.mrb[44].mxu1 %vm462_vm1, %v2484_v34 }
 0xbc1   : > { %5012 = vmatprep.mubr.msk.f32.mxu1 %vm462_vm1, %v2486_v8 }
 0xbc4   : > { %5013 = vmatmul.mubr.msk.f32.gmra.mrb[46].mxu1 %vm462_vm1, %v2488_v9 }
 0xc10   : > { %v7060_v47 = vpop.f32.mrb[32].mxu1 }
 0xc11   : > { %v7062_v38 = vpop.f32.mrb[33].mxu1 }
 0xc44   : > { %v7064_v58 = vpop.f32.mrb[34].mxu1 }
 0xc45   : > { %7705 = vst [vmem:[#allocation18_spill] sm:$0xff] %v7064_v58  ;;  %v7066_v40 = vpop.f32.mrb[35].mxu1 }
 0xc46   : > { %7706 = vst [vmem:[#allocation19_spill] sm:$0xff] %v7066_v40 }
 0xc48   : > { %v7068_v51 = vpop.f32.mrb[36].mxu1 }
 0xc49   : > { %v7070_v35 = vpop.f32.mrb[37].mxu1 }
 0xc79   : > { %v7072_v57 = vpop.f32.mrb[38].mxu1 }
 0xc7a   : > { %7707 = vst [vmem:[#allocation20_spill] sm:$0xff] %v7072_v57  ;;  %v7074_v6 = vpop.f32.mrb[39].mxu1 }
 0xc7b   : > { %7708 = vst [vmem:[#allocation21_spill] sm:$0xff] %v7074_v6 }
 0xc8b   : > { %v5005_v0 = vpop.f32.mrb[40].mxu1 }
 0xc8c   : > { %v2603_v44 = vpop.f32.mrb[41].mxu1  ;;  %v2645_v5 = vsel %vm292_vm0, %v5005_v0, -inf }
 0xc8d   : > { %2646 = vmax.xlane.f32.xlu1 %v2645_v5  ;;  %v2642_v16 = vsel %vm292_vm0, %v2603_v44, -inf }
 0xc8e   : > { %2643 = vmax.xlane.f32.xlu0 %v2642_v16 }
 0xc8f   : > { %v7078_v54 = vpop.f32.mrb[42].mxu1 }
 0xc90   : > { %v2613_v4 = vpop.f32.mrb[43].mxu1  ;;  %v2651_v33 = vsel %vm292_vm0, %v7078_v54, -inf }
 0xc91   : > { %v2648_v11 = vsel %vm292_vm0, %v2613_v4, -inf }
 0xc92   : > { %2652 = vmax.xlane.f32.xlu0 %v2651_v33 }
 0xc93   : > { %v5011_v46 = vpop.f32.mrb[44].mxu1 }
 0xc94   : > { %v7082_v48 = vpop.f32.mrb[45].mxu1  ;;  %v2657_v55 = vsel %vm292_vm0, %v5011_v46, -inf }
 0xc95   : > { %v2654_v8 = vsel %vm292_vm0, %v7082_v48, -inf }
 0xc96   : > { %2649 = vmax.xlane.f32.xlu0 %v2648_v11 }
 0xc97   : > { %v7085_v61 = vpop.f32.mrb[46].mxu1 }
 0xc98   : > { %v7087_v36 = vpop.f32.mrb[47].mxu1  ;;  %v2663_v34 = vsel %vm292_vm0, %v7085_v61, -inf }
 0xc99   : > { %v2660_v9 = vsel %vm292_vm0, %v7087_v36, -inf }
 0xc9a   : > { %2658 = vmax.xlane.f32.xlu0 %v2657_v55 }
 0xc9e   : > { %5768 = vrot.lane.b32.xlu1 %v6287_v52, %s6150_s5  ;;  %2664 = vmax.xlane.f32.xlu0 %v2663_v34 }
 0xcb4   : > { %5773 = vrot.lane.b32.xlu0 %v6293_v63, %s6150_s5 }
 0xcc2   : > { %2655 = vmax.xlane.f32.xlu1 %v2654_v8 }
 0xcd3   : > { %5778 = vrot.lane.b32.xlu1 %v6301_v10, %s6150_s5 }
 0xcf7   : > { %2661 = vmax.xlane.f32.xlu1 %v2660_v9 }
 0xd08   : > { %5783 = vrot.lane.b32.xlu1 %v6313_v21, %s6150_s5 }
 0xd1a   : > { %v2647_v5 = vpop.xlane.xlu1 %2646 }
 0xd1b   : > { %v2667_v16 = vsub.f32 %v5005_v0, %v2647_v5  ;;  %v2644_v33 = vpop.xlane.xlu0 %2643 }
 0xd1c   : > { %v2666_v11 = vsub.f32 %v2603_v44, %v2644_v33 }
 0xd1d   : > { %v2676_v55 = vmul.f32 1.442695, %v2667_v16 }
 0xd1e   : > { %v2674_v34 = vmul.f32 1.442695, %v2666_v11  ;;  %v5769_v58 = vpop.permute.xlu1 %5768 }
 0xd1f   : > { %6027 = vpow2.f32 %v2676_v55  ;;  %v5771_v40 = vunpack.i.h.bf16 %v5769_v58  ;;  %v5770_v8 = vunpack.i.l.bf16 %v5769_v58  ;;  %v2653_v57 = vpop.xlane.xlu0 %2652 }
 0xd20   : > { %6029 = vpow2.f32 %v2674_v34  ;;  %v2669_v11 = vsub.f32 %v7078_v54, %v2653_v57 }
 0xd21   : > { %v5423_v6 = vpack.c.bf16 %v5771_v40, %v5770_v8 }
 0xd22   : > { %v2680_v34 = vmul.f32 1.442695, %v2669_v11 }
 0xd23   : > { %5424 = vmatprep.subr.bf16.mxu0 %v5423_v6  ;;  %v2650_v37 = vpop.xlane.xlu0 %2649 }
 0xd24   : > { %v2668_v12 = vsub.f32 %v2613_v4, %v2650_v37  ;;  %5426 = vmatpush3.bf16.msra.mxu0 %v5423_v6 }
 0xd26   : > { %v2678_v9 = vmul.f32 1.442695, %v2668_v12 }
 0xd27   : > { %v2659_v41 = vpop.xlane.xlu0 %2658 }
 0xd28   : > { %6031 = vpow2.f32 %v2678_v9  ;;  %v2671_v56 = vsub.f32 %v5011_v46, %v2659_v41 }
 0xd29   : > { %v7104_v0 = vpop.eup %6027 }
 0xd2a   : > { %v7106_v44 = vpop.eup %6029  ;;  %v2684_v5 = vmul.f32 1.442695, %v2671_v56  ;;  %v2693_v16 = vsel %vm292_vm0, %v7104_v0, 0.0 }
 0xd2b   : > { %2694 = vadd.xlane.f32.xlu0 %v2693_v16  ;;  %v2665_v58 = vpop.xlane.xlu0 %2664  ;;  %v2690_v40 = vsel %vm292_vm0, %v7106_v44, 0.0 }
 0xd2c   : > { %6033 = vpow2.f32 %v2684_v5  ;;  %2691 = vadd.xlane.f32.xlu1 %v2690_v40  ;;  %v2673_v55 = vsub.f32 %v7085_v61, %v2665_v58 }
 0xd2d   : > { %6035 = vpow2.f32 %v2680_v34 }
 0xd2e   : > { %v2688_v5 = vmul.f32 1.442695, %v2673_v55 }
 0xd2f   : > { %v5774_v37 = vpop.permute.xlu0 %5773 }
 0xd30   : > { %v5776_v12 = vunpack.i.h.bf16 %v5774_v37  ;;  %v5775_v6 = vunpack.i.l.bf16 %v5774_v37 }
 0xd32   : > { %v7112_v4 = vpop.eup %6031  ;;  %v5427_v41 = vpack.c.bf16 %v5776_v12, %v5775_v6 }
 0xd33   : > { %v2696_v46 = vsel %vm292_vm0, %v7112_v4, 0.0 }
 0xd34   : > { %2697 = vadd.xlane.f32.xlu0 %v2696_v46  ;;  %5428 = vmatprep.subr.bf16.mxu0 %v5427_v41 }
 0xd35   : > { %5430 = vmatpush3.bf16.msra.mxu0 %v5427_v41 }
 0xd36   : > { %v7116_v56 = vpop.eup %6033 }
 0xd37   : > { %v2705_v33 = vsel %vm292_vm0, %v7116_v56, 0.0  ;;  %v7125_v41 = vpop.eup %6035 }
 0xd38   : > { %2706 = vadd.xlane.f32.xlu0 %v2705_v33 }
 0xd3d   : > { %5788 = vrot.lane.b32.xlu1 %v6285_v49, %s6151_s27 }
 0xd4f   : > { %v2656_v8 = vpop.xlane.xlu1 %2655 }
 0xd50   : > { %v2670_v9 = vsub.f32 %v7082_v48, %v2656_v8  ;;  %v2699_v48 = vsel %vm292_vm0, %v7125_v41, 0.0 }
 0xd52   : > { %v2682_v16 = vmul.f32 1.442695, %v2670_v9 }
 0xd53   : > { %v5779_v40 = vpop.permute.xlu1 %5778 }
 0xd54   : > { %6037 = vpow2.f32 %v2682_v16  ;;  %v5781_v37 = vunpack.i.h.bf16 %v5779_v40  ;;  %v5780_v12 = vunpack.i.l.bf16 %v5779_v40 }
 0xd55   : > { %6039 = vpow2.f32 %v2688_v5 }
 0xd56   : > { %v5431_v6 = vpack.c.bf16 %v5781_v37, %v5780_v12 }
 0xd58   : > { %5432 = vmatprep.subr.bf16.mxu0 %v5431_v6 }
 0xd59   : > { %5434 = vmatpush3.bf16.msra.mxu0 %v5431_v6 }
 0xd5e   : > { %v7127_v57 = vpop.eup %6037 }
 0xd5f   : > { %v2702_v54 = vsel %vm292_vm0, %v7127_v57, 0.0  ;;  %v7131_v61 = vpop.eup %6039 }
 0xd60   : > { %2703 = vadd.xlane.f32.xlu0 %v2702_v54  ;;  %v2711_v58 = vsel %vm292_vm0, %v7131_v61, 0.0 }
 0xd61   : > { %2700 = vadd.xlane.f32.xlu1 %v2699_v48 }
 0xd64   : > { %2712 = vadd.xlane.f32.xlu0 %v2711_v58 }
 0xd72   : > { %5798 = vrot.lane.b32.xlu1 %v6299_v7, %s6151_s27 }
 0xd76   : > { %5803 = vrot.lane.b32.xlu1 %v6309_v18, %s6151_s27 }
 0xd7a   : > { %2883 = vrot.lane.b32.xlu1 %v6278_v43, %s6152_s28 }
 0xd7e   : > { %2885 = vrot.lane.b32.xlu1 %v6332_v24, %s6152_s28 }
 0xd82   : > { %2889 = vrot.lane.b32.xlu1 %v6336_v25, %s6152_s28 }
 0xd84   : > { %v2662_v46 = vpop.xlane.xlu1 %2661 }
 0xd85   : > { %v2672_v33 = vsub.f32 %v7087_v36, %v2662_v46 }
 0xd86   : > { %2893 = vrot.lane.b32.xlu1 %v6340_v26, %s6152_s28 }
 0xd87   : > { %v2686_v11 = vmul.f32 1.442695, %v2672_v33 }
 0xd88   : > { %v5784_v55 = vpop.permute.xlu1 %5783 }
 0xd89   : > { %6041 = vpow2.f32 %v2686_v11  ;;  %v5786_v34 = vunpack.i.h.bf16 %v5784_v55  ;;  %v5785_v8 = vunpack.i.l.bf16 %v5784_v55 }
 0xd8a   : > { %2897 = vrot.lane.b32.xlu1 %v6344_v27, %s6152_s28 }
 0xd8b   : > { %v5435_v9 = vpack.c.bf16 %v5786_v34, %v5785_v8 }
 0xd8d   : > { %5436 = vmatprep.subr.bf16.mxu0 %v5435_v9 }
 0xd8e   : > { %5438 = vmatpush3.bf16.msra.mxu0 %v5435_v9 }
 0xd93   : > { %v6042_v5 = vpop.eup %6041 }
 0xd94   : > { %v2708_v16 = vsel %vm292_vm0, %v6042_v5, 0.0 }
 0xd95   : > { %2709 = vadd.xlane.f32.xlu0 %v2708_v16 }
 0xdab   : > { %5793 = vrot.lane.b32.xlu0 %v6291_v60, %s6151_s27 }
 0xdaf   : > { %2887 = vrot.lane.b32.xlu0 %v6311_v19, %s6152_s28 }
 0xdb3   : > { %2891 = vrot.lane.b32.xlu0 %v6319_v22, %s6152_s28 }
 0xdb7   : > { %2895 = vrot.lane.b32.xlu0 %v6325_v23, %s6152_s28 }
 0xdb8   : > { %v2695_v36 = vpop.xlane.xlu0 %2694 }
 0xdb9   : > { %6043 = vrcp.f32 %v2695_v36  ;;  %v2692_v40 = vpop.xlane.xlu1 %2691 }
 0xdba   : > { %6045 = vrcp.f32 %v2692_v40 }
 0xdbd   : > { %v5789_v37 = vpop.permute.xlu1 %5788 }
 0xdbe   : > { %v5791_v12 = vunpack.i.h.bf16 %v5789_v37  ;;  %v5790_v6 = vunpack.i.l.bf16 %v5789_v37 }
 0xdc0   : > { %v5439_v54 = vpack.c.bf16 %v5791_v12, %v5790_v6 }
 0xdc1   : > { %v2698_v48 = vpop.xlane.xlu0 %2697 }
 0xdc2   : > { %6047 = vrcp.f32 %v2698_v48  ;;  %5441 = vmatprep.subr.msk.bf16.mxu0 %vm6352_vm2, %v5439_v54 }
 0xdc3   : > { %v6044_v58 = vpop.eup %6043 }
 0xdc4   : > { %v6046_v46 = vpop.eup %6045  ;;  %v2723_v11 = vmul.f32 %v6044_v58, %v7104_v0 }
 0xdc5   : > { %v2722_v33 = vmul.f32 %v6046_v46, %v7106_v44  ;;  %v2707_v8 = vpop.xlane.xlu0 %2706 }
 0xdc7   : > { %5031 = vmatprep.mubr.msk.f32.mxu0 %vm292_vm0, %v2722_v33 }
 0xdc8   : > { %5032 = vmatmul.mubr.msk.f32.vlgmr.msra.gmra.mrb[56].mxu0 %vm292_vm0, %v2723_v11 }
 0xdc9   : > { %5444 = vmatpush3.bf16.xpose.msk.msra.mxu0 %vm6352_vm2, %v5439_v54 }
 0xdcc   : > { %v6048_v55 = vpop.eup %6047 }
 0xdcd   : > { %v2724_v34 = vmul.f32 %v6048_v55, %v7112_v4 }
 0xdcf   : > { %5034 = vmatprep.mubr.msk.f32.mxu0 %vm292_vm0, %v2724_v34 }
 0xded   : > { %v2704_v9 = vpop.xlane.xlu0 %2703 }
 0xdee   : > { %6049 = vrcp.f32 %v2704_v9  ;;  %v2701_v16 = vpop.xlane.xlu1 %2700 }
 0xdef   : > { %6051 = vrcp.f32 %v2701_v16 }
 0xdf0   : > { %6053 = vrcp.f32 %v2707_v8 }
 0xdf1   : > { %v2713_v12 = vpop.xlane.xlu0 %2712 }
 0xdf2   : > { %6055 = vrcp.f32 %v2713_v12  ;;  %v5799_v54 = vpop.permute.xlu1 %5798 }
 0xdf3   : > { %v5801_v58 = vunpack.i.h.bf16 %v5799_v54  ;;  %v5800_v46 = vunpack.i.l.bf16 %v5799_v54 }
 0xdf6   : > { %v5804_v55 = vpop.permute.xlu1 %5803 }
 0xdf7   : > { %v5806_v9 = vunpack.i.h.bf16 %v5804_v55  ;;  %v5805_v16 = vunpack.i.l.bf16 %v5804_v55 }
 0xdf8   : > { %v6050_v44 = vpop.eup %6049 }
 0xdf9   : > { %v6052_v0 = vpop.eup %6051  ;;  %v2726_v37 = vmul.f32 %v6050_v44, %v7127_v57  ;;  %v5451_v57 = vpack.c.bf16 %v5801_v58, %v5800_v46 }
 0xdfa   : > { %v2725_v36 = vmul.f32 %v6052_v0, %v7125_v41  ;;  %v6054_v40 = vpop.eup %6053  ;;  %v2884_v0 = vpop.permute.xlu1 %2883 }
 0xdfb   : > { %v2727_v4 = vmul.f32 %v6054_v40, %v7116_v56 }
 0xdfc   : > { %5035 = vmatmul.mubr.msk.f32.gmra.mrb[58].mxu0 %vm292_vm0, %v2725_v36  ;;  %v6056_v34 = vpop.eup %6055  ;;  %v5457_v36 = vpack.c.bf16 %v5806_v9, %v5805_v16 }
 0xdfd   : > { %5037 = vmatprep.mubr.msk.f32.mxu0 %vm292_vm0, %v2726_v37  ;;  %v2729_v44 = vmul.f32 %v6056_v34, %v7131_v61 }
 0xdfe   : > { %v2886_v40 = vpop.permute.xlu1 %2885 }
 0xe00   : > { %5038 = vmatmul.mubr.msk.f32.gmra.mrb[60].mxu0 %vm292_vm0, %v2727_v4 }
 0xe02   : > { %v2890_v61 = vpop.permute.xlu1 %2889 }
 0xe06   : > { %v2894_v4 = vpop.permute.xlu1 %2893 }
 0xe22   : > { %v2710_v6 = vpop.xlane.xlu0 %2709 }
 0xe23   : > { %6057 = vrcp.f32 %v2710_v6  ;;  %v2898_v6 = vpop.permute.xlu1 %2897 }
 0xe26   : > { %v5794_v48 = vpop.permute.xlu0 %5793 }
 0xe27   : > { %v5796_v41 = vunpack.i.h.bf16 %v5794_v48  ;;  %v5795_v33 = vunpack.i.l.bf16 %v5794_v48 }
 0xe29   : > { %v5445_v11 = vpack.c.bf16 %v5796_v41, %v5795_v33 }
 0xe2b   : > { %5447 = vmatprep.subr.msk.bf16.mxu0 %vm6352_vm2, %v5445_v11 }
 0xe2c   : > { %5450 = vmatpush3.bf16.xpose.msk.msra.mxu0 %vm6352_vm2, %v5445_v11 }
 0xe2d   : > { %v6058_v56 = vpop.eup %6057  ;;  %5453 = vmatprep.subr.msk.bf16.mxu0 %vm6352_vm2, %v5451_v57 }
 0xe2e   : > { %v2728_v8 = vmul.f32 %v6058_v56, %v6042_v5  ;;  %v2888_v5 = vpop.permute.xlu0 %2887 }
 0xe30   : > { %5040 = vmatprep.mubr.msk.f32.mxu0 %vm292_vm0, %v2728_v8 }
 0xe31   : > { %5041 = vmatmul.mubr.msk.f32.gmra.mrb[62].mxu0 %vm292_vm0, %v2729_v44 }
 0xe32   : > { %5059 = vmatprep.mubr.msk.f32.mxu0 %vm462_vm1, %v2884_v0  ;;  %v2892_v37 = vpop.permute.xlu0 %2891 }
 0xe34   : > { %5456 = vmatpush3.bf16.xpose.msk.msra.mxu0 %vm6352_vm2, %v5451_v57 }
 0xe35   : > { %5459 = vmatprep.subr.msk.bf16.mxu0 %vm6352_vm2, %v5457_v36 }
 0xe36   : > { %v2896_v12 = vpop.permute.xlu0 %2895 }
 0xe3c   : > { %5462 = vmatpush3.bf16.xpose.msk.msra.mxu0 %vm6352_vm2, %v5457_v36 }
 0xe43   : > { %5060 = vmatmul.mubr.msk.f32.vlgmr.msra.gmra.mrb[64].mxu0 %vm462_vm1, %v2886_v40 }
 0xe44   : > { %5062 = vmatprep.mubr.msk.f32.mxu0 %vm462_vm1, %v2888_v5 }
 0xe47   : > { %5063 = vmatmul.mubr.msk.f32.gmra.mrb[66].mxu0 %vm462_vm1, %v2890_v61 }
 0xe48   : > { %5065 = vmatprep.mubr.msk.f32.mxu0 %vm462_vm1, %v2892_v37 }
 0xe4b   : > { %5066 = vmatmul.mubr.msk.f32.gmra.mrb[68].mxu0 %vm462_vm1, %v2894_v4 }
 0xe4c   : > { %5068 = vmatprep.mubr.msk.f32.mxu0 %vm462_vm1, %v2896_v12 }
 0xe4f   : > { %5069 = vmatmul.mubr.msk.f32.gmra.mrb[70].mxu0 %vm462_vm1, %v2898_v6 }
 0xe9b   : > { %v7200_v54 = vpop.f32.mrb[56].mxu0 }
 0xe9c   : > { %7709 = vst [vmem:[#allocation22_spill] sm:$0xff] %v7200_v54  ;;  %v7202_v48 = vpop.f32.mrb[57].mxu0 }
 0xecf   : > { %v7204_v58 = vpop.f32.mrb[58].mxu0 }
 0xed0   : > { %7710 = vst [vmem:[#allocation23_spill] sm:$0xff] %v7204_v58  ;;  %v7206_v46 = vpop.f32.mrb[59].mxu0 }
 0xed1   : > { %7711 = vst [vmem:[#allocation24_spill] sm:$0xff] %v7206_v46 }
 0xed3   : > { %v7208_v41 = vpop.f32.mrb[60].mxu0 }
 0xed4   : > { %7712 = vst [vmem:[#allocation25_spill] sm:$0xff] %v7208_v41  ;;  %v7210_v33 = vpop.f32.mrb[61].mxu0 }
 0xf04   : > { %v7212_v11 = vpop.f32.mrb[62].mxu0 }
 0xf05   : > { %7713 = vst [vmem:[#allocation26_spill] sm:$0xff] %v7212_v11  ;;  %v7214_v57 = vpop.f32.mrb[63].mxu0 }
 0xf06   : > { %7714 = vst [vmem:[#allocation27_spill] sm:$0xff] %v7214_v57 }
 0xf16   : > { %v5061_v55 = vpop.f32.mrb[64].mxu0 }
 0xf17   : > { %v3013_v34 = vpop.f32.mrb[65].mxu0  ;;  %v3055_v56 = vsel %vm292_vm0, %v5061_v55, -inf }
 0xf18   : > { %3056 = vmax.xlane.f32.xlu1 %v3055_v56  ;;  %v3052_v8 = vsel %vm292_vm0, %v3013_v34, -inf }
 0xf19   : > { %3053 = vmax.xlane.f32.xlu0 %v3052_v8 }
 0xf1a   : > { %v7218_v9 = vpop.f32.mrb[66].mxu0 }
 0xf1b   : > { %v3023_v16 = vpop.f32.mrb[67].mxu0  ;;  %v3061_v44 = vsel %vm292_vm0, %v7218_v9, -inf }
 0xf1c   : > { %v3058_v40 = vsel %vm292_vm0, %v3023_v16, -inf }
 0xf1d   : > { %3062 = vmax.xlane.f32.xlu0 %v3061_v44 }
 0xf1e   : > { %v5067_v0 = vpop.f32.mrb[68].mxu0 }
 0xf1f   : > { %v7222_v36 = vpop.f32.mrb[69].mxu0  ;;  %v3067_v37 = vsel %vm292_vm0, %v5067_v0, -inf }
 0xf20   : > { %v3064_v12 = vsel %vm292_vm0, %v7222_v36, -inf }
 0xf21   : > { %3059 = vmax.xlane.f32.xlu0 %v3058_v40 }
 0xf22   : > { %v7225_v5 = vpop.f32.mrb[70].mxu0 }
 0xf23   : > { %v7227_v61 = vpop.f32.mrb[71].mxu0  ;;  %v3073_v4 = vsel %vm292_vm0, %v7225_v5, -inf }
 0xf24   : > { %v3070_v6 = vsel %vm292_vm0, %v7227_v61, -inf }
 0xf25   : > { %3068 = vmax.xlane.f32.xlu0 %v3067_v37 }
 0xf29   : > { %5808 = vrot.lane.b32.xlu1 %v6287_v52, %s6152_s28  ;;  %3074 = vmax.xlane.f32.xlu0 %v3073_v4 }
 0xf3f   : > { %5813 = vrot.lane.b32.xlu0 %v6293_v63, %s6152_s28 }
 0xf4d   : > { %3065 = vmax.xlane.f32.xlu1 %v3064_v12 }
 0xf5e   : > { %5818 = vrot.lane.b32.xlu1 %v6301_v10, %s6152_s28 }
 0xf82   : > { %3071 = vmax.xlane.f32.xlu1 %v3070_v6 }
 0xf93   : > { %5823 = vrot.lane.b32.xlu1 %v6313_v21, %s6152_s28 }
 0xfa5   : > { %v3057_v56 = vpop.xlane.xlu1 %3056 }
 0xfa6   : > { %v3077_v8 = vsub.f32 %v5061_v55, %v3057_v56  ;;  %v3054_v44 = vpop.xlane.xlu0 %3053 }
 0xfa7   : > { %v3076_v40 = vsub.f32 %v3013_v34, %v3054_v44 }
 0xfa8   : > { %v3086_v37 = vmul.f32 1.442695, %v3077_v8 }
 0xfa9   : > { %v3084_v4 = vmul.f32 1.442695, %v3076_v40  ;;  %v5809_v58 = vpop.permute.xlu1 %5808 }
 0xfaa   : > { %6059 = vpow2.f32 %v3086_v37  ;;  %v5811_v46 = vunpack.i.h.bf16 %v5809_v58  ;;  %v5810_v12 = vunpack.i.l.bf16 %v5809_v58  ;;  %v3063_v11 = vpop.xlane.xlu0 %3062 }
 0xfab   : > { %6061 = vpow2.f32 %v3084_v4  ;;  %v3079_v40 = vsub.f32 %v7218_v9, %v3063_v11 }
 0xfac   : > { %v5463_v57 = vpack.c.bf16 %v5811_v46, %v5810_v12 }
 0xfad   : > { %v3090_v4 = vmul.f32 1.442695, %v3079_v40 }
 0xfae   : > { %5464 = vmatprep.subr.bf16.mxu1 %v5463_v57  ;;  %v3060_v1 = vpop.xlane.xlu0 %3059 }
 0xfaf   : > { %v3078_v54 = vsub.f32 %v3023_v16, %v3060_v1  ;;  %5466 = vmatpush3.bf16.msra.mxu1 %v5463_v57 }
 0xfb1   : > { %v3088_v6 = vmul.f32 1.442695, %v3078_v54 }
 0xfb2   : > { %v3069_v39 = vpop.xlane.xlu0 %3068 }
 0xfb3   : > { %6063 = vpow2.f32 %v3088_v6  ;;  %v3081_v41 = vsub.f32 %v5067_v0, %v3069_v39 }
 0xfb4   : > { %v7244_v55 = vpop.eup %6059 }
 0xfb5   : > { %v7246_v34 = vpop.eup %6061  ;;  %v3094_v56 = vmul.f32 1.442695, %v3081_v41  ;;  %v3103_v8 = vsel %vm292_vm0, %v7244_v55, 0.0 }
 0xfb6   : > { %3104 = vadd.xlane.f32.xlu0 %v3103_v8  ;;  %v3075_v58 = vpop.xlane.xlu0 %3074  ;;  %v3100_v46 = vsel %vm292_vm0, %v7246_v34, 0.0 }
 0xfb7   : > { %6065 = vpow2.f32 %v3094_v56  ;;  %3101 = vadd.xlane.f32.xlu1 %v3100_v46  ;;  %v3083_v37 = vsub.f32 %v7225_v5, %v3075_v58 }
 0xfb8   : > { %6067 = vpow2.f32 %v3090_v4 }
 0xfb9   : > { %v3098_v56 = vmul.f32 1.442695, %v3083_v37 }
 0xfba   : > { %v5814_v1 = vpop.permute.xlu0 %5813 }
 0xfbb   : > { %v5816_v54 = vunpack.i.h.bf16 %v5814_v1  ;;  %v5815_v57 = vunpack.i.l.bf16 %v5814_v1 }
 0xfbd   : > { %v7252_v16 = vpop.eup %6063  ;;  %v5467_v39 = vpack.c.bf16 %v5816_v54, %v5815_v57 }
 0xfbe   : > { %v3106_v0 = vsel %vm292_vm0, %v7252_v16, 0.0 }
 0xfbf   : > { %3107 = vadd.xlane.f32.xlu0 %v3106_v0  ;;  %5468 = vmatprep.subr.bf16.mxu1 %v5467_v39 }
 0xfc0   : > { %5470 = vmatpush3.bf16.msra.mxu1 %v5467_v39 }
 0xfc1   : > { %v7256_v41 = vpop.eup %6065 }
 0xfc2   : > { %v3115_v44 = vsel %vm292_vm0, %v7256_v41, 0.0 }
 0xfc3   : > { %3116 = vadd.xlane.f32.xlu0 %v3115_v44 }
 0xfc8   : > { %5828 = vrot.lane.b32.xlu1 %v6285_v49, %s6153_s29  ;;  %v7265_v49 = vpop.eup %6067 }
 0xfda   : > { %v3066_v12 = vpop.xlane.xlu1 %3065 }
 0xfdb   : > { %v3080_v6 = vsub.f32 %v7222_v36, %v3066_v12  ;;  %v3109_v36 = vsel %vm292_vm0, %v7265_v49, 0.0 }
 0xfdd   : > { %v3092_v8 = vmul.f32 1.442695, %v3080_v6 }
 0xfde   : > { %v5819_v46 = vpop.permute.xlu1 %5818 }
 0xfdf   : > { %6069 = vpow2.f32 %v3092_v8  ;;  %v5821_v1 = vunpack.i.h.bf16 %v5819_v46  ;;  %v5820_v54 = vunpack.i.l.bf16 %v5819_v46 }
 0xfe0   : > { %6071 = vpow2.f32 %v3098_v56 }
 0xfe1   : > { %v5471_v57 = vpack.c.bf16 %v5821_v1, %v5820_v54 }
 0xfe3   : > { %5472 = vmatprep.subr.bf16.mxu1 %v5471_v57 }
 0xfe4   : > { %5474 = vmatpush3.bf16.msra.mxu1 %v5471_v57 }
 0xfe9   : > { %v7267_v11 = vpop.eup %6069 }
 0xfea   : > { %v3112_v9 = vsel %vm292_vm0, %v7267_v11, 0.0  ;;  %v7271_v5 = vpop.eup %6071 }
 0xfeb   : > { %3113 = vadd.xlane.f32.xlu0 %v3112_v9  ;;  %v3121_v58 = vsel %vm292_vm0, %v7271_v5, 0.0 }
 0xfec   : > { %3110 = vadd.xlane.f32.xlu1 %v3109_v36 }
 0xfef   : > { %3122 = vadd.xlane.f32.xlu0 %v3121_v58 }
 0xffd   : > { %5838 = vrot.lane.b32.xlu1 %v6299_v7, %s6153_s29 }
0x1001   : > { %5843 = vrot.lane.b32.xlu1 %v6309_v18, %s6153_s29 }
0x1005   : > { %3293 = vrot.lane.b32.xlu1 %v6278_v43, %s6154_s7 }
0x1009   : > { %3295 = vrot.lane.b32.xlu1 %v6332_v24, %s6154_s7 }
0x100d   : > { %3299 = vrot.lane.b32.xlu1 %v6336_v25, %s6154_s7 }
0x100f   : > { %v3072_v39 = vpop.xlane.xlu1 %3071 }
0x1010   : > { %v3082_v0 = vsub.f32 %v7227_v61, %v3072_v39 }
0x1011   : > { %3303 = vrot.lane.b32.xlu1 %v6340_v26, %s6154_s7 }
0x1012   : > { %v3096_v7 = vmul.f32 1.442695, %v3082_v0 }
0x1013   : > { %v5824_v44 = vpop.permute.xlu1 %5823 }
0x1014   : > { %6073 = vpow2.f32 %v3096_v7  ;;  %v5826_v18 = vunpack.i.h.bf16 %v5824_v44  ;;  %v5825_v40 = vunpack.i.l.bf16 %v5824_v44 }
0x1015   : > { %3307 = vrot.lane.b32.xlu1 %v6344_v27, %s6154_s7 }
0x1016   : > { %v5475_v43 = vpack.c.bf16 %v5826_v18, %v5825_v40 }
0x1018   : > { %5476 = vmatprep.subr.bf16.mxu1 %v5475_v43 }
0x1019   : > { %5478 = vmatpush3.bf16.msra.mxu1 %v5475_v43 }
0x101e   : > { %v6074_v24 = vpop.eup %6073 }
0x101f   : > { %v3118_v25 = vsel %vm292_vm0, %v6074_v24, 0.0 }
0x1020   : > { %3119 = vadd.xlane.f32.xlu0 %v3118_v25 }
0x1036   : > { %5833 = vrot.lane.b32.xlu0 %v6291_v60, %s6153_s29 }
0x103a   : > { %3297 = vrot.lane.b32.xlu0 %v6311_v19, %s6154_s7 }
0x103e   : > { %3301 = vrot.lane.b32.xlu0 %v6319_v22, %s6154_s7 }
0x1042   : > { %3305 = vrot.lane.b32.xlu0 %v6325_v23, %s6154_s7 }
0x1043   : > { %v3105_v26 = vpop.xlane.xlu0 %3104 }
0x1044   : > { %6075 = vrcp.f32 %v3105_v26  ;;  %v3102_v27 = vpop.xlane.xlu1 %3101 }
0x1045   : > { %6077 = vrcp.f32 %v3102_v27 }
0x1048   : > { %v5829_v61 = vpop.permute.xlu1 %5828 }
0x1049   : > { %v5831_v37 = vunpack.i.h.bf16 %v5829_v61  ;;  %v5830_v4 = vunpack.i.l.bf16 %v5829_v61 }
0x104b   : > { %v5479_v12 = vpack.c.bf16 %v5831_v37, %v5830_v4 }
0x104c   : > { %v3108_v6 = vpop.xlane.xlu0 %3107 }
0x104d   : > { %6079 = vrcp.f32 %v3108_v6  ;;  %5481 = vmatprep.subr.msk.bf16.mxu1 %vm6352_vm2, %v5479_v12 }
0x104e   : > { %v6076_v60 = vpop.eup %6075 }
0x104f   : > { %v6078_v19 = vpop.eup %6077  ;;  %v3133_v56 = vmul.f32 %v6076_v60, %v7244_v55 }
0x1050   : > { %v3132_v22 = vmul.f32 %v6078_v19, %v7246_v34  ;;  %v3117_v46 = vpop.xlane.xlu0 %3116 }
0x1052   : > { %5087 = vmatprep.mubr.msk.f32.mxu1 %vm292_vm0, %v3132_v22 }
0x1053   : > { %5088 = vmatmul.mubr.msk.f32.vlgmr.msra.gmra.mrb[48].mxu1 %vm292_vm0, %v3133_v56 }
0x1054   : > { %5484 = vmatpush3.bf16.xpose.msk.msra.mxu1 %vm6352_vm2, %v5479_v12 }
0x1057   : > { %v6080_v23 = vpop.eup %6079 }
0x1058   : > { %v3134_v8 = vmul.f32 %v6080_v23, %v7252_v16 }
0x105a   : > { %5090 = vmatprep.mubr.msk.f32.mxu1 %vm292_vm0, %v3134_v8 }
0x1078   : > { %v3114_v1 = vpop.xlane.xlu0 %3113 }
0x1079   : > { %6081 = vrcp.f32 %v3114_v1  ;;  %v3111_v54 = vpop.xlane.xlu1 %3110 }
0x107a   : > { %6083 = vrcp.f32 %v3111_v54 }
0x107b   : > { %6085 = vrcp.f32 %v3117_v46 }
0x107c   : > { %v3123_v58 = vpop.xlane.xlu0 %3122 }
0x107d   : > { %6087 = vrcp.f32 %v3123_v58  ;;  %v5839_v0 = vpop.permute.xlu1 %5838 }
0x107e   : > { %v5841_v44 = vunpack.i.h.bf16 %v5839_v0  ;;  %v5840_v18 = vunpack.i.l.bf16 %v5839_v0 }
0x1081   : > { %v5844_v25 = vpop.permute.xlu1 %5843 }
0x1082   : > { %v5846_v61 = vunpack.i.h.bf16 %v5844_v25  ;;  %v5845_v37 = vunpack.i.l.bf16 %v5844_v25 }
0x1083   : > { %v6082_v34 = vpop.eup %6081 }
0x1084   : > { %v6084_v55 = vpop.eup %6083  ;;  %v3136_v36 = vmul.f32 %v6082_v34, %v7267_v11  ;;  %v5491_v11 = vpack.c.bf16 %v5841_v44, %v5840_v18  ;;  %v5497_v6 = vpack.c.bf16 %v5846_v61, %v5845_v37 }
0x1085   : > { %v3135_v57 = vmul.f32 %v6084_v55, %v7265_v49  ;;  %v6086_v9 = vpop.eup %6085  ;;  %v3294_v12 = vpop.permute.xlu1 %3293 }
0x1086   : > { %v3137_v16 = vmul.f32 %v6086_v9, %v7256_v41 }
0x1087   : > { %5091 = vmatmul.mubr.msk.f32.gmra.mrb[50].mxu1 %vm292_vm0, %v3135_v57  ;;  %v6088_v26 = vpop.eup %6087 }
0x1088   : > { %5093 = vmatprep.mubr.msk.f32.mxu1 %vm292_vm0, %v3136_v36  ;;  %v3139_v4 = vmul.f32 %v6088_v26, %v7271_v5 }
0x1089   : > { %v3296_v60 = vpop.permute.xlu1 %3295 }
0x108b   : > { %5094 = vmatmul.mubr.msk.f32.gmra.mrb[52].mxu1 %vm292_vm0, %v3137_v16 }
0x108d   : > { %v3300_v5 = vpop.permute.xlu1 %3299 }
0x1091   : > { %v3304_v22 = vpop.permute.xlu1 %3303 }
0x1095   : > { %v3308_v23 = vpop.permute.xlu1 %3307 }
0x10ad   : > { %v3120_v39 = vpop.xlane.xlu0 %3119 }
0x10ae   : > { %6089 = vrcp.f32 %v3120_v39 }
0x10b1   : > { %v5834_v7 = vpop.permute.xlu0 %5833 }
0x10b2   : > { %v5836_v49 = vunpack.i.h.bf16 %v5834_v7  ;;  %v5835_v40 = vunpack.i.l.bf16 %v5834_v7 }
0x10b4   : > { %v5485_v43 = vpack.c.bf16 %v5836_v49, %v5835_v40 }
0x10b6   : > { %5487 = vmatprep.subr.msk.bf16.mxu1 %vm6352_vm2, %v5485_v43 }
0x10b7   : > { %5490 = vmatpush3.bf16.xpose.msk.msra.mxu1 %vm6352_vm2, %v5485_v43 }
0x10b8   : > { %v6090_v41 = vpop.eup %6089  ;;  %5493 = vmatprep.subr.msk.bf16.mxu1 %vm6352_vm2, %v5491_v11 }
0x10b9   : > { %v3138_v27 = vmul.f32 %v6090_v41, %v6074_v24  ;;  %v3298_v24 = vpop.permute.xlu0 %3297 }
0x10bb   : > { %5096 = vmatprep.mubr.msk.f32.mxu1 %vm292_vm0, %v3138_v27 }
0x10bc   : > { %5097 = vmatmul.mubr.msk.f32.gmra.mrb[54].mxu1 %vm292_vm0, %v3139_v4 }
0x10bd   : > { %5115 = vmatprep.mubr.msk.f32.mxu1 %vm462_vm1, %v3294_v12  ;;  %v3302_v19 = vpop.permute.xlu0 %3301 }
0x10bf   : > { %5496 = vmatpush3.bf16.xpose.msk.msra.mxu1 %vm6352_vm2, %v5491_v11 }
0x10c0   : > { %5499 = vmatprep.subr.msk.bf16.mxu1 %vm6352_vm2, %v5497_v6 }
0x10c1   : > { %v3306_v56 = vpop.permute.xlu0 %3305 }
0x10c7   : > { %5502 = vmatpush3.bf16.xpose.msk.msra.mxu1 %vm6352_vm2, %v5497_v6 }
0x10ce   : > { %5116 = vmatmul.mubr.msk.f32.vlgmr.msra.gmra.mrb[56].mxu1 %vm462_vm1, %v3296_v60 }
0x10cf   : > { %5118 = vmatprep.mubr.msk.f32.mxu1 %vm462_vm1, %v3298_v24 }
0x10d2   : > { %5119 = vmatmul.mubr.msk.f32.gmra.mrb[58].mxu1 %vm462_vm1, %v3300_v5 }
0x10d3   : > { %5121 = vmatprep.mubr.msk.f32.mxu1 %vm462_vm1, %v3302_v19 }
0x10d6   : > { %5122 = vmatmul.mubr.msk.f32.gmra.mrb[60].mxu1 %vm462_vm1, %v3304_v22 }
0x10d7   : > { %5124 = vmatprep.mubr.msk.f32.mxu1 %vm462_vm1, %v3306_v56 }
0x10da   : > { %5125 = vmatmul.mubr.msk.f32.gmra.mrb[62].mxu1 %vm462_vm1, %v3308_v23 }
0x1126   : > { %v7340_v31 = vpop.f32.mrb[48].mxu1 }
0x1127   : > { %v7342_v8 = vpop.f32.mrb[49].mxu1 }
0x115a   : > { %v7344_v46 = vpop.f32.mrb[50].mxu1 }
0x115b   : > { %v7346_v1 = vpop.f32.mrb[51].mxu1 }
0x115e   : > { %v7348_v54 = vpop.f32.mrb[52].mxu1 }
0x115f   : > { %v7350_v34 = vpop.f32.mrb[53].mxu1 }
0x118f   : > { %v7352_v55 = vpop.f32.mrb[54].mxu1 }
0x1190   : > { %v7354_v57 = vpop.f32.mrb[55].mxu1 }
0x11a1   : > { %v5117_v9 = vpop.f32.mrb[56].mxu1 }
0x11a2   : > { %v3423_v36 = vpop.f32.mrb[57].mxu1  ;;  %v3465_v16 = vsel %vm292_vm0, %v5117_v9, -inf }
0x11a3   : > { %3466 = vmax.xlane.f32.xlu1 %v3465_v16  ;;  %v3462_v58 = vsel %vm292_vm0, %v3423_v36, -inf }
0x11a4   : > { %3463 = vmax.xlane.f32.xlu0 %v3462_v58 }
0x11a5   : > { %v5120_v39 = vpop.f32.mrb[58].mxu1 }
0x11a6   : > { %v3433_v0 = vpop.f32.mrb[59].mxu1  ;;  %v3471_v49 = vsel %vm292_vm0, %v5120_v39, -inf }
0x11a7   : > { %v3468_v7 = vsel %vm292_vm0, %v3433_v0, -inf }
0x11a8   : > { %3469 = vmax.xlane.f32.xlu0 %v3468_v7 }
0x11a9   : > { %v5123_v44 = vpop.f32.mrb[60].mxu1 }
0x11aa   : > { %v3443_v18 = vpop.f32.mrb[61].mxu1  ;;  %v3477_v25 = vsel %vm292_vm0, %v5123_v44, -inf }
0x11ab   : > { %v3474_v40 = vsel %vm292_vm0, %v3443_v18, -inf }
0x11ac   : > { %3472 = vmax.xlane.f32.xlu0 %v3471_v49  ;;  %3475 = vmax.xlane.f32.xlu1 %v3474_v40 }
0x11ad   : > { %v5126_v43 = vpop.f32.mrb[62].mxu1 }
0x11ae   : > { %v3453_v11 = vpop.f32.mrb[63].mxu1  ;;  %v3483_v41 = vsel %vm292_vm0, %v5126_v43, -inf }
0x11af   : > { %v3480_v26 = vsel %vm292_vm0, %v3453_v11, -inf }
0x11b0   : > { %3478 = vmax.xlane.f32.xlu0 %v3477_v25  ;;  %3481 = vmax.xlane.f32.xlu1 %v3480_v26 }
0x11b4   : > { %3484 = vmax.xlane.f32.xlu0 %v3483_v41 }
0x11c1   : > { %5848 = vrot.lane.b32.xlu1 %v6287_v52, %s6154_s7 }
0x1230   : > { %v3467_v27 = vpop.xlane.xlu1 %3466 }
0x1231   : > { %v3487_v61 = vsub.f32 %v5117_v9, %v3467_v27  ;;  %v3464_v37 = vpop.xlane.xlu0 %3463 }
0x1232   : > { %v3486_v4 = vsub.f32 %v3423_v36, %v3464_v37 }
0x1233   : > { %v3496_v12 = vmul.f32 1.442695, %v3487_v61 }
0x1234   : > { %v3494_v6 = vmul.f32 1.442695, %v3486_v4 }
0x1235   : > { %6091 = vpow2.f32 %v3496_v12  ;;  %v3470_v60 = vpop.xlane.xlu0 %3469 }
0x1236   : > { %6093 = vpow2.f32 %v3494_v6  ;;  %v3488_v24 = vsub.f32 %v3433_v0, %v3470_v60 }
0x1238   : > { %v3498_v5 = vmul.f32 1.442695, %v3488_v24 }
0x1239   : > { %v3473_v19 = vpop.xlane.xlu0 %3472  ;;  %v3476_v22 = vpop.xlane.xlu1 %3475 }
0x123a   : > { %6095 = vpow2.f32 %v3498_v5  ;;  %v3489_v56 = vsub.f32 %v5120_v39, %v3473_v19  ;;  %v3490_v23 = vsub.f32 %v3443_v18, %v3476_v22 }
0x123c   : > { %v3500_v16 = vmul.f32 1.442695, %v3489_v56  ;;  %v3502_v58 = vmul.f32 1.442695, %v3490_v23 }
0x123d   : > { %v3479_v7 = vpop.xlane.xlu0 %3478  ;;  %v3482_v52 = vpop.xlane.xlu1 %3481 }
0x123e   : > { %6097 = vpow2.f32 %v3500_v16  ;;  %v3491_v9 = vsub.f32 %v5123_v44, %v3479_v7  ;;  %v3492_v25 = vsub.f32 %v3453_v11, %v3482_v52 }
0x123f   : > { %v7366_v49 = vpop.eup %6091  ;;  %6099 = vpow2.f32 %v3502_v58 }
0x1240   : > { %v7368_v36 = vpop.eup %6093  ;;  %v3504_v40 = vmul.f32 1.442695, %v3491_v9  ;;  %v3513_v0 = vsel %vm292_vm0, %v7366_v49, 0.0  ;;  %v3506_v37 = vmul.f32 1.442695, %v3492_v25 }
0x1241   : > { %3514 = vadd.xlane.f32.xlu0 %v3513_v0  ;;  %v3485_v26 = vpop.xlane.xlu0 %3484  ;;  %v5849_v39 = vpop.permute.xlu1 %5848  ;;  %v3510_v18 = vsel %vm292_vm0, %v7368_v36, 0.0 }
0x1242   : > { %6101 = vpow2.f32 %v3504_v40  ;;  %v3493_v41 = vsub.f32 %v5126_v43, %v3485_v26  ;;  %v5851_v27 = vunpack.i.h.bf16 %v5849_v39  ;;  %v5850_v44 = vunpack.i.l.bf16 %v5849_v39  ;;  %3511 = vadd.xlane.f32.xlu1 %v3510_v18  ;;  %v7733_v40 = vld [vmem:[#allocation8_spill] sm:$0xff] }
0x1244   : > { %v7374_v61 = vpop.eup %6095  ;;  %v3508_v4 = vmul.f32 1.442695, %v3493_v41  ;;  %v5503_v12 = vpack.c.bf16 %v5851_v27, %v5850_v44  ;;  %v7734_v41 = vld [vmem:[#allocation3_spill] sm:$0xff] }
0x1245   : > { %v3516_v11 = vsel %vm292_vm0, %v7374_v61, 0.0 }
0x1246   : > { %6103 = vpow2.f32 %v3508_v4  ;;  %3517 = vadd.xlane.f32.xlu1 %v3516_v11  ;;  %5504 = vmatprep.subr.bf16.mxu0 %v5503_v12 }
0x1247   : > { %5506 = vmatpush3.bf16.msra.mxu0 %v5503_v12  ;;  %6105 = vpow2.f32 %v3506_v37  ;;  %v7735_v37 = vld [vmem:[#allocation7_spill] sm:$0xff] }
0x1248   : > { %v7378_v6 = vpop.eup %6097 }
0x1249   : > { %v7380_v60 = vpop.eup %6099  ;;  %v3519_v43 = vsel %vm292_vm0, %v7378_v6, 0.0 }
0x124a   : > { %3520 = vadd.xlane.f32.xlu0 %v3519_v43  ;;  %v3522_v24 = vsel %vm292_vm0, %v7380_v60, 0.0 }
0x124b   : > { %3523 = vadd.xlane.f32.xlu1 %v3522_v24 }
0x124c   : > { %v7386_v5 = vpop.eup %6101 }
0x124d   : > { %v3525_v19 = vsel %vm292_vm0, %v7386_v5, 0.0 }
0x124e   : > { %3526 = vadd.xlane.f32.xlu0 %v3525_v19 }
0x1250   : > { %v7390_v22 = vpop.eup %6103 }
0x1251   : > { %v3531_v56 = vsel %vm292_vm0, %v7390_v22, 0.0  ;;  %v7394_v23 = vpop.eup %6105 }
0x1252   : > { %3532 = vadd.xlane.f32.xlu0 %v3531_v56  ;;  %v3528_v16 = vsel %vm292_vm0, %v7394_v23, 0.0 }
0x1256   : > { %3529 = vadd.xlane.f32.xlu0 %v3528_v16 }
0x125c   : > { %5858 = vrot.lane.b32.xlu1 %v6301_v10, %s6154_s7  ;;  %v7716_v10 = vld [vmem:[#allocation12_spill] sm:$0xff] }
0x1260   : > { %5863 = vrot.lane.b32.xlu1 %v6313_v21, %s6154_s7  ;;  %v7717_v21 = vld [vmem:[#allocation22_spill] sm:$0xff] }
0x1264   : > { %3711 = vrot.lane.b32.xlu1 %v6642_v42, %s6153_s29  ;;  %v7719_v42 = vld [vmem:[#allocation17_spill] sm:$0xff] }
0x1268   : > { %3719 = vrot.lane.b32.xlu1 %v6650_v20, %s6153_s29  ;;  %v7723_v20 = vld [vmem:[#allocation21_spill] sm:$0xff] }
0x126c   : > { %3721 = vrot.lane.b32.xlu1 %v6648_v15, %s6153_s29  ;;  %5853 = vrot.lane.b32.xlu0 %v6293_v63, %s6154_s7  ;;  %v7715_v63 = vld [vmem:[#allocation25_spill] sm:$0xff]  ;;  %v7722_v15 = vld [vmem:[#allocation16_spill] sm:$0xff] }
0x1270   : > { %3751 = vrot.lane.b32.xlu1 %v6790_v45, %s6151_s27  ;;  %3713 = vrot.lane.b32.xlu0 %v6640_v59, %s6153_s29  ;;  %v7718_v59 = vld [vmem:[#allocation13_spill] sm:$0xff]  ;;  %v7729_v45 = vld [vmem:[#allocation26_spill] sm:$0xff] }
0x1274   : > { %3753 = vrot.lane.b32.xlu1 %v6788_v50, %s6151_s27  ;;  %3743 = vrot.lane.b32.xlu0 %v6782_v30, %s6151_s27  ;;  %v7727_v30 = vld [vmem:[#allocation27_spill] sm:$0xff]  ;;  %v7728_v50 = vld [vmem:[#allocation18_spill] sm:$0xff] }
0x1278   : > { %3783 = vrot.lane.b32.xlu1 %v6930_v32, %s6149_s26  ;;  %3745 = vrot.lane.b32.xlu0 %v6780_v17, %s6151_s27  ;;  %v7726_v17 = vld [vmem:[#allocation19_spill] sm:$0xff] }
0x127c   : > { %3785 = vrot.lane.b32.xlu1 %v6928_v2, %s6149_s26  ;;  %3775 = vrot.lane.b32.xlu0 %v6922_v62, %s6149_s26 }
0x1280   : > { %3815 = vrot.lane.b32.xlu1 %v7070_v35, %s6147_s24  ;;  %3777 = vrot.lane.b32.xlu0 %v6920_v3, %s6149_s26  ;;  %v7731_v3 = vld [vmem:[#allocation23_spill] sm:$0xff] }
0x1284   : > { %3723 = vrot.lane.b32.xlu1 %v6654_v29, %s6153_s29  ;;  %3807 = vrot.lane.b32.xlu0 %v7062_v38, %s6147_s24  ;;  %v7725_v29 = vld [vmem:[#allocation20_spill] sm:$0xff] }
0x1288   : > { %3817 = vrot.lane.b32.xlu1 %v7068_v51, %s6147_s24  ;;  %3715 = vrot.lane.b32.xlu0 %v6646_v14, %s6153_s29  ;;  %v7721_v14 = vld [vmem:[#allocation15_spill] sm:$0xff] }
0x128c   : > { %3847 = vrot.lane.b32.xlu1 %v7210_v33, %s6145_s21  ;;  %3809 = vrot.lane.b32.xlu0 %v7060_v47, %s6147_s24 }
0x1290   : > { %3725 = vrot.lane.b32.xlu1 %v6652_v28, %s6153_s29  ;;  %3839 = vrot.lane.b32.xlu0 %v7202_v48, %s6145_s21  ;;  %v7724_v28 = vld [vmem:[#allocation14_spill] sm:$0xff] }
0x1294   : > { %3755 = vrot.lane.b32.xlu1 %v6794_v53, %s6151_s27  ;;  %3717 = vrot.lane.b32.xlu0 %v6644_v13, %s6153_s29  ;;  %v7720_v13 = vld [vmem:[#allocation11_spill] sm:$0xff]  ;;  %v7730_v53 = vld [vmem:[#allocation24_spill] sm:$0xff] }
0x1298   : > { %3849 = vrot.lane.b32.xlu1 %v7715_v63, %s6145_s21  ;;  %3747 = vrot.lane.b32.xlu0 %v7716_v10, %s6151_s27 }
0x129c   : > { %3879 = vrot.lane.b32.xlu1 %v7350_v34, %s6143_s19  ;;  %3841 = vrot.lane.b32.xlu0 %v7717_v21, %s6145_s21  ;;  %v7732_v34 = vld [vmem:[#allocation4_spill] sm:$0xff] }
0x12a0   : > { %3757 = vrot.lane.b32.xlu1 %v7718_v59, %s6151_s27  ;;  %3871 = vrot.lane.b32.xlu0 %v7342_v8, %s6143_s19 }
0x12a4   : > { %3787 = vrot.lane.b32.xlu1 %v7719_v42, %s6149_s26  ;;  %3749 = vrot.lane.b32.xlu0 %v7720_v13, %s6151_s27 }
0x12a8   : > { %3881 = vrot.lane.b32.xlu1 %v7348_v54, %s6143_s19  ;;  %3779 = vrot.lane.b32.xlu0 %v7721_v14, %s6149_s26 }
0x12ac   : > { %3789 = vrot.lane.b32.xlu1 %v7722_v15, %s6149_s26  ;;  %3873 = vrot.lane.b32.xlu0 %v7340_v31, %s6143_s19 }
0x12b0   : > { %3819 = vrot.lane.b32.xlu1 %v7723_v20, %s6147_s24  ;;  %3781 = vrot.lane.b32.xlu0 %v7724_v28, %s6149_s26 }
0x12b4   : > { %3821 = vrot.lane.b32.xlu1 %v7725_v29, %s6147_s24  ;;  %3811 = vrot.lane.b32.xlu0 %v7726_v17, %s6147_s24 }
0x12b8   : > { %3851 = vrot.lane.b32.xlu1 %v7727_v30, %s6145_s21  ;;  %3813 = vrot.lane.b32.xlu0 %v7728_v50, %s6147_s24 }
0x12bc   : > { %3853 = vrot.lane.b32.xlu1 %v7729_v45, %s6145_s21  ;;  %3843 = vrot.lane.b32.xlu0 %v7730_v53, %s6145_s21 }
0x12c0   : > { %3883 = vrot.lane.b32.xlu1 %v7354_v57, %s6143_s19  ;;  %3845 = vrot.lane.b32.xlu0 %v7731_v3, %s6145_s21 }
0x12c4   : > { %3885 = vrot.lane.b32.xlu1 %v7352_v55, %s6143_s19  ;;  %3875 = vrot.lane.b32.xlu0 %v7346_v1, %s6143_s19 }
0x12c8   : > { %3877 = vrot.lane.b32.xlu0 %v7344_v46, %s6143_s19 }
0x12ce   : > { %v3515_v2 = vpop.xlane.xlu0 %3514 }
0x12cf   : > { %v3512_v62 = vpop.xlane.xlu1 %3511 }
0x12d0   : > { %6107 = vrcp.f32 %v3512_v62 }
0x12d1   : > { %6109 = vrcp.f32 %v3515_v2 }
0x12d3   : > { %v3518_v32 = vpop.xlane.xlu1 %3517 }
0x12d4   : > { %6111 = vrcp.f32 %v3518_v32 }
0x12d7   : > { %v3521_v47 = vpop.xlane.xlu0 %3520 }
0x12d8   : > { %v3524_v38 = vpop.xlane.xlu1 %3523  ;;  %6113 = vrcp.f32 %v3521_v47 }
0x12d9   : > { %6115 = vrcp.f32 %v3524_v38 }
0x12da   : > { %v6108_v51 = vpop.eup %6107 }
0x12db   : > { %v3527_v35 = vpop.xlane.xlu0 %3526  ;;  %v3542_v48 = vmul.f32 %v6108_v51, %v7368_v36  ;;  %v6110_v56 = vpop.eup %6109 }
0x12dc   : > { %v5859_v33 = vpop.permute.xlu1 %5858  ;;  %6117 = vrcp.f32 %v3527_v35  ;;  %v3543_v42 = vmul.f32 %v6110_v56, %v7366_v49 }
0x12dd   : > { %5143 = vmatprep.mubr.msk.f32.mxu0 %vm292_vm0, %v3542_v48  ;;  %v5861_v57 = vunpack.i.h.bf16 %v5859_v33  ;;  %v5860_v58 = vunpack.i.l.bf16 %v5859_v33  ;;  %v7736_v33 = vld [vmem:[#allocation6_spill] sm:$0xff] }
0x12de   : > { %v6112_v63 = vpop.eup %6111 }
0x12df   : > { %v3533_v31 = vpop.xlane.xlu0 %3532  ;;  %v5511_v26 = vpack.c.bf16 %v5861_v57, %v5860_v58  ;;  %v3544_v15 = vmul.f32 %v6112_v63, %v7374_v61  ;;  %v3991_v57 = vld [vmem:[%s7684_s3 + $0x10] sm:$0xff] }
0x12e0   : > { %v5864_v8 = vpop.permute.xlu1 %5863 }
0x12e1   : > { %v5866_v39 = vunpack.i.h.bf16 %v5864_v8  ;;  %v5865_v18 = vunpack.i.l.bf16 %v5864_v8 }
0x12e2   : > { %v6114_v13 = vpop.eup %6113 }
0x12e3   : > { %v3530_v54 = vpop.xlane.xlu0 %3529  ;;  %v5515_v11 = vpack.c.bf16 %v5866_v39, %v5865_v18  ;;  %v6116_v20 = vpop.eup %6115  ;;  %v3545_v30 = vmul.f32 %v6114_v13, %v7378_v6 }
0x12e4   : > { %v3712_v1 = vpop.permute.xlu1 %3711  ;;  %6119 = vrcp.f32 %v3530_v54  ;;  %v3546_v49 = vmul.f32 %v6116_v20, %v7380_v60 }
0x12e5   : > { %v3927_v46 = vsel %vm462_vm1, %v7732_v34, %v3712_v1  ;;  %6121 = vrcp.f32 %v3533_v31 }
0x12e6   : > { %v6118_v50 = vpop.eup %6117 }
0x12e7   : > { %v5854_v55 = vpop.permute.xlu0 %5853  ;;  %v3547_v2 = vmul.f32 %v6118_v50, %v7386_v5 }
0x12e8   : > { %v5856_v7 = vunpack.i.h.bf16 %v5854_v55  ;;  %v5855_v52 = vunpack.i.l.bf16 %v5854_v55  ;;  %v3720_v9 = vpop.permute.xlu1 %3719  ;;  %v3990_v55 = vld [vmem:[%s7684_s3 + $0x8] sm:$0xff] }
0x12e9   : > { %v3931_v36 = vsel %vm462_vm1, %v7733_v40, %v3720_v9  ;;  %v3993_v9 = vld [vmem:[%s7684_s3 + $0x20] sm:$0xff]  ;;  %v3994_v40 = vld [vmem:[%s7684_s3 + $0x28] sm:$0xff] }
0x12ea   : > { %v5507_v25 = vpack.c.bf16 %v5856_v7, %v5855_v52  ;;  %v3992_v7 = vld [vmem:[%s7684_s3 + $0x18] sm:$0xff] }
0x12eb   : > { %v3714_v0 = vpop.permute.xlu0 %3713  ;;  %v5523_v52 = vpack.c.bf16 %v3992_v7, %v3991_v57 }
0x12ec   : > { %v3928_v27 = vsel %vm462_vm1, %v7734_v41, %v3714_v0  ;;  %v3722_v44 = vpop.permute.xlu1 %3721  ;;  %5508 = vmatprep.subr.bf16.mxu0 %v5507_v25  ;;  %v3996_v0 = vld [vmem:[%s7684_s3 + $0x38] sm:$0xff] }
0x12ed   : > { %v3932_v4 = vsel %vm462_vm1, %v7735_v37, %v3722_v44  ;;  %5510 = vmatpush3.bf16.msra.mxu0 %v5507_v25  ;;  %v3995_v25 = vld [vmem:[%s7684_s3 + $0x30] sm:$0xff] }
0x12ee   : > { %5512 = vmatprep.subr.bf16.mxu0 %v5511_v26  ;;  %v6120_v53 = vpop.eup %6119 }
0x12ef   : > { %v3744_v12 = vpop.permute.xlu0 %3743  ;;  %v6122_v32 = vpop.eup %6121  ;;  %v3548_v6 = vmul.f32 %v6120_v53, %v7394_v23  ;;  %v7737_v23 = vld [vmem:[#allocation10_spill] sm:$0xff] }
0x12f0   : > { %v3936_v43 = vsel %vm3935_vm3, %v3927_v46, %v3744_v12  ;;  %v3752_v24 = vpop.permute.xlu1 %3751  ;;  %v3549_v35 = vmul.f32 %v6122_v32, %v7390_v22  ;;  %v3989_v22 = vld [vmem:[%s7684_s3] sm:$0xff] }
0x12f1   : > { %v3940_v19 = vsel %vm3935_vm3, %v3931_v36, %v3752_v24  ;;  %5514 = vmatpush3.bf16.msra.mxu0 %v5511_v26  ;;  %v5519_v58 = vpack.c.bf16 %v3990_v55, %v3989_v22  ;;  %v5527_v36 = vpack.c.bf16 %v3994_v40, %v3993_v9  ;;  %v5531_v26 = vpack.c.bf16 %v3996_v0, %v3995_v25 }
0x12f2   : > { %5516 = vmatprep.subr.bf16.mxu0 %v5515_v11 }
0x12f3   : > { %v3746_v16 = vpop.permute.xlu0 %3745  ;;  %5535 = vmatprep.subr.bf16.mxu1 %v5519_v58 }
0x12f4   : > { %v3937_v10 = vsel %vm3935_vm3, %v3928_v27, %v3746_v16  ;;  %v3754_v21 = vpop.permute.xlu1 %3753  ;;  %5539 = vmatpush3.bf16.msra.mxu1 %v5519_v58 }
0x12f5   : > { %v3941_v59 = vsel %vm3935_vm3, %v3932_v4, %v3754_v21  ;;  %5518 = vmatpush3.bf16.msra.mxu0 %v5515_v11  ;;  %5536 = vmatprep.subr.bf16.mxu1 %v5523_v52 }
0x12f6   : > { %5520 = vmatprep.subr.bf16.mxu0 %v5519_v58 }
0x12f7   : > { %v3776_v14 = vpop.permute.xlu0 %3775 }
0x12f8   : > { %v3945_v28 = vsel %vm3944_vm4, %v3936_v43, %v3776_v14  ;;  %v3784_v29 = vpop.permute.xlu1 %3783  ;;  %5144 = vmatmul.mubr.msk.f32.vlgmr.msra.gmra.mrb[72].mxu0 %vm292_vm0, %v3543_v42  ;;  %5540 = vmatpush3.bf16.msra.mxu1 %v5523_v52 }
0x12f9   : > { %v3949_v17 = vsel %vm3944_vm4, %v3940_v19, %v3784_v29  ;;  %5146 = vmatprep.mubr.msk.f32.mxu0 %vm292_vm0, %v3544_v15  ;;  %5522 = vmatpush3.bf16.msra.mxu0 %v5519_v58 }
0x12fa   : > { %5524 = vmatprep.subr.bf16.mxu0 %v5523_v52  ;;  %5537 = vmatprep.subr.bf16.mxu1 %v5527_v36 }
0x12fb   : > { %v3778_v45 = vpop.permute.xlu0 %3777 }
0x12fc   : > { %v3946_v3 = vsel %vm3944_vm4, %v3937_v10, %v3778_v45  ;;  %v3786_v61 = vpop.permute.xlu1 %3785  ;;  %5147 = vmatmul.mubr.msk.f32.gmra.mrb[74].mxu0 %vm292_vm0, %v3545_v30  ;;  %5541 = vmatpush3.bf16.msra.mxu1 %v5527_v36 }
0x12fd   : > { %v3950_v62 = vsel %vm3944_vm4, %v3941_v59, %v3786_v61  ;;  %5149 = vmatprep.mubr.msk.f32.mxu0 %vm292_vm0, %v3546_v49  ;;  %5526 = vmatpush3.bf16.msra.mxu0 %v5523_v52 }
0x12fe   : > { %5528 = vmatprep.subr.bf16.mxu0 %v5527_v36  ;;  %5538 = vmatprep.subr.bf16.mxu1 %v5531_v26 }
0x12ff   : > { %v3808_v47 = vpop.permute.xlu0 %3807 }
0x1300   : > { %v7529_v38 = vsel %vm3953_vm5, %v3945_v28, %v3808_v47  ;;  %v3816_v60 = vpop.permute.xlu1 %3815  ;;  %5150 = vmatmul.mubr.msk.f32.gmra.mrb[76].mxu0 %vm292_vm0, %v3547_v2  ;;  %5542 = vmatpush3.bf16.msra.mxu1 %v5531_v26 }
0x1301   : > { %v7533_v51 = vsel %vm3953_vm5, %v3949_v17, %v3816_v60  ;;  %5152 = vmatprep.mubr.msk.f32.mxu0 %vm292_vm0, %v3548_v6  ;;  %5530 = vmatpush3.bf16.msra.mxu0 %v5527_v36 }
0x1302   : > { %5532 = vmatprep.subr.bf16.mxu0 %v5531_v26 }
0x1303   : > { %v3716_v48 = vpop.permute.xlu0 %3715 }
0x1304   : > { %v7539_v5 = vsel %vm462_vm1, %v7736_v33, %v3716_v48  ;;  %v3724_v31 = vpop.permute.xlu1 %3723  ;;  %5153 = vmatmul.mubr.msk.f32.gmra.mrb[78].mxu0 %vm292_vm0, %v3549_v35 }
0x1305   : > { %v7544_v8 = vsel %vm462_vm1, %v7737_v23, %v3724_v31  ;;  %5534 = vmatpush3.bf16.msra.mxu0 %v5531_v26 }
0x1307   : > { %v3810_v54 = vpop.permute.xlu0 %3809 }
0x1308   : > { %v7547_v1 = vsel %vm3953_vm5, %v3946_v3, %v3810_v54  ;;  %v3818_v34 = vpop.permute.xlu1 %3817 }
0x1309   : > { %v7550_v46 = vsel %vm3953_vm5, %v3950_v62, %v3818_v34 }
0x130b   : > { %v3840_v11 = vpop.permute.xlu0 %3839 }
0x130c   : > { %v3848_v24 = vpop.permute.xlu1 %3847  ;;  %v3963_v60 = vsel %vm3962_vm6, %v7529_v38, %v3840_v11 }
0x130d   : > { %v3967_v0 = vsel %vm3962_vm6, %v7533_v51, %v3848_v24 }
0x130f   : > { %v3718_v43 = vpop.permute.xlu0 %3717 }
0x1310   : > { %v7584_v56 = vpop.permute.xlu1 %3725 }
0x1313   : > { %v3748_v19 = vpop.permute.xlu0 %3747 }
0x1314   : > { %v3756_v63 = vpop.permute.xlu1 %3755  ;;  %v3938_v35 = vsel %vm3935_vm3, %v7539_v5, %v3748_v19  ;;  %v7738_v5 = vld [vmem:[#allocation5_spill] sm:$0xff] }
0x1315   : > { %v3930_v57 = vsel %vm462_vm1, %v7738_v5, %v3718_v43 }
0x1317   : > { %v3842_v16 = vpop.permute.xlu0 %3841 }
0x1318   : > { %v3850_v21 = vpop.permute.xlu1 %3849  ;;  %v3964_v48 = vsel %vm3962_vm6, %v7547_v1, %v3842_v16 }
0x131b   : > { %v3872_v10 = vpop.permute.xlu0 %3871 }
0x131c   : > { %v3880_v42 = vpop.permute.xlu1 %3879  ;;  %v3972_v33 = vsel %vm3971_vm7, %v3963_v60, %v3872_v10 }
0x131f   : > { %v3750_v59 = vpop.permute.xlu0 %3749 }
0x1320   : > { %v7586_v14 = vpop.permute.xlu1 %3757  ;;  %v3939_v58 = vsel %vm3935_vm3, %v3930_v57, %v3750_v59  ;;  %v6127_v57 = vld [vmem:[%s6257_s13 + $0x28] sm:$0xff] }
0x1323   : > { %v3780_v13 = vpop.permute.xlu0 %3779 }
0x1324   : > { %v3788_v20 = vpop.permute.xlu1 %3787  ;;  %v3947_v54 = vsel %vm3944_vm4, %v3938_v35, %v3780_v13 }
0x1327   : > { %v3874_v15 = vpop.permute.xlu0 %3873 }
0x1328   : > { %v3882_v29 = vpop.permute.xlu1 %3881  ;;  %v3973_v34 = vsel %vm3971_vm7, %v3964_v48, %v3874_v15 }
0x132b   : > { %v3782_v28 = vpop.permute.xlu0 %3781 }
0x132c   : > { %v3790_v30 = vpop.permute.xlu1 %3789  ;;  %v3948_v40 = vsel %vm3944_vm4, %v3939_v58, %v3782_v28  ;;  %v6128_v58 = vld [vmem:[%s6257_s13 + $0x20] sm:$0xff] }
0x132f   : > { %v3812_v17 = vpop.permute.xlu0 %3811 }
0x1330   : > { %v3820_v45 = vpop.permute.xlu1 %3819  ;;  %v3956_v55 = vsel %vm3953_vm5, %v3947_v54, %v3812_v17 }
0x1333   : > { %v3814_v50 = vpop.permute.xlu0 %3813 }
0x1334   : > { %v3822_v53 = vpop.permute.xlu1 %3821  ;;  %v3957_v25 = vsel %vm3953_vm5, %v3948_v40, %v3814_v50 }
0x1337   : > { %v3844_v49 = vpop.permute.xlu0 %3843 }
0x1338   : > { %v3852_v61 = vpop.permute.xlu1 %3851  ;;  %v3965_v1 = vsel %vm3962_vm6, %v3956_v55, %v3844_v49 }
0x133b   : > { %v3846_v3 = vpop.permute.xlu0 %3845 }
0x133c   : > { %v3854_v2 = vpop.permute.xlu1 %3853  ;;  %v3966_v26 = vsel %vm3962_vm6, %v3957_v25, %v3846_v3 }
0x133f   : > { %v3876_v62 = vpop.permute.xlu0 %3875 }
0x1340   : > { %v3884_v47 = vpop.permute.xlu1 %3883  ;;  %v3974_v7 = vsel %vm3971_vm7, %v3965_v1, %v3876_v62 }
0x1343   : > { %v3878_v32 = vpop.permute.xlu0 %3877 }
0x1344   : > { %v3886_v31 = vpop.permute.xlu1 %3885 }
0x13cb   : > { %v5145_v39 = vpop.f32.mrb[72].mxu0 }
0x13cc   : > { %3905 = vrot.lane.b32.xlu0 %v5145_v39, %s6141_s17  ;;  %v3664_v18 = vpop.f32.mrb[73].mxu0  ;;  %v3942_v39 = vsel %vm3935_vm3, %v7544_v8, %v3756_v63 }
0x13cf   : > { %v5148_v41 = vpop.f32.mrb[74].mxu0 }
0x13d0   : > { %3903 = vrot.lane.b32.xlu0 %v3664_v18, %s6141_s17  ;;  %v3674_v27 = vpop.f32.mrb[75].mxu0  ;;  %v3968_v18 = vsel %vm3962_vm6, %v7550_v46, %v3850_v21  ;;  %v7739_v46 = vld [vmem:[#allocation9_spill] sm:$0xff] }
0x13d1   : > { %v3934_v24 = vsel %vm462_vm1, %v7739_v46, %v7584_v56 }
0x13d2   : > { %v3943_v16 = vsel %vm3935_vm3, %v3934_v24, %v7586_v14 }
0x13d3   : > { %v5151_v44 = vpop.f32.mrb[76].mxu0  ;;  %v3952_v21 = vsel %vm3944_vm4, %v3943_v16, %v3790_v30 }
0x13d4   : > { %3907 = vrot.lane.b32.xlu0 %v3674_v27, %s6141_s17  ;;  %3913 = vrot.lane.b32.xlu1 %v5151_v44, %s6141_s17  ;;  %v3684_v37 = vpop.f32.mrb[77].mxu0  ;;  %v3975_v27 = vsel %vm3971_vm7, %v3966_v26, %v3878_v32  ;;  %v6129_v26 = vld [vmem:[%s6257_s13 + $0x38] sm:$0xff] }
0x13d7   : > { %v5154_v4 = vpop.f32.mrb[78].mxu0 }
0x13d8   : > { %3909 = vrot.lane.b32.xlu0 %v5148_v41, %s6141_s17  ;;  %3911 = vrot.lane.b32.xlu1 %v3684_v37, %s6141_s17  ;;  %v3694_v12 = vpop.f32.mrb[79].mxu0  ;;  %v3976_v41 = vsel %vm3971_vm7, %v3967_v0, %v3880_v42  ;;  %v3961_v42 = vsel %vm3953_vm5, %v3952_v21, %v3822_v53  ;;  %v6123_v53 = vld [vmem:[%s6257_s13 + $0x8] sm:$0xff] }
0x13d9   : > { %v3970_v56 = vsel %vm3962_vm6, %v3961_v42, %v3854_v2 }
0x13da   : > { %v3979_v13 = vsel %vm3971_vm7, %v3970_v56, %v3886_v31 }
0x13dc   : > { %3915 = vrot.lane.b32.xlu1 %v3694_v12, %s6141_s17  ;;  %v3977_v12 = vsel %vm3971_vm7, %v3968_v18, %v3882_v29  ;;  %v6130_v18 = vld [vmem:[%s6257_s13 + $0x30] sm:$0xff] }
0x13e0   : > { %3917 = vrot.lane.b32.xlu1 %v5154_v4, %s6141_s17  ;;  %v3951_v4 = vsel %vm3944_vm4, %v3942_v39, %v3788_v20  ;;  %s4133_s17 = sld [smem:[#allocation2]]  ;;  %v4424_v20 = vld [vmem:[%s7685_s4] ss:$0 sm:$0xff] }
0x13e1   : > { %v3960_v43 = vsel %vm3953_vm5, %v3951_v4, %v3820_v45 }
0x13e2   : > { %v3969_v19 = vsel %vm3962_vm6, %v3960_v43, %v3852_v61  ;;  %v6124_v61 = vld [vmem:[%s6257_s13] sm:$0xff] }
0x13e3   : > { %v3978_v63 = vsel %vm3971_vm7, %v3969_v19, %v3884_v47 }
0x13e6   : > { %v4134_v29 = vstv %s4133_s17 }
0x143e   : > { %v3906_v6 = vpop.permute.xlu0 %3905 }
0x143f   : > { %v3982_v38 = vsel %vm3980_vm8, %v3973_v34, %v3906_v6  ;;  %v6125_v34 = vld [vmem:[%s6257_s13 + $0x18] sm:$0xff] }
0x1442   : > { %v3904_v23 = vpop.permute.xlu0 %3903 }
0x1443   : > { %v3981_v22 = vsel %vm3980_vm8, %v3972_v33, %v3904_v23 }
0x1444   : > { %5171 = vmatprep.mubr.msk.f32.mxu0 %vm292_vm0, %v3981_v22 }
0x1445   : > { %5172 = vmatmul.mubr.msk.f32.vlgmr.msra.gmra.mrb[80].mxu0 %vm292_vm0, %v3982_v38  ;;  %v6126_v38 = vld [vmem:[%s6257_s13 + $0x10] sm:$0xff] }
0x1446   : > { %v3908_v52 = vpop.permute.xlu0 %3907  ;;  %v3914_v9 = vpop.permute.xlu1 %3913 }
0x1447   : > { %v3983_v36 = vsel %vm3980_vm8, %v3974_v7, %v3908_v52  ;;  %v3986_v8 = vsel %vm3980_vm8, %v3977_v12, %v3914_v9 }
0x1448   : > { %5174 = vmatprep.mubr.msk.f32.mxu0 %vm292_vm0, %v3983_v36 }
0x144a   : > { %v3910_v44 = vpop.permute.xlu0 %3909  ;;  %v3912_v37 = vpop.permute.xlu1 %3911 }
0x144b   : > { %v3984_v51 = vsel %vm3980_vm8, %v3975_v27, %v3910_v44  ;;  %v3985_v11 = vsel %vm3980_vm8, %v3976_v41, %v3912_v37 }
0x144c   : > { %5175 = vmatmul.mubr.msk.f32.gmra.mrb[82].mxu0 %vm292_vm0, %v3984_v51  ;;  %5177 = vmatprep.mubr.msk.f32.mxu1 %vm292_vm0, %v3985_v11 }
0x144d   : > { %5178 = vmatmul.mubr.msk.f32.vlgmr.msra.gmra.mrb[64].mxu1 %vm292_vm0, %v3986_v8 }
0x144e   : > { %v3916_v10 = vpop.permute.xlu1 %3915 }
0x144f   : > { %v3987_v59 = vsel %vm3980_vm8, %v3978_v63, %v3916_v10 }
0x1450   : > { %5180 = vmatprep.mubr.msk.f32.mxu1 %vm292_vm0, %v3987_v59 }
0x1452   : > { %v3918_v15 = vpop.permute.xlu1 %3917 }
0x1453   : > { %v3988_v14 = vsel %vm3980_vm8, %v3979_v13, %v3918_v15 }
0x1454   : > { %5181 = vmatmul.mubr.msk.f32.gmra.mrb[66].mxu1 %vm292_vm0, %v3988_v14 }
0x1518   : > { %v5173_v28 = vpop.f32.mrb[80].mxu0 }
0x1519   : > { %v4100_v17 = vadd.f32 %v5173_v28, %v4424_v20  ;;  %v4094_v30 = vpop.f32.mrb[81].mxu0 }
0x151a   : > { %v4095_v50 = vadd.f32 %v4424_v20, %v4094_v30 }
0x151b   : > { %v4136_v45 = vmul.f32 %v4134_v29, %v4100_v17 }
0x151c   : > { %v4135_v49 = vmul.f32 %v4134_v29, %v4095_v50 }
0x151d   : > { %v4144_v3 = vadd.f32 %v6123_v53, %v4136_v45 }
0x151e   : > { %v4143_v62 = vadd.f32 %v6124_v61, %v4135_v49 }
0x151f   : > { %4152 = vst.msk [vmem:[%s7652_s8 + $0x8] sm:$0xff] %vm292_vm0, %v4144_v3  ;;  %v5176_v2 = vpop.f32.mrb[82].mxu0 }
0x1520   : > { %4151 = vst.msk [vmem:[%s7652_s8] sm:$0xff] %vm292_vm0, %v4143_v62  ;;  %v4110_v32 = vadd.f32 %v5176_v2, %v4424_v20  ;;  %v4104_v47 = vpop.f32.mrb[83].mxu0  ;;  %v5179_v6 = vpop.f32.mrb[64].mxu1 }
0x1521   : > { %v4105_v60 = vadd.f32 %v4424_v20, %v4104_v47  ;;  %v4120_v35 = vadd.f32 %v5179_v6, %v4424_v20  ;;  %v4114_v48 = vpop.f32.mrb[65].mxu1 }
0x1522   : > { %v4138_v33 = vmul.f32 %v4134_v29, %v4110_v32  ;;  %v4115_v31 = vadd.f32 %v4424_v20, %v4114_v48 }
0x1523   : > { %v4137_v23 = vmul.f32 %v4134_v29, %v4105_v60  ;;  %v4140_v54 = vmul.f32 %v4134_v29, %v4120_v35 }
0x1524   : > { %v4146_v22 = vadd.f32 %v6125_v34, %v4138_v33  ;;  %v4139_v55 = vmul.f32 %v4134_v29, %v4115_v31 }
0x1525   : > { %v4145_v5 = vadd.f32 %v6126_v38, %v4137_v23  ;;  %v4148_v1 = vadd.f32 %v6127_v57, %v4140_v54 }
0x1526   : > { %4154 = vst.msk [vmem:[%s7652_s8 + $0x18] sm:$0xff] %vm292_vm0, %v4146_v22  ;;  %v4147_v7 = vadd.f32 %v6128_v58, %v4139_v55 }
0x1527   : > { %4153 = vst.msk [vmem:[%s7652_s8 + $0x10] sm:$0xff] %vm292_vm0, %v4145_v5  ;;  %4156 = vst.msk [vmem:[%s7652_s8 + $0x28] sm:$0xff] %vm292_vm0, %v4148_v1  ;;  %v5182_v52 = vpop.f32.mrb[66].mxu1 }
0x1528   : > { %4155 = vst.msk [vmem:[%s7652_s8 + $0x20] sm:$0xff] %vm292_vm0, %v4147_v7  ;;  %v4130_v9 = vadd.f32 %v5182_v52, %v4424_v20  ;;  %v4124_v40 = vpop.f32.mrb[67].mxu1 }
0x1529   : > { %v4125_v36 = vadd.f32 %v4424_v20, %v4124_v40 }
0x152a   : > { %v4142_v25 = vmul.f32 %v4134_v29, %v4130_v9 }
0x152b   : > { %v4141_v0 = vmul.f32 %v4134_v29, %v4125_v36 }
0x152c   : > { %v4150_v39 = vadd.f32 %v6129_v26, %v4142_v25 }
0x152d   : > { %v4149_v41 = vadd.f32 %v6130_v18, %v4141_v0 }
0x152e   : > { %4158 = vst.msk [vmem:[%s7652_s8 + $0x38] sm:$0xff] %vm292_vm0, %v4150_v39 }
0x152f   : > { %4157 = vst.msk [vmem:[%s7652_s8 + $0x30] sm:$0xff] %vm292_vm0, %v4149_v41 }
0x1530 PF: > { %s17_s23 = sadd.s32 1, %s6137_s23  }
0x1531   : > { %p14_p4 = scmp.ge.s32.totalorder %s17_s23, 4  }
0x1533   :  { %16 = sbr.rel (!%p14_p4) target bundleno = 2 (0x2), region = 74 }

</bundles_post_ra>
